<compile_context>
chip_gen: v6e
topology: v6e:2x2x1
jax: 0.10.0
libtpu: 0.0.40
codegen_flags: <defaults>
</compile_context>

<pallas_src>
import functools

import jax
import jax.numpy as jnp
from jax.experimental import pallas as pl
from jax.experimental.pallas import tpu as pltpu

NEG_SLOPE = 0.2  # nn.LeakyReLU(0.2)


# --------------------------------------------------------------------------
# Fused 3x3 conv (pad=1, stride 1 or 2) + bias + LeakyReLU(0.2), batch folded.
# --------------------------------------------------------------------------
def _conv3x3_lrelu_kernel(x_ref, w_ref, b_ref, o_ref, *, stride):
    # x_ref: (N, H+2, W+2, Cin)  spatially pre-padded input (NHWC)
    # w_ref: (3, 3, Cin, Cout)   conv weights (HWIO)
    # b_ref: (1, Cout)           bias
    # o_ref: (N, Ho, Wo, Cout)   conv + LeakyReLU output (Ho = H//stride)
    N, Hp, Wp, Cin = x_ref.shape
    H, W = Hp - 2, Wp - 2
    Ho, Wo = o_ref.shape[1], o_ref.shape[2]
    Cout = o_ref.shape[-1]

    xp = x_ref[...]                                   # (N, H+2, W+2, Cin)
    acc = jnp.zeros((N * H * W, Cout), jnp.float32)
    # 3x3 conv as 9 shifted (N*H*W, Cin) @ (Cin, Cout) MXU matmuls.
    for dy in range(3):
        for dx in range(3):
            patch = xp[:, dy:dy + H, dx:dx + W, :].reshape(N * H * W, Cin)
            acc = acc + jnp.dot(patch, w_ref[dy, dx],
                                preferred_element_type=jnp.float32)
    acc = acc + b_ref[...]                            # (1, Cout) broadcast
    acc = jnp.where(acc >= 0, acc, NEG_SLOPE * acc)   # LeakyReLU(0.2)

    if stride == 1:
        y = acc.reshape(N, Ho, Wo, Cout)
    else:
        # y_strided[i, j] == y_full[stride*i, stride*j] for k=3, pad=1.
        y = acc.reshape(N, Ho, stride, Wo, stride, Cout)[:, :, 0, :, 0, :]
    o_ref[...] = y.astype(o_ref.dtype)


def conv3x3_lrelu(x_nhwc, w_hwio, b, stride):
    """x_nhwc: (N, H, W, Cin); w_hwio: (3, 3, Cin, Cout); b: (Cout,)."""
    N, H, W, Cin = x_nhwc.shape
    Cout = w_hwio.shape[-1]
    if stride == 2:
        assert H % 2 == 0 and W % 2 == 0, "stride-2 layers expect even H, W"
    Ho, Wo = H // stride, W // stride

    x_pad = jnp.pad(x_nhwc, ((0, 0), (1, 1), (1, 1), (0, 0)))
    b2 = b.reshape(1, Cout).astype(jnp.float32)

    kernel = functools.partial(_conv3x3_lrelu_kernel, stride=stride)
    return pl.pallas_call(
        kernel,
        out_shape=jax.ShapeDtypeStruct((N, Ho, Wo, Cout), jnp.float32),
        grid_spec=pltpu.PrefetchScalarGridSpec(
            num_scalar_prefetch=0,
            grid=(1,),
            in_specs=[
                pl.BlockSpec((N, H + 2, W + 2, Cin), lambda i: (0, 0, 0, 0)),
                pl.BlockSpec((3, 3, Cin, Cout), lambda i: (0, 0, 0, 0)),
                pl.BlockSpec((1, Cout), lambda i: (0, 0)),
            ],
            out_specs=pl.BlockSpec((N, Ho, Wo, Cout), lambda i: (0, 0, 0, 0)),
        ),
        compiler_params=pltpu.CompilerParams(
            dimension_semantics=("arbitrary",)),
    )(x_pad, w_hwio, b2)


# --------------------------------------------------------------------------
# Fused head: AdaptiveAvgPool2d(1) + 1x1 conv (512->1024) + LeakyReLU
#             + 1x1 conv (1024->1), all in one kernel.
# --------------------------------------------------------------------------
def _head_kernel(x_ref, w1_ref, b1_ref, w2_ref, b2_ref, o_ref):
    # x_ref:  (N, S, C)   flattened spatial features (S = Hf*Wf)
    # w1_ref: (C, C1)     b1_ref: (1, C1)
    # w2_ref: (C1, 1)     b2_ref: (1, 1)
    # o_ref:  (N, 1)
    x = x_ref[...].astype(jnp.float32)
    pooled = jnp.mean(x, axis=1)                       # (N, C) global avg pool
    h = jnp.dot(pooled, w1_ref[...], preferred_element_type=jnp.float32)
    h = h + b1_ref[...]
    h = jnp.where(h >= 0, h, NEG_SLOPE * h)            # LeakyReLU(0.2)
    out = jnp.dot(h, w2_ref[...], preferred_element_type=jnp.float32)
    out = out + b2_ref[...]
    o_ref[...] = out.astype(o_ref.dtype)


def head(x_nhwc, w1, b1, w2, b2):
    N, Hf, Wf, C = x_nhwc.shape
    S = Hf * Wf
    C1 = w1.shape[-1]
    x_flat = x_nhwc.reshape(N, S, C)
    out = pl.pallas_call(
        _head_kernel,
        out_shape=jax.ShapeDtypeStruct((N, 1), jnp.float32),
        grid_spec=pltpu.PrefetchScalarGridSpec(
            num_scalar_prefetch=0,
            grid=(1,),
            in_specs=[
                pl.BlockSpec((N, S, C), lambda i: (0, 0, 0)),
                pl.BlockSpec((C, C1), lambda i: (0, 0)),
                pl.BlockSpec((1, C1), lambda i: (0, 0)),
                pl.BlockSpec((C1, 1), lambda i: (0, 0)),
                pl.BlockSpec((1, 1), lambda i: (0, 0)),
            ],
            out_specs=pl.BlockSpec((N, 1), lambda i: (0, 0)),
        ),
        compiler_params=pltpu.CompilerParams(
            dimension_semantics=("arbitrary",)),
    )(x_flat, w1, b1, w2, b2)
    return out.reshape(N)


# --------------------------------------------------------------------------
# Full Discriminator forward (matches the PyTorch module semantics).
# --------------------------------------------------------------------------
def discriminator_forward(x_nchw, params, strides):
    x = jnp.transpose(x_nchw, (0, 2, 3, 1))            # NCHW -> NHWC (once)
    for (w, b), s in zip(params["convs"], strides):
        x = conv3x3_lrelu(x, w, b, s)
    return head(x, params["fc1_w"], params["fc1_b"],
                params["fc2_w"], params["fc2_b"])


if __name__ == "__main__":
    # Small shapes consistent with the module: batch=2, RGB, 16x16 input.
    N, Cin0, H0, W0 = 2, 3, 16, 16
    # (Cin, Cout, stride) per conv layer, as in the nn.Sequential.
    plan = [(3, 64, 1), (64, 64, 2), (64, 128, 1), (128, 128, 2),
            (128, 256, 1), (256, 256, 2), (256, 512, 1), (512, 512, 2)]
    strides = [s for _, _, s in plan]

    key = jax.random.PRNGKey(0)
    params = {"convs": []}
    for cin, cout, _ in plan:
        key, kw, kb = jax.random.split(key, 3)
        bound = 1.0 / ((cin * 9) ** 0.5)               # nn.Conv2d-style bound
        w_oihw = jax.random.uniform(kw, (cout, cin, 3, 3), jnp.float32,
                                    minval=-bound, maxval=bound)
        b = jax.random.uniform(kb, (cout,), jnp.float32,
                               minval=-bound, maxval=bound)
        params["convs"].append((jnp.transpose(w_oihw, (2, 3, 1, 0)), b))

    key, k1, k2, k3, k4, kx = jax.random.split(key, 6)
    b1 = 1.0 / (512 ** 0.5)
    fc1_w = jax.random.uniform(k1, (1024, 512), jnp.float32, minval=-b1, maxval=b1)
    fc1_b = jax.random.uniform(k2, (1024,), jnp.float32, minval=-b1, maxval=b1)
    b2 = 1.0 / (1024 ** 0.5)
    fc2_w = jax.random.uniform(k3, (1, 1024), jnp.float32, minval=-b2, maxval=b2)
    fc2_b = jax.random.uniform(k4, (1,), jnp.float32, minval=-b2, maxval=b2)
    params["fc1_w"] = fc1_w.T                          # (512, 1024)
    params["fc1_b"] = fc1_b.reshape(1, 1024)
    params["fc2_w"] = fc2_w.T                          # (1024, 1)
    params["fc2_b"] = fc2_b.reshape(1, 1)

    x = jax.random.normal(kx, (N, Cin0, H0, W0), jnp.float32)

    out = discriminator_forward(x, params, strides)
    out = jax.block_until_ready(out)
    assert out.shape == (N,)
    print("KERNEL_OK")
</pallas_src>

<mosaic_0001>
module attributes {stable_mosaic.version = 11 : i64} {
  func.func @_conv3x3_lrelu_kernel(%arg0: i32, %arg1: memref<2x18x18x3xf32, #tpu.memory_space<vmem>>, %arg2: memref<3x3x3x64xf32, #tpu.memory_space<vmem>>, %arg3: memref<1x64xf32, #tpu.memory_space<vmem>>, %arg4: memref<2x16x16x64xf32, #tpu.memory_space<vmem>>) attributes {dimension_semantics = [#tpu.dimension_semantics<arbitrary>], iteration_bounds = array<i64: 1>, scalar_prefetch = 0 : i64, scratch_operands = 0 : i64, tpu.core_type = #tpu.core_type<tc>, window_params = [{pipeline_mode = #tpu.pipeline_mode<synchronous>, transform_indices = @transform_0, window_bounds = array<i64: 2, 18, 18, 3>}, {pipeline_mode = #tpu.pipeline_mode<synchronous>, transform_indices = @transform_1, window_bounds = array<i64: 3, 3, 3, 64>}, {pipeline_mode = #tpu.pipeline_mode<synchronous>, transform_indices = @transform_2, window_bounds = array<i64: 1, 64>}, {pipeline_mode = #tpu.pipeline_mode<synchronous>, transform_indices = @transform_3, window_bounds = array<i64: 2, 16, 16, 64>}]} {
    %c0 = arith.constant 0 : index
    %c0_0 = arith.constant 0 : index
    %c0_1 = arith.constant 0 : index
    %c0_2 = arith.constant 0 : index
    %0 = vector.load %arg1[%c0, %c0_0, %c0_1, %c0_2] : memref<2x18x18x3xf32, #tpu.memory_space<vmem>>, vector<2x18x18x3xf32>
    %cst = arith.constant 0.000000e+00 : f32
    %1 = vector.broadcast %cst : f32 to vector<512x64xf32>
    %2 = vector.extract_strided_slice %0 {offsets = [0, 0, 0, 0], sizes = [2, 16, 16, 3], strides = [1, 1, 1, 1]} : vector<2x18x18x3xf32> to vector<2x16x16x3xf32>
    %3 = vector.shape_cast %2 : vector<2x16x16x3xf32> to vector<512x3xf32>
    %c0_3 = arith.constant 0 : index
    %c0_4 = arith.constant 0 : index
    %c0_5 = arith.constant 0 : index
    %c0_6 = arith.constant 0 : index
    %4 = vector.load %arg2[%c0_3, %c0_4, %c0_5, %c0_6] : memref<3x3x3x64xf32, #tpu.memory_space<vmem>>, vector<1x1x3x64xf32>
    %5 = vector.shape_cast %4 : vector<1x1x3x64xf32> to vector<3x64xf32>
    %cst_7 = arith.constant dense<0.000000e+00> : vector<512x64xf32>
    %6 = tpu.matmul %3, %5, %cst_7 {dimension_numbers = #tpu.dot_dimension_numbers<[1], [0], [0], [1], [0, 0, 1, 1], [], []>} : vector<512x3xf32>, vector<3x64xf32>, vector<512x64xf32> -> vector<512x64xf32>
    %7 = arith.addf %1, %6 : vector<512x64xf32>
    %8 = vector.extract_strided_slice %0 {offsets = [0, 0, 1, 0], sizes = [2, 16, 16, 3], strides = [1, 1, 1, 1]} : vector<2x18x18x3xf32> to vector<2x16x16x3xf32>
    %9 = vector.shape_cast %8 : vector<2x16x16x3xf32> to vector<512x3xf32>
    %c0_8 = arith.constant 0 : index
    %c1 = arith.constant 1 : index
    %c0_9 = arith.constant 0 : index
    %c0_10 = arith.constant 0 : index
    %10 = vector.load %arg2[%c0_8, %c1, %c0_9, %c0_10] : memref<3x3x3x64xf32, #tpu.memory_space<vmem>>, vector<1x1x3x64xf32>
    %11 = vector.shape_cast %10 : vector<1x1x3x64xf32> to vector<3x64xf32>
    %cst_11 = arith.constant dense<0.000000e+00> : vector<512x64xf32>
    %12 = tpu.matmul %9, %11, %cst_11 {dimension_numbers = #tpu.dot_dimension_numbers<[1], [0], [0], [1], [0, 0, 1, 1], [], []>} : vector<512x3xf32>, vector<3x64xf32>, vector<512x64xf32> -> vector<512x64xf32>
    %13 = arith.addf %7, %12 : vector<512x64xf32>
    %14 = vector.extract_strided_slice %0 {offsets = [0, 0, 2, 0], sizes = [2, 16, 16, 3], strides = [1, 1, 1, 1]} : vector<2x18x18x3xf32> to vector<2x16x16x3xf32>
    %15 = vector.shape_cast %14 : vector<2x16x16x3xf32> to vector<512x3xf32>
    %c0_12 = arith.constant 0 : index
    %c2 = arith.constant 2 : index
    %c0_13 = arith.constant 0 : index
    %c0_14 = arith.constant 0 : index
    %16 = vector.load %arg2[%c0_12, %c2, %c0_13, %c0_14] : memref<3x3x3x64xf32, #tpu.memory_space<vmem>>, vector<1x1x3x64xf32>
    %17 = vector.shape_cast %16 : vector<1x1x3x64xf32> to vector<3x64xf32>
    %cst_15 = arith.constant dense<0.000000e+00> : vector<512x64xf32>
    %18 = tpu.matmul %15, %17, %cst_15 {dimension_numbers = #tpu.dot_dimension_numbers<[1], [0], [0], [1], [0, 0, 1, 1], [], []>} : vector<512x3xf32>, vector<3x64xf32>, vector<512x64xf32> -> vector<512x64xf32>
    %19 = arith.addf %13, %18 : vector<512x64xf32>
    %20 = vector.extract_strided_slice %0 {offsets = [0, 1, 0, 0], sizes = [2, 16, 16, 3], strides = [1, 1, 1, 1]} : vector<2x18x18x3xf32> to vector<2x16x16x3xf32>
    %21 = vector.shape_cast %20 : vector<2x16x16x3xf32> to vector<512x3xf32>
    %c1_16 = arith.constant 1 : index
    %c0_17 = arith.constant 0 : index
    %c0_18 = arith.constant 0 : index
    %c0_19 = arith.constant 0 : index
    %22 = vector.load %arg2[%c1_16, %c0_17, %c0_18, %c0_19] : memref<3x3x3x64xf32, #tpu.memory_space<vmem>>, vector<1x1x3x64xf32>
    %23 = vector.shape_cast %22 : vector<1x1x3x64xf32> to vector<3x64xf32>
    %cst_20 = arith.constant dense<0.000000e+00> : vector<512x64xf32>
    %24 = tpu.matmul %21, %23, %cst_20 {dimension_numbers = #tpu.dot_dimension_numbers<[1], [0], [0], [1], [0, 0, 1, 1], [], []>} : vector<512x3xf32>, vector<3x64xf32>, vector<512x64xf32> -> vector<512x64xf32>
    %25 = arith.addf %19, %24 : vector<512x64xf32>
    %26 = vector.extract_strided_slice %0 {offsets = [0, 1, 1, 0], sizes = [2, 16, 16, 3], strides = [1, 1, 1, 1]} : vector<2x18x18x3xf32> to vector<2x16x16x3xf32>
    %27 = vector.shape_cast %26 : vector<2x16x16x3xf32> to vector<512x3xf32>
    %c1_21 = arith.constant 1 : index
    %c1_22 = arith.constant 1 : index
    %c0_23 = arith.constant 0 : index
    %c0_24 = arith.constant 0 : index
    %28 = vector.load %arg2[%c1_21, %c1_22, %c0_23, %c0_24] : memref<3x3x3x64xf32, #tpu.memory_space<vmem>>, vector<1x1x3x64xf32>
    %29 = vector.shape_cast %28 : vector<1x1x3x64xf32> to vector<3x64xf32>
    %cst_25 = arith.constant dense<0.000000e+00> : vector<512x64xf32>
    %30 = tpu.matmul %27, %29, %cst_25 {dimension_numbers = #tpu.dot_dimension_numbers<[1], [0], [0], [1], [0, 0, 1, 1], [], []>} : vector<512x3xf32>, vector<3x64xf32>, vector<512x64xf32> -> vector<512x64xf32>
    %31 = arith.addf %25, %30 : vector<512x64xf32>
    %32 = vector.extract_strided_slice %0 {offsets = [0, 1, 2, 0], sizes = [2, 16, 16, 3], strides = [1, 1, 1, 1]} : vector<2x18x18x3xf32> to vector<2x16x16x3xf32>
    %33 = vector.shape_cast %32 : vector<2x16x16x3xf32> to vector<512x3xf32>
    %c1_26 = arith.constant 1 : index
    %c2_27 = arith.constant 2 : index
    %c0_28 = arith.constant 0 : index
    %c0_29 = arith.constant 0 : index
    %34 = vector.load %arg2[%c1_26, %c2_27, %c0_28, %c0_29] : memref<3x3x3x64xf32, #tpu.memory_space<vmem>>, vector<1x1x3x64xf32>
    %35 = vector.shape_cast %34 : vector<1x1x3x64xf32> to vector<3x64xf32>
    %cst_30 = arith.constant dense<0.000000e+00> : vector<512x64xf32>
    %36 = tpu.matmul %33, %35, %cst_30 {dimension_numbers = #tpu.dot_dimension_numbers<[1], [0], [0], [1], [0, 0, 1, 1], [], []>} : vector<512x3xf32>, vector<3x64xf32>, vector<512x64xf32> -> vector<512x64xf32>
    %37 = arith.addf %31, %36 : vector<512x64xf32>
    %38 = vector.extract_strided_slice %0 {offsets = [0, 2, 0, 0], sizes = [2, 16, 16, 3], strides = [1, 1, 1, 1]} : vector<2x18x18x3xf32> to vector<2x16x16x3xf32>
    %39 = vector.shape_cast %38 : vector<2x16x16x3xf32> to vector<512x3xf32>
    %c2_31 = arith.constant 2 : index
    %c0_32 = arith.constant 0 : index
    %c0_33 = arith.constant 0 : index
    %c0_34 = arith.constant 0 : index
    %40 = vector.load %arg2[%c2_31, %c0_32, %c0_33, %c0_34] : memref<3x3x3x64xf32, #tpu.memory_space<vmem>>, vector<1x1x3x64xf32>
    %41 = vector.shape_cast %40 : vector<1x1x3x64xf32> to vector<3x64xf32>
    %cst_35 = arith.constant dense<0.000000e+00> : vector<512x64xf32>
    %42 = tpu.matmul %39, %41, %cst_35 {dimension_numbers = #tpu.dot_dimension_numbers<[1], [0], [0], [1], [0, 0, 1, 1], [], []>} : vector<512x3xf32>, vector<3x64xf32>, vector<512x64xf32> -> vector<512x64xf32>
    %43 = arith.addf %37, %42 : vector<512x64xf32>
    %44 = vector.extract_strided_slice %0 {offsets = [0, 2, 1, 0], sizes = [2, 16, 16, 3], strides = [1, 1, 1, 1]} : vector<2x18x18x3xf32> to vector<2x16x16x3xf32>
    %45 = vector.shape_cast %44 : vector<2x16x16x3xf32> to vector<512x3xf32>
    %c2_36 = arith.constant 2 : index
    %c1_37 = arith.constant 1 : index
    %c0_38 = arith.constant 0 : index
    %c0_39 = arith.constant 0 : index
    %46 = vector.load %arg2[%c2_36, %c1_37, %c0_38, %c0_39] : memref<3x3x3x64xf32, #tpu.memory_space<vmem>>, vector<1x1x3x64xf32>
    %47 = vector.shape_cast %46 : vector<1x1x3x64xf32> to vector<3x64xf32>
    %cst_40 = arith.constant dense<0.000000e+00> : vector<512x64xf32>
    %48 = tpu.matmul %45, %47, %cst_40 {dimension_numbers = #tpu.dot_dimension_numbers<[1], [0], [0], [1], [0, 0, 1, 1], [], []>} : vector<512x3xf32>, vector<3x64xf32>, vector<512x64xf32> -> vector<512x64xf32>
    %49 = arith.addf %43, %48 : vector<512x64xf32>
    %50 = vector.extract_strided_slice %0 {offsets = [0, 2, 2, 0], sizes = [2, 16, 16, 3], strides = [1, 1, 1, 1]} : vector<2x18x18x3xf32> to vector<2x16x16x3xf32>
    %51 = vector.shape_cast %50 : vector<2x16x16x3xf32> to vector<512x3xf32>
    %c2_41 = arith.constant 2 : index
    %c2_42 = arith.constant 2 : index
    %c0_43 = arith.constant 0 : index
    %c0_44 = arith.constant 0 : index
    %52 = vector.load %arg2[%c2_41, %c2_42, %c0_43, %c0_44] : memref<3x3x3x64xf32, #tpu.memory_space<vmem>>, vector<1x1x3x64xf32>
    %53 = vector.shape_cast %52 : vector<1x1x3x64xf32> to vector<3x64xf32>
    %cst_45 = arith.constant dense<0.000000e+00> : vector<512x64xf32>
    %54 = tpu.matmul %51, %53, %cst_45 {dimension_numbers = #tpu.dot_dimension_numbers<[1], [0], [0], [1], [0, 0, 1, 1], [], []>} : vector<512x3xf32>, vector<3x64xf32>, vector<512x64xf32> -> vector<512x64xf32>
    %55 = arith.addf %49, %54 : vector<512x64xf32>
    %c0_46 = arith.constant 0 : index
    %c0_47 = arith.constant 0 : index
    %56 = vector.load %arg3[%c0_46, %c0_47] : memref<1x64xf32, #tpu.memory_space<vmem>>, vector<1x64xf32>
    %57 = vector.broadcast %56 : vector<1x64xf32> to vector<512x64xf32>
    %58 = arith.addf %55, %57 : vector<512x64xf32>
    %cst_48 = arith.constant 0.000000e+00 : f32
    %59 = vector.broadcast %cst_48 : f32 to vector<512x64xf32>
    %60 = arith.cmpf oge, %58, %59 : vector<512x64xf32>
    %cst_49 = arith.constant 2.000000e-01 : f32
    %61 = vector.broadcast %cst_49 : f32 to vector<512x64xf32>
    %62 = arith.mulf %61, %58 : vector<512x64xf32>
    %63 = arith.select %60, %58, %62 : vector<512x64xi1>, vector<512x64xf32>
    %64 = vector.shape_cast %63 : vector<512x64xf32> to vector<2x16x16x64xf32>
    %c0_50 = arith.constant 0 : index
    %c0_51 = arith.constant 0 : index
    %c0_52 = arith.constant 0 : index
    %c0_53 = arith.constant 0 : index
    %65 = vector.load %arg4[%c0_50, %c0_51, %c0_52, %c0_53] : memref<2x16x16x64xf32, #tpu.memory_space<vmem>>, vector<2x16x16x64xf32>
    tpu.vector_store %arg4[%c0_50, %c0_51, %c0_52, %c0_53], %64 {strides = array<i32>} : memref<2x16x16x64xf32, #tpu.memory_space<vmem>>, vector<2x16x16x64xf32>,
    return
  }
  func.func @transform_0(%arg0: i32) -> (i32, i32, i32, i32) {
    %c0_i32 = arith.constant 0 : i32
    %c0_i32_0 = arith.constant 0 : i32
    %c0_i32_1 = arith.constant 0 : i32
    %c0_i32_2 = arith.constant 0 : i32
    %c0_i32_3 = arith.constant 0 : i32
    return %c0_i32, %c0_i32_0, %c0_i32_1, %c0_i32_2 : i32, i32, i32, i32
  }
  func.func @transform_1(%arg0: i32) -> (i32, i32, i32, i32) {
    %c0_i32 = arith.constant 0 : i32
    %c0_i32_0 = arith.constant 0 : i32
    %c0_i32_1 = arith.constant 0 : i32
    %c0_i32_2 = arith.constant 0 : i32
    %c0_i32_3 = arith.constant 0 : i32
    return %c0_i32, %c0_i32_0, %c0_i32_1, %c0_i32_2 : i32, i32, i32, i32
  }
  func.func @transform_2(%arg0: i32) -> (i32, i32) {
    %c0_i32 = arith.constant 0 : i32
    %c0_i32_0 = arith.constant 0 : i32
    %c0_i32_1 = arith.constant 0 : i32
    return %c0_i32, %c0_i32_0 : i32, i32
  }
  func.func @transform_3(%arg0: i32) -> (i32, i32, i32, i32) {
    %c0_i32 = arith.constant 0 : i32
    %c0_i32_0 = arith.constant 0 : i32
    %c0_i32_1 = arith.constant 0 : i32
    %c0_i32_2 = arith.constant 0 : i32
    %c0_i32_3 = arith.constant 0 : i32
    return %c0_i32, %c0_i32_0, %c0_i32_1, %c0_i32_2 : i32, i32, i32, i32
  }
}

</mosaic_0001>

<bundles_post_ra>
// kernel: tpu_custom_call.1
= control target key start
LH: loop header
LB: loop body
LE: loop exit
PB: predicated region body
PF: predicated region fallthrough
CT: control target
= control target key end

     0   :  { %vm512_vm0 = vcmask 1042432   ;;  %vm220_vm1 = vcmask 1046528   ;;  %vm383_vm2 = vcmask 23552   ;;  %s11013_s0 = inlined_call_operand.vmem [shape: f32[2,18,18,3], index: 0, kind: input, shape index: {}]   ;;  %s11014_s1 = inlined_call_operand.vmem [shape: f32[3,3,3,64], index: 1, kind: input, shape index: {}]   ;;  %s11015_s2 = inlined_call_operand.vmem [shape: f32[1,64], index: 2, kind: input, shape index: {}]   ;;  %s11016_s3 = inlined_call_operand.hbm [shape: f32[2,16,16,64], index: 3, kind: output, shape index: {}]  }
   0x1   :  { %v5328_v0 = vld [vmem:[%s11014_s1 + $0x4] sm:$0x7]  ;;  %v7511_v2 = vld [vmem:[%s11013_s0 + $0x8] sm:$0xff]  ;;  %v7520_v5 = vld [vmem:[%s11013_s0 + $0x1b0] sm:$0xff] }
   0x2   :  { %v7506_v1 = vld [vmem:[%s11013_s0] sm:$0xff]  ;;  %7389 = vmatprep.subr.msk.mxu1 %vm512_vm0, %v5328_v0  ;;  %6507 = vmatprep.subr.msk.mxu0 %vm512_vm0, %v5328_v0  ;;  %v222_v4 = vrot.slane %v7511_v2, 1  ;;  %11360 = vst [vmem:[#allocation5_spill] sm:$0xff] %v7520_v5  ;;  %v7525_v6 = vld [vmem:[%s11013_s0 + $0x1b8] sm:$0xff]  ;;  %v301_v8 = vrot.slane %v7520_v5, 1  ;;  %v7568_v20 = vld [vmem:[%s11013_s0 + $0x1c8] sm:$0xff] }
   0x3   :  { %v221_v3 = vrot.slane %v7506_v1, 1  ;;  %11361 = vst [vmem:[#allocation6_spill] sm:$0xff] %v7525_v6  ;;  %v7530_v7 = vld [vmem:[%s11013_s0 + $0x18] sm:$0xff]  ;;  %7390 = vmatpush3.msk.msra.mxu1 %vm512_vm0, %v5328_v0  ;;  %6508 = vmatpush3.msk.msra.mxu0 %vm512_vm0, %v5328_v0  ;;  %v302_v9 = vrot.slane %v7525_v6, 1  ;;  %v123_v10 = vld [vmem:[%s11014_s1] sm:$0x7] }
   0x4   :  { %v7542_v11 = vld [vmem:[%s11013_s0 + $0x10] sm:$0x3]  ;;  %6605 = vmatprep.subr.msk.mxu1 %vm512_vm0, %v123_v10  ;;  %v7550_v14 = vld [vmem:[%s11013_s0 + $0x1c0] sm:$0x3]  ;;  %v5459_v15 = vld [vmem:[%s11014_s1 + $0x8] sm:$0x7] }
   0x5   :  { %v223_v12 = vsel %vm220_vm1, %v221_v3, %v222_v4  ;;  %v224_v13 = vrot.slane %v7542_v11, 1  ;;  %11362 = vst [vmem:[#allocation7_spill] sm:$0xff] %v7550_v14  ;;  %v303_v16 = vsel %vm220_vm1, %v301_v8, %v302_v9  ;;  %v304_v17 = vrot.slane %v7550_v14, 1  ;;  %6703 = vmatprep.subr.msk.mxu0 %vm512_vm0, %v5459_v15  ;;  %v7562_v18 = vld [vmem:[%s11013_s0 + $0x20] sm:$0xff]  ;;  %11363 = vst [vmem:[#allocation8_spill] sm:$0xff] %v7568_v20  ;;  %v7573_v21 = vld [vmem:[%s11013_s0 + $0x1d0] sm:$0xff] }
   0x6   :  { %6509 = vmatprep.mubr.msk.f32.mxu0 %vm383_vm2, %v223_v12  ;;  %v226_v19 = vrot.slane %v7530_v7, 1  ;;  %11364 = vst [vmem:[#allocation9_spill] sm:$0xff] %v7573_v21  ;;  %6557 = vmatprep.mubr.msk.f32.mxu1 %vm383_vm2, %v303_v16  ;;  %v227_v23 = vrot.slane %v7562_v18, 1  ;;  %v306_v24 = vrot.slane %v7568_v20, 1  ;;  %v307_v25 = vrot.slane %v7573_v21, 1  ;;  %v7588_v27 = vld [vmem:[%s11013_s0 + $0x30] sm:$0xff] }
   0x7   :  { %v225_v22 = vsel %vm220_vm1, %v222_v4, %v224_v13  ;;  %v7583_v26 = vld [vmem:[%s11013_s0 + $0x28] sm:$0x3]  ;;  %v305_v28 = vsel %vm220_vm1, %v302_v9, %v304_v17  ;;  %v7596_v30 = vld [vmem:[%s11013_s0 + $0x1d8] sm:$0x3]  ;;  %v231_v32 = vrot.slane %v7588_v27, 1  ;;  %v7607_v33 = vld [vmem:[%s11013_s0 + $0x1e0] sm:$0xff] }
   0x8   :  { %6510 = vmatmul.mubr.msk.f32.vlgmr.msra.gmra.mxu0 %vm383_vm2, %v225_v22  ;;  %v229_v29 = vrot.slane %v7583_v26, 1  ;;  %11365 = vst [vmem:[#allocation10_spill] sm:$0xff] %v7596_v30  ;;  %v7601_v31 = vld [vmem:[%s11013_s0 + $0x38] sm:$0xff]  ;;  %11366 = vst [vmem:[#allocation11_spill] sm:$0xff] %v7607_v33  ;;  %6558 = vmatmul.mubr.msk.f32.vlgmr.msra.gmra.mxu1 %vm383_vm2, %v305_v28  ;;  %v7612_v34 = vsel %vm220_vm1, %v226_v19, %v227_v23  ;;  %v7615_v35 = vsel %vm220_vm1, %v306_v24, %v307_v25  ;;  %v7622_v38 = vld [vmem:[%s11013_s0 + $0x1e8] sm:$0xff] }
   0x9   :  { %6704 = vmatpush3.msk.msra.mxu0 %vm512_vm0, %v5459_v15  ;;  %11367 = vst [vmem:[#allocation12_spill] sm:$0xff] %v7612_v34  ;;  %11368 = vst [vmem:[#allocation13_spill] sm:$0xff] %v7615_v35  ;;  %v309_v36 = vrot.slane %v7596_v30, 1  ;;  %v232_v37 = vrot.slane %v7601_v31, 1  ;;  %v7627_v39 = vld [vmem:[%s11013_s0 + $0x40] sm:$0x3]  ;;  %6606 = vmatpush3.msk.msra.mxu1 %vm512_vm0, %v123_v10 }
   0xa   :  { %11369 = vst [vmem:[#allocation14_spill] sm:$0xff] %v7622_v38  ;;  %v7632_v40 = vld [vmem:[%s11013_s0 + $0x48] sm:$0xff]  ;;  %6512 = vmatprep.mubr.msk.f32.mxu0 %vm383_vm2, %v7612_v34  ;;  %v7638_v41 = vsel %vm220_vm1, %v227_v23, %v229_v29  ;;  %v311_v42 = vrot.slane %v7607_v33, 1  ;;  %v312_v43 = vrot.slane %v7622_v38, 1  ;;  %v234_v44 = vrot.slane %v7627_v39, 1  ;;  %v7651_v46 = vld [vmem:[%s11013_s0 + $0x50] sm:$0xff]  ;;  %6560 = vmatprep.mubr.msk.f32.mxu1 %vm383_vm2, %v7615_v35 }
   0xb   :  { %11370 = vst [vmem:[#allocation15_spill] sm:$0xff] %v7638_v41  ;;  %v7646_v45 = vld [vmem:[%s11013_s0 + $0x1f0] sm:$0x3]  ;;  %v7656_v47 = vsel %vm220_vm1, %v307_v25, %v309_v36  ;;  %v7659_v48 = vsel %vm220_vm1, %v231_v32, %v232_v37  ;;  %v236_v50 = vrot.slane %v7632_v40, 1  ;;  %v7666_v51 = vld [vmem:[%s11013_s0 + $0x1f8] sm:$0xff]  ;;  %v7671_v52 = vld [vmem:[%s11013_s0 + $0x200] sm:$0xff] }
   0xc   :  { %11371 = vst [vmem:[#allocation16_spill] sm:$0xff] %v7646_v45  ;;  %11372 = vst [vmem:[#allocation17_spill] sm:$0xff] %v7656_v47  ;;  %v314_v49 = vrot.slane %v7646_v45, 1  ;;  %v7676_v53 = vld [vmem:[%s11013_s0 + $0x58] sm:$0x3]  ;;  %6513 = vmatmul.mubr.msk.f32.gmra.mxu0 %vm383_vm2, %v7638_v41  ;;  %v7681_v54 = vsel %vm220_vm1, %v311_v42, %v312_v43  ;;  %v237_v55 = vrot.slane %v7651_v46, 1  ;;  %6561 = vmatmul.mubr.msk.f32.gmra.mxu1 %vm383_vm2, %v7656_v47 }
   0xd   :  { %11373 = vst [vmem:[#allocation18_spill] sm:$0xff] %v7659_v48  ;;  %11374 = vst [vmem:[#allocation19_spill] sm:$0xff] %v7666_v51  ;;  %v316_v56 = vrot.slane %v7666_v51, 1  ;;  %v7688_v57 = vld [vmem:[%s11013_s0 + $0x208] sm:$0x3]  ;;  %v7693_v58 = vld [vmem:[%s11013_s0 + $0x60] sm:$0xff]  ;;  %6515 = vmatprep.mubr.msk.f32.mxu0 %vm383_vm2, %v7659_v48  ;;  %v7705_v60 = vsel %vm220_vm1, %v232_v37, %v234_v44  ;;  %6563 = vmatprep.mubr.msk.f32.mxu1 %vm383_vm2, %v7681_v54 }
   0xe   :  { %11375 = vst [vmem:[#allocation20_spill] sm:$0xff] %v7671_v52  ;;  %11376 = vst [vmem:[#allocation21_spill] sm:$0xff] %v7681_v54  ;;  %v7698_v59 = vld [vmem:[%s11013_s0 + $0x68] sm:$0xff]  ;;  %v7708_v61 = vsel %vm220_vm1, %v312_v43, %v314_v49  ;;  %v317_v62 = vrot.slane %v7671_v52, 1  ;;  %v239_v63 = vrot.slane %v7676_v53, 1  ;;  %v7715_v0 = vld [vmem:[%s11013_s0 + $0x210] sm:$0xff]  ;;  %v7725_v4 = vsel %vm220_vm1, %v236_v50, %v237_v55 }
   0xf   :  { %11377 = vst [vmem:[#allocation22_spill] sm:$0xff] %v7688_v57  ;;  %11378 = vst [vmem:[#allocation23_spill] sm:$0xff] %v7705_v60  ;;  %v7720_v3 = vld [vmem:[%s11013_s0 + $0x218] sm:$0xff]  ;;  %v319_v8 = vrot.slane %v7688_v57, 1  ;;  %v241_v9 = vrot.slane %v7693_v58, 1  ;;  %v242_v10 = vrot.slane %v7698_v59, 1 }
  0x10   :  { %11379 = vst [vmem:[#allocation24_spill] sm:$0xff] %v7708_v61  ;;  %11380 = vst [vmem:[#allocation25_spill] sm:$0xff] %v7715_v0  ;;  %v7733_v12 = vld [vmem:[%s11013_s0 + $0x70] sm:$0x3]  ;;  %v7736_v13 = vsel %vm220_vm1, %v316_v56, %v317_v62  ;;  %v321_v15 = vrot.slane %v7715_v0, 1  ;;  %v322_v16 = vrot.slane %v7720_v3, 1  ;;  %6516 = vmatmul.mubr.msk.f32.gmra.mxu0 %vm383_vm2, %v7705_v60  ;;  %6564 = vmatmul.mubr.msk.f32.gmra.mxu1 %vm383_vm2, %v7708_v61 }
  0x11   :  { %11381 = vst [vmem:[#allocation26_spill] sm:$0xff] %v7720_v3  ;;  %11382 = vst [vmem:[#allocation27_spill] sm:$0xff] %v7725_v4  ;;  %v7743_v17 = vld [vmem:[%s11013_s0 + $0x220] sm:$0x3]  ;;  %v7748_v19 = vld [vmem:[%s11013_s0 + $0x78] sm:$0xff]  ;;  %6518 = vmatprep.mubr.msk.f32.mxu0 %vm383_vm2, %v7725_v4  ;;  %v7772_v25 = vsel %vm220_vm1, %v237_v55, %v239_v63  ;;  %v244_v28 = vrot.slane %v7733_v12, 1  ;;  %6566 = vmatprep.mubr.msk.f32.mxu1 %vm383_vm2, %v7736_v13  ;;  %v7779_v32 = vsel %vm220_vm1, %v317_v62, %v319_v8 }
  0x12   :  { %11383 = vst [vmem:[#allocation28_spill] sm:$0xff] %v7736_v13  ;;  %11384 = vst [vmem:[#allocation29_spill] sm:$0xff] %v7743_v17  ;;  %v7753_v22 = vld [vmem:[%s11013_s0 + $0x80] sm:$0xff]  ;;  %v7760_v23 = vld [vmem:[%s11013_s0 + $0x228] sm:$0xff]  ;;  %v324_v29 = vrot.slane %v7743_v17, 1  ;;  %v7782_v36 = vsel %vm220_vm1, %v241_v9, %v242_v10  ;;  %v246_v37 = vrot.slane %v7748_v19, 1  ;;  %v7797_v49 = vsel %vm220_vm1, %v321_v15, %v322_v16 }
  0x13   :  { %11385 = vst [vmem:[#allocation30_spill] sm:$0xff] %v7760_v23  ;;  %v7765_v24 = vld [vmem:[%s11013_s0 + $0x230] sm:$0xff]  ;;  %11387 = vst [vmem:[#allocation32_spill] sm:$0xff] %v7772_v25  ;;  %v247_v42 = vrot.slane %v7753_v22, 1  ;;  %v7789_v43 = vld [vmem:[%s11013_s0 + $0x88] sm:$0x3]  ;;  %v7828_v9 = vsel %vm220_vm1, %v242_v10, %v244_v28 }
  0x14   :  { %11386 = vst [vmem:[#allocation31_spill] sm:$0xff] %v7765_v24  ;;  %11388 = vst [vmem:[#allocation33_spill] sm:$0xff] %v7779_v32  ;;  %v7794_v44 = vld [vmem:[%s11013_s0 + $0x238] sm:$0x3]  ;;  %v326_v50 = vrot.slane %v7760_v23, 1  ;;  %v327_v55 = vrot.slane %v7765_v24, 1  ;;  %6519 = vmatmul.mubr.msk.f32.gmra.mxu0 %vm383_vm2, %v7772_v25  ;;  %6567 = vmatmul.mubr.msk.f32.gmra.mxu1 %vm383_vm2, %v7779_v32  ;;  %v7835_v61 = vsel %vm220_vm1, %v322_v16, %v324_v29 }
  0x15   :  { %11389 = vst [vmem:[#allocation34_spill] sm:$0xff] %v7782_v36  ;;  %11390 = vst [vmem:[#allocation35_spill] sm:$0xff] %v7794_v44  ;;  %v7804_v56 = vld [vmem:[%s11013_s0 + $0x90] sm:$0xff]  ;;  %v7809_v62 = vld [vmem:[%s11013_s0 + $0x98] sm:$0xff]  ;;  %6521 = vmatprep.mubr.msk.f32.mxu0 %vm383_vm2, %v7782_v36  ;;  %v249_v15 = vrot.slane %v7789_v43, 1  ;;  %v329_v13 = vrot.slane %v7794_v44, 1  ;;  %6569 = vmatprep.mubr.msk.f32.mxu1 %vm383_vm2, %v7797_v49  ;;  %v7838_v54 = vsel %vm220_vm1, %v246_v37, %v247_v42 }
  0x16   :  { %11391 = vst [vmem:[#allocation36_spill] sm:$0xff] %v7797_v49  ;;  %v7816_v63 = vld [vmem:[%s11013_s0 + $0x240] sm:$0xff]  ;;  %v7821_v8 = vld [vmem:[%s11013_s0 + $0x248] sm:$0xff]  ;;  %11394 = vst [vmem:[#allocation39_spill] sm:$0xff] %v7828_v9  ;;  %v251_v32 = vrot.slane %v7804_v56, 1  ;;  %v252_v47 = vrot.slane %v7809_v62, 1  ;;  %v7848_v28 = vsel %vm220_vm1, %v326_v50, %v327_v55 }
  0x17   :  { %11392 = vst [vmem:[#allocation37_spill] sm:$0xff] %v7816_v63  ;;  %11393 = vst [vmem:[#allocation38_spill] sm:$0xff] %v7821_v8  ;;  %v7845_v10 = vld [vmem:[%s11013_s0 + $0xa0] sm:$0x3]  ;;  %v331_v49 = vrot.slane %v7816_v63, 1  ;;  %v332_v16 = vrot.slane %v7821_v8, 1  ;;  %v7884_v25 = vsel %vm220_vm1, %v247_v42, %v249_v15 }
  0x18   :  { %11395 = vst [vmem:[#allocation40_spill] sm:$0xff] %v7835_v61  ;;  %11396 = vst [vmem:[#allocation41_spill] sm:$0xff] %v7838_v54  ;;  %v7855_v29 = vld [vmem:[%s11013_s0 + $0x250] sm:$0x3]  ;;  %v7860_v37 = vld [vmem:[%s11013_s0 + $0xa8] sm:$0xff]  ;;  %6522 = vmatmul.mubr.msk.f32.gmra.mxu0 %vm383_vm2, %v7828_v9  ;;  %6570 = vmatmul.mubr.msk.f32.gmra.mxu1 %vm383_vm2, %v7835_v61  ;;  %v7887_v9 = vsel %vm220_vm1, %v327_v55, %v329_v13  ;;  %v254_v4 = vrot.slane %v7845_v10, 1  ;;  %v7898_v61 = vsel %vm220_vm1, %v251_v32, %v252_v47 }
  0x19   :  { %11397 = vst [vmem:[#allocation42_spill] sm:$0xff] %v7848_v28  ;;  %11398 = vst [vmem:[#allocation43_spill] sm:$0xff] %v7855_v29  ;;  %v7865_v35 = vld [vmem:[%s11013_s0 + $0xb0] sm:$0xff]  ;;  %v7872_v50 = vld [vmem:[%s11013_s0 + $0x258] sm:$0xff]  ;;  %6524 = vmatprep.mubr.msk.f32.mxu0 %vm383_vm2, %v7838_v54  ;;  %6572 = vmatprep.mubr.msk.f32.mxu1 %vm383_vm2, %v7848_v28  ;;  %v334_v54 = vrot.slane %v7855_v29, 1  ;;  %v256_v42 = vrot.slane %v7860_v37, 1  ;;  %v7909_v15 = vsel %vm220_vm1, %v331_v49, %v332_v16 }
  0x1a   :  { %11399 = vst [vmem:[#allocation44_spill] sm:$0xff] %v7872_v50  ;;  %v7877_v36 = vld [vmem:[%s11013_s0 + $0x260] sm:$0xff]  ;;  %11401 = vst [vmem:[#allocation46_spill] sm:$0xff] %v7884_v25  ;;  %v7893_v60 = vld [vmem:[%s11013_s0 + $0xb8] sm:$0x3]  ;;  %v257_v13 = vrot.slane %v7865_v35, 1 }
  0x1b   :  { %11400 = vst [vmem:[#allocation45_spill] sm:$0xff] %v7877_v36  ;;  %11402 = vst [vmem:[#allocation47_spill] sm:$0xff] %v7887_v9  ;;  %v7906_v55 = vld [vmem:[%s11013_s0 + $0x268] sm:$0x3]  ;;  %v336_v48 = vrot.slane %v7872_v50, 1  ;;  %v337_v28 = vrot.slane %v7877_v36, 1  ;;  %v7940_v36 = vsel %vm220_vm1, %v252_v47, %v254_v4  ;;  %v7947_v29 = vsel %vm220_vm1, %v332_v16, %v334_v54 }
  0x1c   :  { %11403 = vst [vmem:[#allocation48_spill] sm:$0xff] %v7898_v61  ;;  %11404 = vst [vmem:[#allocation49_spill] sm:$0xff] %v7906_v55  ;;  %v7916_v32 = vld [vmem:[%s11013_s0 + $0xc0] sm:$0xff]  ;;  %v7921_v41 = vld [vmem:[%s11013_s0 + $0xc8] sm:$0xff]  ;;  %6525 = vmatmul.mubr.msk.f32.gmra.mxu0 %vm383_vm2, %v7884_v25  ;;  %6573 = vmatmul.mubr.msk.f32.gmra.mxu1 %vm383_vm2, %v7887_v9  ;;  %v259_v25 = vrot.slane %v7893_v60, 1  ;;  %v339_v50 = vrot.slane %v7906_v55, 1  ;;  %v7950_v8 = vsel %vm220_vm1, %v256_v42, %v257_v13 }
  0x1d   :  { %11405 = vst [vmem:[#allocation50_spill] sm:$0xff] %v7909_v15  ;;  %v7928_v49 = vld [vmem:[%s11013_s0 + $0x270] sm:$0xff]  ;;  %v7933_v34 = vld [vmem:[%s11013_s0 + $0x278] sm:$0xff]  ;;  %6527 = vmatprep.mubr.msk.f32.mxu0 %vm383_vm2, %v7898_v61  ;;  %11408 = vst [vmem:[#allocation53_spill] sm:$0xff] %v7940_v36  ;;  %6575 = vmatprep.mubr.msk.f32.mxu1 %vm383_vm2, %v7909_v15  ;;  %v261_v9 = vrot.slane %v7916_v32, 1  ;;  %v262_v61 = vrot.slane %v7921_v41, 1  ;;  %v7960_v4 = vsel %vm220_vm1, %v336_v48, %v337_v28 }
  0x1e   :  { %11406 = vst [vmem:[#allocation51_spill] sm:$0xff] %v7928_v49  ;;  %11407 = vst [vmem:[#allocation52_spill] sm:$0xff] %v7933_v34  ;;  %v7957_v47 = vld [vmem:[%s11013_s0 + $0xd0] sm:$0x3]  ;;  %v341_v15 = vrot.slane %v7928_v49, 1  ;;  %v342_v54 = vrot.slane %v7933_v34, 1  ;;  %v7996_v49 = vsel %vm220_vm1, %v257_v13, %v259_v25 }
  0x1f   :  { %11409 = vst [vmem:[#allocation54_spill] sm:$0xff] %v7947_v29  ;;  %11410 = vst [vmem:[#allocation55_spill] sm:$0xff] %v7950_v8  ;;  %v7967_v16 = vld [vmem:[%s11013_s0 + $0x280] sm:$0x3]  ;;  %v7972_v42 = vld [vmem:[%s11013_s0 + $0xd8] sm:$0xff]  ;;  %v264_v63 = vrot.slane %v7957_v47, 1 }
  0x20   :  { %11411 = vst [vmem:[#allocation56_spill] sm:$0xff] %v7960_v4  ;;  %11412 = vst [vmem:[#allocation57_spill] sm:$0xff] %v7967_v16  ;;  %v7977_v55 = vld [vmem:[%s11013_s0 + $0xe0] sm:$0xff]  ;;  %6528 = vmatmul.mubr.msk.f32.gmra.mxu0 %vm383_vm2, %v7940_v36  ;;  %v7984_v48 = vld [vmem:[%s11013_s0 + $0x288] sm:$0xff]  ;;  %6576 = vmatmul.mubr.msk.f32.gmra.mxu1 %vm383_vm2, %v7947_v29  ;;  %v7999_v36 = vsel %vm220_vm1, %v337_v28, %v339_v50  ;;  %v8010_v29 = vsel %vm220_vm1, %v261_v9, %v262_v61  ;;  %v266_v25 = vrot.slane %v7972_v42, 1 }
  0x21   :  { %11413 = vst [vmem:[#allocation58_spill] sm:$0xff] %v7984_v48  ;;  %v7989_v34 = vld [vmem:[%s11013_s0 + $0x290] sm:$0xff]  ;;  %6530 = vmatprep.mubr.msk.f32.mxu0 %vm383_vm2, %v7950_v8  ;;  %11415 = vst [vmem:[#allocation60_spill] sm:$0xff] %v7996_v49  ;;  %v8005_v44 = vld [vmem:[%s11013_s0 + $0xe8] sm:$0x3]  ;;  %6578 = vmatprep.mubr.msk.f32.mxu1 %vm383_vm2, %v7960_v4  ;;  %v344_v8 = vrot.slane %v7967_v16, 1  ;;  %v8021_v13 = vsel %vm220_vm1, %v341_v15, %v342_v54 }
  0x22   :  { %11414 = vst [vmem:[#allocation59_spill] sm:$0xff] %v7989_v34  ;;  %11416 = vst [vmem:[#allocation61_spill] sm:$0xff] %v7999_v36  ;;  %v267_v28 = vrot.slane %v7977_v55, 1  ;;  %v8018_v50 = vld [vmem:[%s11013_s0 + $0x298] sm:$0x3]  ;;  %v346_v24 = vrot.slane %v7984_v48, 1  ;;  %v8052_v48 = vsel %vm220_vm1, %v262_v61, %v264_v63 }
  0x23   :  { %11417 = vst [vmem:[#allocation62_spill] sm:$0xff] %v8010_v29  ;;  %11418 = vst [vmem:[#allocation63_spill] sm:$0xff] %v8018_v50  ;;  %v347_v4 = vrot.slane %v7989_v34, 1  ;;  %v8028_v9 = vld [vmem:[%s11013_s0 + $0xf0] sm:$0xff]  ;;  %v8033_v16 = vld [vmem:[%s11013_s0 + $0xf8] sm:$0xff]  ;;  %v349_v23 = vrot.slane %v8018_v50, 1  ;;  %v8059_v17 = vsel %vm220_vm1, %v342_v54, %v344_v8 }
  0x24   :  { %11419 = vst [vmem:[#allocation64_spill] sm:$0xff] %v8021_v13  ;;  %6531 = vmatmul.mubr.msk.f32.gmra.mxu0 %vm383_vm2, %v7996_v49  ;;  %v8040_v15 = vld [vmem:[%s11013_s0 + $0x2a0] sm:$0xff]  ;;  %v8045_v34 = vld [vmem:[%s11013_s0 + $0x2a8] sm:$0xff]  ;;  %6579 = vmatmul.mubr.msk.f32.gmra.mxu1 %vm383_vm2, %v7999_v36  ;;  %11422 = vst [vmem:[#allocation67_spill] sm:$0xff] %v8052_v48  ;;  %v269_v49 = vrot.slane %v8005_v44, 1  ;;  %v8062_v3 = vsel %vm220_vm1, %v266_v25, %v267_v28  ;;  %v271_v36 = vrot.slane %v8028_v9, 1 }
  0x25   :  { %11420 = vst [vmem:[#allocation65_spill] sm:$0xff] %v8040_v15  ;;  %11421 = vst [vmem:[#allocation66_spill] sm:$0xff] %v8045_v34  ;;  %6533 = vmatprep.mubr.msk.f32.mxu0 %vm383_vm2, %v8010_v29  ;;  %6581 = vmatprep.mubr.msk.f32.mxu1 %vm383_vm2, %v8021_v13  ;;  %v272_v29 = vrot.slane %v8033_v16, 1  ;;  %v8069_v61 = vld [vmem:[%s11013_s0 + $0x100] sm:$0x3]  ;;  %v8077_v8 = vsel %vm220_vm1, %v346_v24, %v347_v4  ;;  %v351_v54 = vrot.slane %v8040_v15, 1 }
  0x26   :  { %11423 = vst [vmem:[#allocation68_spill] sm:$0xff] %v8059_v17  ;;  %11424 = vst [vmem:[#allocation69_spill] sm:$0xff] %v8062_v3  ;;  %v8074_v63 = vld [vmem:[%s11013_s0 + $0x2b0] sm:$0x3]  ;;  %v352_v25 = vrot.slane %v8045_v34, 1  ;;  %v8084_v13 = vld [vmem:[%s11013_s0 + $0x108] sm:$0xff] }
  0x27   :  { %11425 = vst [vmem:[#allocation70_spill] sm:$0xff] %v8074_v63  ;;  %11426 = vst [vmem:[#allocation71_spill] sm:$0xff] %v8077_v8  ;;  %v8089_v50 = vld [vmem:[%s11013_s0 + $0x110] sm:$0xff]  ;;  %v8094_v0 = vld [vmem:[%s11013_s0 + $0x2b8] sm:$0xff]  ;;  %v274_v57 = vrot.slane %v8069_v61, 1  ;;  %v354_v52 = vrot.slane %v8074_v63, 1 }
  0x28   :  { %11427 = vst [vmem:[#allocation72_spill] sm:$0xff] %v8094_v0  ;;  %6534 = vmatmul.mubr.msk.f32.gmra.mxu0 %vm383_vm2, %v8052_v48  ;;  %v8101_v24 = vld [vmem:[%s11013_s0 + $0x2c0] sm:$0xff]  ;;  %v8106_v34 = vld [vmem:[%s11014_s1 + $0xc] sm:$0x7]  ;;  %v8111_v15 = vld [vmem:[%s11014_s1 + $0x10] sm:$0x7]  ;;  %6582 = vmatmul.mubr.msk.f32.gmra.mxu1 %vm383_vm2, %v8059_v17  ;;  %v8118_v48 = vsel %vm220_vm1, %v267_v28, %v269_v49 }
  0x29   :  { %11428 = vst [vmem:[#allocation73_spill] sm:$0xff] %v8101_v24  ;;  %6536 = vmatprep.mubr.msk.f32.mxu0 %vm383_vm2, %v8062_v3  ;;  %11429 = vst [vmem:[#allocation74_spill] sm:$0xff] %v8118_v48 }
  0x2a   :  { %8 = vsyncpa [#allocation3], 0  ;;  %6584 = vmatprep.mubr.msk.f32.mxu1 %vm383_vm2, %v8077_v8  ;;  %v8125_v51 = vsel %vm220_vm1, %v347_v4, %v349_v23  ;;  %v8128_v45 = vsel %vm220_vm1, %v271_v36, %v272_v29  ;;  %v276_v17 = vrot.slane %v8084_v13, 1  ;;  %v277_v3 = vrot.slane %v8089_v50, 1  ;;  %v8135_v49 = vld [vmem:[%s11013_s0 + $0x118] sm:$0x3]  ;;  %6801 = vmatprep.subr.msk.mxu1 %vm512_vm0, %v8106_v34 }
  0x2b   :  { %11430 = vst [vmem:[#allocation75_spill] sm:$0xff] %v8125_v51  ;;  %11431 = vst [vmem:[#allocation76_spill] sm:$0xff] %v8128_v45  ;;  %v8140_v28 = vsel %vm220_vm1, %v351_v54, %v352_v25  ;;  %v356_v23 = vrot.slane %v8094_v0, 1  ;;  %v357_v36 = vrot.slane %v8101_v24, 1  ;;  %v8147_v4 = vld [vmem:[%s11013_s0 + $0x2c8] sm:$0x3]  ;;  %6899 = vmatprep.subr.msk.mxu0 %vm512_vm0, %v8111_v15  ;;  %v8178_v0 = vsel %vm220_vm1, %v272_v29, %v274_v57 }
  0x2c   :  { %11432 = vst [vmem:[#allocation77_spill] sm:$0xff] %v8140_v28  ;;  %11433 = vst [vmem:[#allocation78_spill] sm:$0xff] %v8147_v4  ;;  %v8152_v8 = vld [vmem:[%s11013_s0 + $0x120] sm:$0xff]  ;;  %v8157_v63 = vld [vmem:[%s11013_s0 + $0x128] sm:$0xff]  ;;  %6537 = vmatmul.mubr.msk.f32.gmra.mxu0 %vm383_vm2, %v8118_v48  ;;  %6585 = vmatmul.mubr.msk.f32.gmra.mxu1 %vm383_vm2, %v8125_v51  ;;  %v8181_v48 = vsel %vm220_vm1, %v352_v25, %v354_v52  ;;  %v279_v38 = vrot.slane %v8135_v49, 1  ;;  %v8192_v51 = vsel %vm220_vm1, %v276_v17, %v277_v3  ;;  %vm1417_vm3 = vcmask 1045504  }
  0x2d   :  { %v8166_v54 = vld [vmem:[%s11013_s0 + $0x2d0] sm:$0xff]  ;;  %v8171_v24 = vld [vmem:[%s11013_s0 + $0x2d8] sm:$0xff]  ;;  %6539 = vmatprep.mubr.msk.f32.mxu0 %vm383_vm2, %v8128_v45  ;;  %11436 = vst [vmem:[#allocation81_spill] sm:$0xff] %v8178_v0  ;;  %11437 = vst [vmem:[#allocation82_spill] sm:$0xff] %v8181_v48  ;;  %6587 = vmatprep.mubr.msk.f32.mxu1 %vm383_vm2, %v8140_v28  ;;  %v359_v45 = vrot.slane %v8147_v4, 1  ;;  %v281_v57 = vrot.slane %v8152_v8, 1  ;;  %v8203_v25 = vsel %vm220_vm1, %v356_v23, %v357_v36 }
  0x2e   :  { %11434 = vst [vmem:[#allocation79_spill] sm:$0xff] %v8166_v54  ;;  %11435 = vst [vmem:[#allocation80_spill] sm:$0xff] %v8171_v24  ;;  %v8187_v33 = vld [vmem:[%s11013_s0 + $0x130] sm:$0x3]  ;;  %v282_v52 = vrot.slane %v8157_v63, 1  ;;  %v361_v30 = vrot.slane %v8166_v54, 1  ;;  %v8234_v54 = vsel %vm220_vm1, %v277_v3, %v279_v38 }
  0x2f   :  { %11438 = vst [vmem:[#allocation83_spill] sm:$0xff] %v8192_v51  ;;  %v8200_v29 = vld [vmem:[%s11013_s0 + $0x2e0] sm:$0x3]  ;;  %11440 = vst [vmem:[#allocation85_spill] sm:$0xff] %v8203_v25  ;;  %v362_v28 = vrot.slane %v8171_v24, 1  ;;  %v8210_v17 = vld [vmem:[%s11013_s0 + $0x138] sm:$0xff]  ;;  %v8241_v20 = vsel %vm220_vm1, %v357_v36, %v359_v45 }
  0x30   :  { %11439 = vst [vmem:[#allocation84_spill] sm:$0xff] %v8200_v29  ;;  %v8215_v4 = vld [vmem:[%s11013_s0 + $0x140] sm:$0xff]  ;;  %6540 = vmatmul.mubr.msk.f32.gmra.mxu0 %vm383_vm2, %v8178_v0  ;;  %v8222_v23 = vld [vmem:[%s11013_s0 + $0x2e8] sm:$0xff]  ;;  %v8227_v24 = vld [vmem:[%s11013_s0 + $0x2f0] sm:$0xff]  ;;  %6588 = vmatmul.mubr.msk.f32.gmra.mxu1 %vm383_vm2, %v8181_v48  ;;  %v284_v0 = vrot.slane %v8187_v33, 1  ;;  %v364_v21 = vrot.slane %v8200_v29, 1  ;;  %v8244_v14 = vsel %vm220_vm1, %v281_v57, %v282_v52 }
  0x31   :  { %11441 = vst [vmem:[#allocation86_spill] sm:$0xff] %v8215_v4  ;;  %11442 = vst [vmem:[#allocation87_spill] sm:$0xff] %v8222_v23  ;;  %6542 = vmatprep.mubr.msk.f32.mxu0 %vm383_vm2, %v8192_v51  ;;  %6590 = vmatprep.mubr.msk.f32.mxu1 %vm383_vm2, %v8203_v25  ;;  %v286_v48 = vrot.slane %v8210_v17, 1  ;;  %v287_v51 = vrot.slane %v8215_v4, 1  ;;  %v8251_v38 = vld [vmem:[%s11013_s0 + $0x148] sm:$0x3]  ;;  %v8254_v3 = vsel %vm220_vm1, %v361_v30, %v362_v28 }
  0x32   :  { %11443 = vst [vmem:[#allocation88_spill] sm:$0xff] %v8227_v24  ;;  %11444 = vst [vmem:[#allocation89_spill] sm:$0xff] %v8234_v54  ;;  %v366_v25 = vrot.slane %v8222_v23, 1  ;;  %v367_v45 = vrot.slane %v8227_v24, 1  ;;  %v8261_v36 = vld [vmem:[%s11013_s0 + $0x2f8] sm:$0x3]  ;;  %v8290_v23 = vsel %vm220_vm1, %v282_v52, %v284_v0 }
  0x33   :  { %11445 = vst [vmem:[#allocation90_spill] sm:$0xff] %v8241_v20  ;;  %11446 = vst [vmem:[#allocation91_spill] sm:$0xff] %v8244_v14  ;;  %v8266_v57 = vld [vmem:[%s11013_s0 + $0x150] sm:$0xff]  ;;  %v8271_v29 = vld [vmem:[%s11013_s0 + $0x158] sm:$0xff]  ;;  %v289_v6 = vrot.slane %v8251_v38, 1  ;;  %vm5247_vm4 = vcmask 523264  }
  0x34   :  { %11447 = vst [vmem:[#allocation92_spill] sm:$0xff] %v8251_v38  ;;  %11448 = vst [vmem:[#allocation93_spill] sm:$0xff] %v8254_v3  ;;  %6543 = vmatmul.mubr.msk.f32.gmra.mxu0 %vm383_vm2, %v8234_v54  ;;  %v8278_v30 = vld [vmem:[%s11013_s0 + $0x300] sm:$0xff]  ;;  %v8283_v24 = vld [vmem:[%s11013_s0 + $0x308] sm:$0xff]  ;;  %6591 = vmatmul.mubr.msk.f32.gmra.mxu1 %vm383_vm2, %v8241_v20  ;;  %v8293_v54 = vsel %vm220_vm1, %v362_v28, %v364_v21  ;;  %v8304_v20 = vsel %vm220_vm1, %v286_v48, %v287_v51  ;;  %v291_v0 = vrot.slane %v8266_v57, 1 }
  0x35   :  { %11449 = vst [vmem:[#allocation94_spill] sm:$0xff] %v8261_v36  ;;  %11450 = vst [vmem:[#allocation95_spill] sm:$0xff] %v8266_v57  ;;  %6545 = vmatprep.mubr.msk.f32.mxu0 %vm383_vm2, %v8244_v14  ;;  %v8299_v5 = vld [vmem:[%s11013_s0 + $0x160] sm:$0x3]  ;;  %6593 = vmatprep.mubr.msk.f32.mxu1 %vm383_vm2, %v8254_v3  ;;  %v369_v14 = vrot.slane %v8261_v36, 1  ;;  %v292_v21 = vrot.slane %v8271_v29, 1  ;;  %v8315_v52 = vsel %vm220_vm1, %v366_v25, %v367_v45 }
  0x36   :  { %11451 = vst [vmem:[#allocation96_spill] sm:$0xff] %v8271_v29  ;;  %11452 = vst [vmem:[#allocation97_spill] sm:$0xff] %v8278_v30  ;;  %v8312_v28 = vld [vmem:[%s11013_s0 + $0x310] sm:$0x3]  ;;  %v371_v38 = vrot.slane %v8278_v30, 1  ;;  %v372_v3 = vrot.slane %v8283_v24, 1  ;;  %v8346_v30 = vsel %vm220_vm1, %v287_v51, %v289_v6 }
  0x37   :  { %11453 = vst [vmem:[#allocation98_spill] sm:$0xff] %v8283_v24  ;;  %11454 = vst [vmem:[#allocation99_spill] sm:$0xff] %v8290_v23  ;;  %v8322_v48 = vld [vmem:[%s11013_s0 + $0x168] sm:$0xff]  ;;  %v8327_v36 = vld [vmem:[%s11013_s0 + $0x170] sm:$0xff]  ;;  %v374_v29 = vrot.slane %v8312_v28, 1  ;;  %v8353_v57 = vsel %vm220_vm1, %v367_v45, %v369_v14  ;;  %v8356_v4 = vsel %vm220_vm1, %v291_v0, %v292_v21 }
  0x38   :  { %11455 = vst [vmem:[#allocation100_spill] sm:$0xff] %v8293_v54  ;;  %11456 = vst [vmem:[#allocation101_spill] sm:$0xff] %v8304_v20  ;;  %6546 = vmatmul.mubr.msk.f32.gmra.mxu0 %vm383_vm2, %v8290_v23  ;;  %v8334_v25 = vld [vmem:[%s11013_s0 + $0x318] sm:$0xff]  ;;  %v8339_v24 = vld [vmem:[%s11013_s0 + $0x320] sm:$0xff]  ;;  %6594 = vmatmul.mubr.msk.f32.gmra.mxu1 %vm383_vm2, %v8293_v54  ;;  %v294_v23 = vrot.slane %v8299_v5, 1  ;;  %v296_v54 = vrot.slane %v8322_v48, 1  ;;  %v8366_v51 = vsel %vm220_vm1, %v371_v38, %v372_v3 }
  0x39   :  { %11457 = vst [vmem:[#allocation102_spill] sm:$0xff] %v8315_v52  ;;  %11458 = vst [vmem:[#allocation103_spill] sm:$0xff] %v8334_v25  ;;  %6548 = vmatprep.mubr.msk.f32.mxu0 %vm383_vm2, %v8304_v20  ;;  %6596 = vmatprep.mubr.msk.f32.mxu1 %vm383_vm2, %v8315_v52  ;;  %v297_v20 = vrot.slane %v8327_v36, 1  ;;  %v8363_v6 = vld [vmem:[%s11013_s0 + $0x178] sm:$0x3]  ;;  %v376_v52 = vrot.slane %v8334_v25, 1  ;;  %v8385_v0 = vsel %vm220_vm1, %v372_v3, %v374_v29 }
  0x3a   :  { %11459 = vst [vmem:[#allocation104_spill] sm:$0xff] %v8339_v24  ;;  %11460 = vst [vmem:[#allocation105_spill] sm:$0xff] %v8346_v30  ;;  %v377_v14 = vrot.slane %v8339_v24, 1  ;;  %v8373_v45 = vld [vmem:[%s11013_s0 + $0x328] sm:$0x3]  ;;  %v8382_v38 = vsel %vm220_vm1, %v292_v21, %v294_v23  ;;  %v299_v24 = vrot.slane %v8363_v6, 1 }
  0x3b   :  { %11461 = vst [vmem:[#allocation106_spill] sm:$0xff] %v8353_v57  ;;  %11462 = vst [vmem:[#allocation107_spill] sm:$0xff] %v8356_v4  ;;  %v8391_v25 = vsel %vm220_vm1, %v296_v54, %v297_v20  ;;  %v1421_v29 = vrot.slane %v7542_v11, 2  ;;  %v1423_v11 = vrot.slane %v7530_v7, 2 }
  0x3c   :  { %11463 = vst [vmem:[#allocation108_spill] sm:$0xff] %v8366_v51  ;;  %6549 = vmatmul.mubr.msk.f32.gmra.mxu0 %vm383_vm2, %v8346_v30  ;;  %6597 = vmatmul.mubr.msk.f32.gmra.mxu1 %vm383_vm2, %v8353_v57  ;;  %11464 = vst [vmem:[#allocation109_spill] sm:$0xff] %v8382_v38  ;;  %v379_v30 = vrot.slane %v8373_v45, 1  ;;  %v1418_v57 = vrot.slane %v7506_v1, 2  ;;  %v8397_v23 = vsel %vm220_vm1, %v376_v52, %v377_v14  ;;  %v1424_v52 = vrot.slane %v7562_v18, 2 }
  0x3d   :  { %6551 = vmatprep.mubr.msk.f32.mxu0 %vm383_vm2, %v8356_v4  ;;  %11465 = vst [vmem:[#allocation110_spill] sm:$0xff] %v8385_v0  ;;  %6599 = vmatprep.mubr.msk.f32.mxu1 %vm383_vm2, %v8366_v51  ;;  %11466 = vst [vmem:[#allocation111_spill] sm:$0xff] %v8391_v25  ;;  %v1419_v4 = vrot.slane %v7511_v2, 2  ;;  %v8407_v54 = vsel %vm220_vm1, %v297_v20, %v299_v24  ;;  %v1426_v24 = vrot.slane %v7583_v26, 2  ;;  %v1431_v26 = vrot.slane %v7627_v39, 2 }
  0x3e   :  { %11467 = vst [vmem:[#allocation112_spill] sm:$0xff] %v8397_v23  ;;  %11468 = vst [vmem:[#allocation113_spill] sm:$0xff] %v8407_v54  ;;  %v8412_v3 = vsel %vm220_vm1, %v377_v14, %v379_v30  ;;  %v1429_v30 = vrot.slane %v7601_v31, 2  ;;  %v8430_v14 = vsel %vm1417_vm3, %v1423_v11, %v1424_v52  ;;  %v1438_v11 = vrot.slane %v7693_v58, 2 }
  0x3f   :  { %11469 = vst [vmem:[#allocation114_spill] sm:$0xff] %v8412_v3  ;;  %v1420_v21 = vsel %vm1417_vm3, %v1418_v57, %v1419_v4  ;;  %v1422_v20 = vsel %vm1417_vm3, %v1419_v4, %v1421_v29  ;;  %v1428_v57 = vrot.slane %v7588_v27, 2  ;;  %v1433_v29 = vrot.slane %v7632_v40, 2 }
  0x40   :  { %6552 = vmatmul.mubr.msk.f32.gmra.mxu0 %vm383_vm2, %v8382_v38  ;;  %6600 = vmatmul.mubr.msk.f32.gmra.mxu1 %vm383_vm2, %v8385_v0 }
  0x41   :  { %6554 = vmatprep.mubr.msk.f32.mxu0 %vm383_vm2, %v8391_v25  ;;  %6602 = vmatprep.mubr.msk.f32.mxu1 %vm383_vm2, %v8397_v23  ;;  %v8450_v4 = vsel %vm1417_vm3, %v1428_v57, %v1429_v30  ;;  %v1448_v57 = vrot.slane %v7804_v56, 2 }
  0x44   :  { %6555 = vmatmul.mubr.msk.f32.gmra.mxu0 %vm383_vm2, %v8407_v54  ;;  %6603 = vmatmul.mubr.msk.f32.gmra.mxu1 %vm383_vm2, %v8412_v3 }
  0x45   :  { %6705 = vmatprep.mubr.msk.f32.mxu0 %vm383_vm2, %v1420_v21  ;;  %6607 = vmatprep.mubr.msk.f32.mxu1 %vm383_vm2, %v7506_v1  ;;  %v8435_v21 = vld [vmem:[%s11014_s1 + $0x14] sm:$0x7]  ;;  %v8442_v1 = vsel %vm1417_vm3, %v1424_v52, %v1426_v24  ;;  %v1439_v52 = vrot.slane %v7698_v59, 2  ;;  %v1444_v24 = vrot.slane %v7753_v22, 2 }
  0x48   :  { %6706 = vmatmul.mubr.msk.f32.vlgmr.msra.gmra.mxu0 %vm383_vm2, %v1422_v20  ;;  %6608 = vmatmul.mubr.msk.f32.vlgmr.msra.gmra.mxu1 %vm383_vm2, %v7511_v2  ;;  %v1434_v2 = vrot.slane %v7651_v46, 2  ;;  %v1443_v20 = vrot.slane %v7748_v19, 2 }
  0x49   :  { %6900 = vmatpush3.msk.msra.mxu0 %vm512_vm0, %v8111_v15  ;;  %6802 = vmatpush3.msk.msra.mxu1 %vm512_vm0, %v8106_v34  ;;  %v8457_v15 = vld [vmem:[%s11014_s1 + $0x18] sm:$0x7]  ;;  %v1436_v34 = vrot.slane %v7676_v53, 2  ;;  %v8495_v53 = vsel %vm1417_vm3, %v1438_v11, %v1439_v52  ;;  %v1463_v11 = vrot.slane %v7972_v42, 2 }
  0x4a   :  { %6610 = vmatprep.mubr.msk.f32.mxu1 %vm383_vm2, %v7530_v7  ;;  %6708 = vmatprep.mubr.msk.f32.mxu0 %vm383_vm2, %v8430_v14  ;;  %v8472_v7 = vsel %vm1417_vm3, %v1429_v30, %v1431_v26  ;;  %v8478_v39 = vsel %vm1417_vm3, %v1433_v29, %v1434_v2  ;;  %11471 = vst [vmem:[#allocation116_spill] sm:$0xff] %v8495_v53  ;;  %v1449_v30 = vrot.slane %v7809_v62, 2  ;;  %v1453_v26 = vrot.slane %v7860_v37, 2 }
  0x4b   :  { %6997 = vmatprep.subr.msk.mxu1 %vm512_vm0, %v8435_v21  ;;  %7095 = vmatprep.subr.msk.mxu0 %vm512_vm0, %v8457_v15  ;;  %v1454_v29 = vrot.slane %v7865_v35, 2 }
  0x4c   :  { %6709 = vmatmul.mubr.msk.f32.gmra.mxu0 %vm383_vm2, %v8442_v1  ;;  %6611 = vmatmul.mubr.msk.f32.gmra.mxu1 %vm383_vm2, %v7562_v18  ;;  %v8489_v18 = vsel %vm1417_vm3, %v1434_v2, %v1436_v34  ;;  %v1458_v2 = vrot.slane %v7916_v32, 2  ;;  %v1459_v34 = vrot.slane %v7921_v41, 2 }
  0x4d   :  { %6711 = vmatprep.mubr.msk.f32.mxu0 %vm383_vm2, %v8450_v4  ;;  %6613 = vmatprep.mubr.msk.f32.mxu1 %vm383_vm2, %v7588_v27  ;;  %11470 = vst [vmem:[#allocation115_spill] sm:$0xff] %v8489_v18  ;;  %v1441_v27 = vrot.slane %v7733_v12, 2  ;;  %v8512_v12 = vsel %vm1417_vm3, %v1443_v20, %v1444_v24  ;;  %v1469_v20 = vrot.slane %v8033_v16, 2 }
  0x4e   :  { %11473 = vst [vmem:[#allocation118_spill] sm:$0xff] %v8512_v12 }
  0x50   :  { %6712 = vmatmul.mubr.msk.f32.gmra.mxu0 %vm383_vm2, %v8472_v7  ;;  %6614 = vmatmul.mubr.msk.f32.gmra.mxu1 %vm383_vm2, %v7601_v31  ;;  %v8506_v31 = vsel %vm1417_vm3, %v1439_v52, %v1441_v27  ;;  %v1464_v52 = vrot.slane %v7977_v55, 2  ;;  %v1468_v27 = vrot.slane %v8028_v9, 2 }
  0x51   :  { %6714 = vmatprep.mubr.msk.f32.mxu0 %vm383_vm2, %v8478_v39  ;;  %6616 = vmatprep.mubr.msk.f32.mxu1 %vm383_vm2, %v7632_v40  ;;  %11472 = vst [vmem:[#allocation117_spill] sm:$0xff] %v8506_v31  ;;  %v1446_v40 = vrot.slane %v7789_v43, 2  ;;  %v8529_v43 = vsel %vm1417_vm3, %v1448_v57, %v1449_v30  ;;  %v1478_v57 = vrot.slane %v8152_v8, 2 }
  0x52   :  { %11475 = vst [vmem:[#allocation120_spill] sm:$0xff] %v8529_v43 }
  0x54   :  { %6715 = vmatmul.mubr.msk.f32.gmra.mxu0 %vm383_vm2, %v8489_v18  ;;  %6617 = vmatmul.mubr.msk.f32.gmra.mxu1 %vm383_vm2, %v7651_v46  ;;  %v8523_v46 = vsel %vm1417_vm3, %v1444_v24, %v1446_v40  ;;  %v1473_v24 = vrot.slane %v8084_v13, 2  ;;  %v1474_v40 = vrot.slane %v8089_v50, 2 }
  0x55   :  { %6717 = vmatprep.mubr.msk.f32.mxu0 %vm383_vm2, %v8495_v53  ;;  %6619 = vmatprep.mubr.msk.f32.mxu1 %vm383_vm2, %v7693_v58  ;;  %11474 = vst [vmem:[#allocation119_spill] sm:$0xff] %v8523_v46  ;;  %v1451_v58 = vrot.slane %v7845_v10, 2  ;;  %v8546_v10 = vsel %vm1417_vm3, %v1453_v26, %v1454_v29  ;;  %v11488_v26 = vld [vmem:[#allocation86_spill] sm:$0xff]  ;;  %v11628_v53 = vld [vmem:[#allocation99_spill] sm:$0xff] }
  0x56   :  { %11477 = vst [vmem:[#allocation122_spill] sm:$0xff] %v8546_v10 }
  0x58   :  { %6718 = vmatmul.mubr.msk.f32.gmra.mxu0 %vm383_vm2, %v8506_v31  ;;  %6620 = vmatmul.mubr.msk.f32.gmra.mxu1 %vm383_vm2, %v7698_v59  ;;  %v8540_v59 = vsel %vm1417_vm3, %v1449_v30, %v1451_v58  ;;  %v1479_v30 = vrot.slane %v8157_v63, 2  ;;  %v1483_v58 = vrot.slane %v8210_v17, 2  ;;  %v11619_v31 = vld [vmem:[#allocation81_spill] sm:$0xff] }
  0x59   :  { %6720 = vmatprep.mubr.msk.f32.mxu0 %vm383_vm2, %v8512_v12  ;;  %6622 = vmatprep.mubr.msk.f32.mxu1 %vm383_vm2, %v7748_v19  ;;  %11476 = vst [vmem:[#allocation121_spill] sm:$0xff] %v8540_v59  ;;  %v1456_v19 = vrot.slane %v7893_v60, 2  ;;  %v11610_v12 = vld [vmem:[#allocation69_spill] sm:$0xff] }
  0x5b   :  { %v8557_v60 = vsel %vm1417_vm3, %v1454_v29, %v1456_v19  ;;  %v1484_v29 = vrot.slane %v11488_v26, 2 }
  0x5c   :  { %6721 = vmatmul.mubr.msk.f32.gmra.mxu0 %vm383_vm2, %v8523_v46  ;;  %6623 = vmatmul.mubr.msk.f32.gmra.mxu1 %vm383_vm2, %v7753_v22  ;;  %11478 = vst [vmem:[#allocation123_spill] sm:$0xff] %v8557_v60  ;;  %v1461_v22 = vrot.slane %v7957_v47, 2  ;;  %v8580_v47 = vsel %vm1417_vm3, %v1463_v11, %v1464_v52  ;;  %v11493_v11 = vld [vmem:[#allocation96_spill] sm:$0xff] }
  0x5d   :  { %6723 = vmatprep.mubr.msk.f32.mxu0 %vm383_vm2, %v8529_v43  ;;  %6625 = vmatprep.mubr.msk.f32.mxu1 %vm383_vm2, %v7804_v56  ;;  %v8563_v56 = vsel %vm1417_vm3, %v1458_v2, %v1459_v34  ;;  %11481 = vst [vmem:[#allocation126_spill] sm:$0xff] %v8580_v47  ;;  %v8648_v2 = vsel %vm1417_vm3, %v1483_v58, %v1484_v29 }
  0x5e   :  { %11479 = vst [vmem:[#allocation124_spill] sm:$0xff] %v8563_v56 }
  0x60   :  { %6724 = vmatmul.mubr.msk.f32.gmra.mxu0 %vm383_vm2, %v8540_v59  ;;  %6626 = vmatmul.mubr.msk.f32.gmra.mxu1 %vm383_vm2, %v7809_v62  ;;  %v8574_v62 = vsel %vm1417_vm3, %v1459_v34, %v1461_v22  ;;  %v11492_v34 = vld [vmem:[#allocation95_spill] sm:$0xff] }
  0x61   :  { %6726 = vmatprep.mubr.msk.f32.mxu0 %vm383_vm2, %v8546_v10  ;;  %6628 = vmatprep.mubr.msk.f32.mxu1 %vm383_vm2, %v7860_v37  ;;  %11480 = vst [vmem:[#allocation125_spill] sm:$0xff] %v8574_v62  ;;  %v1466_v37 = vrot.slane %v8005_v44, 2  ;;  %v1471_v44 = vrot.slane %v8069_v61, 2  ;;  %v8614_v61 = vsel %vm1417_vm3, %v1473_v24, %v1474_v40  ;;  %v1488_v22 = vrot.slane %v11492_v34, 2  ;;  %v11598_v59 = vld [vmem:[#allocation55_spill] sm:$0xff] }
  0x62   :  { %11485 = vst [vmem:[#allocation130_spill] sm:$0xff] %v8614_v61  ;;  %v1494_v24 = vrot.slane %v8327_v36, 2 }
  0x64   :  { %6727 = vmatmul.mubr.msk.f32.gmra.mxu0 %vm383_vm2, %v8557_v60  ;;  %6629 = vmatmul.mubr.msk.f32.gmra.mxu1 %vm383_vm2, %v7865_v35  ;;  %v8591_v35 = vsel %vm1417_vm3, %v1464_v52, %v1466_v37  ;;  %v1489_v52 = vrot.slane %v11493_v11, 2  ;;  %v11595_v60 = vld [vmem:[#allocation53_spill] sm:$0xff] }
  0x65   :  { %6729 = vmatprep.mubr.msk.f32.mxu0 %vm383_vm2, %v8563_v56  ;;  %6631 = vmatprep.mubr.msk.f32.mxu1 %vm383_vm2, %v7916_v32  ;;  %11482 = vst [vmem:[#allocation127_spill] sm:$0xff] %v8591_v35  ;;  %v8597_v32 = vsel %vm1417_vm3, %v1468_v27, %v1469_v20  ;;  %v1491_v27 = vrot.slane %v8299_v5, 2 }
  0x66   :  { %11483 = vst [vmem:[#allocation128_spill] sm:$0xff] %v8597_v32 }
  0x67   :  { %v8676_v5 = vsel %vm1417_vm3, %v1489_v52, %v1491_v27  ;;  %v11503_v27 = vld [vmem:[#allocation9_spill] sm:$0xff] }
  0x68   :  { %6730 = vmatmul.mubr.msk.f32.gmra.mxu0 %vm383_vm2, %v8574_v62  ;;  %6632 = vmatmul.mubr.msk.f32.gmra.mxu1 %vm383_vm2, %v7921_v41  ;;  %v8608_v41 = vsel %vm1417_vm3, %v1469_v20, %v1471_v44  ;;  %v8665_v20 = vsel %vm1417_vm3, %v1488_v22, %v1489_v52  ;;  %v1493_v44 = vrot.slane %v8322_v48, 2  ;;  %11496 = vst [vmem:[#allocation133_spill] sm:$0xff] %v8676_v5  ;;  %v11502_v22 = vld [vmem:[#allocation8_spill] sm:$0xff]  ;;  %v9110_v62 = vld [vmem:[%s11013_s0 + $0x90] sm:$0xff] }
  0x69   :  { %6732 = vmatprep.mubr.msk.f32.mxu0 %vm383_vm2, %v8580_v47  ;;  %6634 = vmatprep.mubr.msk.f32.mxu1 %vm383_vm2, %v7972_v42  ;;  %11484 = vst [vmem:[#allocation129_spill] sm:$0xff] %v8608_v41  ;;  %v1476_v42 = vrot.slane %v8135_v49, 2  ;;  %v8631_v49 = vsel %vm1417_vm3, %v1478_v57, %v1479_v30  ;;  %11495 = vst [vmem:[#allocation96_spill] sm:$0xff] %v8665_v20  ;;  %v11498_v57 = vld [vmem:[#allocation5_spill] sm:$0xff]  ;;  %v1503_v52 = vrot.slane %v11502_v22, 2 }
  0x6a   :  { %11487 = vst [vmem:[#allocation132_spill] sm:$0xff] %v8631_v49 }
  0x6c   :  { %6733 = vmatmul.mubr.msk.f32.gmra.mxu0 %vm383_vm2, %v8591_v35  ;;  %6635 = vmatmul.mubr.msk.f32.gmra.mxu1 %vm383_vm2, %v7977_v55  ;;  %v8625_v55 = vsel %vm1417_vm3, %v1474_v40, %v1476_v42  ;;  %v1496_v40 = vrot.slane %v8363_v6, 2  ;;  %v8682_v42 = vsel %vm1417_vm3, %v1493_v44, %v1494_v24  ;;  %v1504_v44 = vrot.slane %v11503_v27, 2  ;;  %v11592_v35 = vld [vmem:[#allocation48_spill] sm:$0xff] }
  0x6d   :  { %6735 = vmatprep.mubr.msk.f32.mxu0 %vm383_vm2, %v8597_v32  ;;  %6637 = vmatprep.mubr.msk.f32.mxu1 %vm383_vm2, %v8028_v9  ;;  %11486 = vst [vmem:[#allocation131_spill] sm:$0xff] %v8625_v55  ;;  %v1481_v9 = vrot.slane %v8187_v33, 2  ;;  %11497 = vst [vmem:[#allocation134_spill] sm:$0xff] %v8682_v42 }
  0x6e   :  { %v8693_v6 = vsel %vm1417_vm3, %v1494_v24, %v1496_v40  ;;  %v11504_v40 = vld [vmem:[#allocation10_spill] sm:$0xff] }
  0x6f   :  { %v8642_v33 = vsel %vm1417_vm3, %v1479_v30, %v1481_v9  ;;  %v1498_v30 = vrot.slane %v11498_v57, 2  ;;  %v11499_v9 = vld [vmem:[#allocation6_spill] sm:$0xff]  ;;  %11500 = vst [vmem:[#allocation5_spill] sm:$0xff] %v8693_v6 }
  0x70   :  { %6736 = vmatmul.mubr.msk.f32.gmra.mxu0 %vm383_vm2, %v8608_v41  ;;  %6638 = vmatmul.mubr.msk.f32.gmra.mxu1 %vm383_vm2, %v8033_v16  ;;  %11489 = vst [vmem:[#allocation86_spill] sm:$0xff] %v8642_v33  ;;  %v11490_v16 = vld [vmem:[#allocation92_spill] sm:$0xff]  ;;  %v1499_v58 = vrot.slane %v11499_v9, 2  ;;  %v11589_v41 = vld [vmem:[#allocation46_spill] sm:$0xff] }
  0x71   :  { %6738 = vmatprep.mubr.msk.f32.mxu0 %vm383_vm2, %v8614_v61  ;;  %6640 = vmatprep.mubr.msk.f32.mxu1 %vm383_vm2, %v8084_v13  ;;  %v1486_v19 = vrot.slane %v11490_v16, 2  ;;  %11491 = vst [vmem:[#allocation92_spill] sm:$0xff] %v8648_v2 }
  0x73   :  { %v8659_v37 = vsel %vm1417_vm3, %v1484_v29, %v1486_v19  ;;  %v11501_v29 = vld [vmem:[#allocation7_spill] sm:$0xff]  ;;  %v1500_v19 = vsel %vm1417_vm3, %v1498_v30, %v1499_v58  ;;  %v8711_v30 = vsel %vm1417_vm3, %v1503_v52, %v1504_v44 }
  0x74   :  { %6739 = vmatmul.mubr.msk.f32.gmra.mxu0 %vm383_vm2, %v8625_v55  ;;  %6641 = vmatmul.mubr.msk.f32.gmra.mxu1 %vm383_vm2, %v8089_v50  ;;  %11494 = vst [vmem:[#allocation95_spill] sm:$0xff] %v8659_v37  ;;  %v1501_v16 = vrot.slane %v11501_v29, 2  ;;  %v1506_v29 = vrot.slane %v11504_v40, 2  ;;  %11505 = vst [vmem:[#allocation6_spill] sm:$0xff] %v8711_v30  ;;  %v11511_v52 = vld [vmem:[#allocation19_spill] sm:$0xff]  ;;  %v9084_v55 = vld [vmem:[%s11013_s0 + $0x78] sm:$0xff] }
  0x75   :  { %6741 = vmatprep.mubr.msk.f32.mxu0 %vm383_vm2, %v8631_v49  ;;  %6643 = vmatprep.mubr.msk.f32.mxu1 %vm383_vm2, %v8152_v8  ;;  %v1513_v40 = vrot.slane %v11511_v52, 2 }
  0x76   :  { %v1502_v24 = vsel %vm1417_vm3, %v1499_v58, %v1501_v16  ;;  %v8721_v58 = vsel %vm1417_vm3, %v1504_v44, %v1506_v29  ;;  %v11509_v16 = vld [vmem:[#allocation16_spill] sm:$0xff]  ;;  %v11516_v29 = vld [vmem:[#allocation25_spill] sm:$0xff] }
  0x77   :  { %11508 = vst [vmem:[#allocation7_spill] sm:$0xff] %v8721_v58 }
  0x78   :  { %6742 = vmatmul.mubr.msk.f32.gmra.mxu0 %vm383_vm2, %v8642_v33  ;;  %6644 = vmatmul.mubr.msk.f32.gmra.mxu1 %vm383_vm2, %v8157_v63  ;;  %v11586_v33 = vld [vmem:[#allocation41_spill] sm:$0xff] }
  0x79   :  { %6744 = vmatprep.mubr.msk.f32.mxu0 %vm383_vm2, %v8648_v2  ;;  %6646 = vmatprep.mubr.msk.f32.mxu1 %vm383_vm2, %v8210_v17 }
  0x7c   :  { %6745 = vmatmul.mubr.msk.f32.gmra.mxu0 %vm383_vm2, %v8659_v37  ;;  %6647 = vmatmul.mubr.msk.f32.gmra.mxu1 %vm383_vm2, %v11488_v26 }
  0x7d   :  { %6747 = vmatprep.mubr.msk.f32.mxu0 %vm383_vm2, %v8665_v20  ;;  %6649 = vmatprep.mubr.msk.f32.mxu1 %vm383_vm2, %v11492_v34  ;;  %v11507_v20 = vld [vmem:[#allocation14_spill] sm:$0xff] }
  0x7e   :  { %v1509_v37 = vrot.slane %v11507_v20, 2 }
  0x80   :  { %6748 = vmatmul.mubr.msk.f32.gmra.mxu0 %vm383_vm2, %v8676_v5  ;;  %6650 = vmatmul.mubr.msk.f32.gmra.mxu1 %vm383_vm2, %v11493_v11 }
  0x81   :  { %6750 = vmatprep.mubr.msk.f32.mxu0 %vm383_vm2, %v8682_v42  ;;  %6652 = vmatprep.mubr.msk.f32.mxu1 %vm383_vm2, %v8322_v48  ;;  %v11506_v42 = vld [vmem:[#allocation11_spill] sm:$0xff] }
  0x82   :  { %v1508_v5 = vrot.slane %v11506_v42, 2 }
  0x84   :  { %6751 = vmatmul.mubr.msk.f32.gmra.mxu0 %vm383_vm2, %v8693_v6  ;;  %6653 = vmatmul.mubr.msk.f32.gmra.mxu1 %vm383_vm2, %v8327_v36 }
  0x85   :  { %6753 = vmatprep.mubr.msk.f32.mxu0 %vm383_vm2, %v1500_v19  ;;  %6655 = vmatprep.mubr.msk.f32.mxu1 %vm383_vm2, %v11498_v57  ;;  %v1511_v57 = vrot.slane %v11509_v16, 2  ;;  %v8727_v19 = vsel %vm1417_vm3, %v1508_v5, %v1509_v37  ;;  %v1518_v16 = vrot.slane %v11516_v29, 2 }
  0x86   :  { %11510 = vst [vmem:[#allocation8_spill] sm:$0xff] %v8727_v19 }
  0x88   :  { %6754 = vmatmul.mubr.msk.f32.gmra.mxu0 %vm383_vm2, %v1502_v24  ;;  %6656 = vmatmul.mubr.msk.f32.gmra.mxu1 %vm383_vm2, %v11499_v9  ;;  %v11512_v24 = vld [vmem:[#allocation20_spill] sm:$0xff]  ;;  %v8738_v9 = vsel %vm1417_vm3, %v1509_v37, %v1511_v57 }
  0x89   :  { %6756 = vmatprep.mubr.msk.f32.mxu0 %vm383_vm2, %v8711_v30  ;;  %6658 = vmatprep.mubr.msk.f32.mxu1 %vm383_vm2, %v11502_v22  ;;  %v1514_v6 = vrot.slane %v11512_v24, 2  ;;  %11513 = vst [vmem:[#allocation9_spill] sm:$0xff] %v8738_v9  ;;  %v11514_v22 = vld [vmem:[#allocation22_spill] sm:$0xff] }
  0x8a   :  { %v1516_v44 = vrot.slane %v11514_v22, 2 }
  0x8b   :  { %v8744_v5 = vsel %vm1417_vm3, %v1513_v40, %v1514_v6  ;;  %v11521_v40 = vld [vmem:[#allocation30_spill] sm:$0xff] }
  0x8c   :  { %6757 = vmatmul.mubr.msk.f32.gmra.mxu0 %vm383_vm2, %v8721_v58  ;;  %6659 = vmatmul.mubr.msk.f32.gmra.mxu1 %vm383_vm2, %v11503_v27  ;;  %11515 = vst [vmem:[#allocation10_spill] sm:$0xff] %v8744_v5  ;;  %v11517_v58 = vld [vmem:[#allocation26_spill] sm:$0xff]  ;;  %v8755_v37 = vsel %vm1417_vm3, %v1514_v6, %v1516_v44  ;;  %v1523_v22 = vrot.slane %v11521_v40, 2  ;;  %v11524_v6 = vld [vmem:[#allocation35_spill] sm:$0xff] }
  0x8d   :  { %6759 = vmatprep.mubr.msk.f32.mxu0 %vm383_vm2, %v8727_v19  ;;  %6661 = vmatprep.mubr.msk.f32.mxu1 %vm383_vm2, %v11506_v42  ;;  %v1519_v30 = vrot.slane %v11517_v58, 2  ;;  %11518 = vst [vmem:[#allocation11_spill] sm:$0xff] %v8755_v37  ;;  %v11519_v42 = vld [vmem:[#allocation29_spill] sm:$0xff] }
  0x8e   :  { %v1521_v27 = vrot.slane %v11519_v42, 2 }
  0x8f   :  { %v8761_v57 = vsel %vm1417_vm3, %v1518_v16, %v1519_v30  ;;  %v11526_v16 = vld [vmem:[#allocation37_spill] sm:$0xff] }
  0x90   :  { %6760 = vmatmul.mubr.msk.f32.gmra.mxu0 %vm383_vm2, %v8738_v9  ;;  %6662 = vmatmul.mubr.msk.f32.gmra.mxu1 %vm383_vm2, %v11507_v20  ;;  %11520 = vst [vmem:[#allocation14_spill] sm:$0xff] %v8761_v57  ;;  %v11522_v9 = vld [vmem:[#allocation31_spill] sm:$0xff]  ;;  %v8772_v20 = vsel %vm1417_vm3, %v1519_v30, %v1521_v27  ;;  %v1528_v42 = vrot.slane %v11526_v16, 2 }
  0x91   :  { %6762 = vmatprep.mubr.msk.f32.mxu0 %vm383_vm2, %v8744_v5  ;;  %6664 = vmatprep.mubr.msk.f32.mxu1 %vm383_vm2, %v11511_v52  ;;  %v1524_v19 = vrot.slane %v11522_v9, 2  ;;  %11523 = vst [vmem:[#allocation16_spill] sm:$0xff] %v8772_v20  ;;  %v1526_v52 = vrot.slane %v11524_v6, 2 }
  0x93   :  { %v8778_v44 = vsel %vm1417_vm3, %v1523_v22, %v1524_v19  ;;  %v8789_v30 = vsel %vm1417_vm3, %v1524_v19, %v1526_v52  ;;  %v11531_v22 = vld [vmem:[#allocation44_spill] sm:$0xff]  ;;  %v11534_v19 = vld [vmem:[#allocation49_spill] sm:$0xff] }
  0x94   :  { %6763 = vmatmul.mubr.msk.f32.gmra.mxu0 %vm383_vm2, %v8755_v37  ;;  %6665 = vmatmul.mubr.msk.f32.gmra.mxu1 %vm383_vm2, %v11512_v24  ;;  %11525 = vst [vmem:[#allocation19_spill] sm:$0xff] %v8778_v44  ;;  %v11527_v37 = vld [vmem:[#allocation38_spill] sm:$0xff]  ;;  %11528 = vst [vmem:[#allocation20_spill] sm:$0xff] %v8789_v30  ;;  %v11529_v24 = vld [vmem:[#allocation43_spill] sm:$0xff]  ;;  %v1533_v6 = vrot.slane %v11531_v22, 2 }
  0x95   :  { %6765 = vmatprep.mubr.msk.f32.mxu0 %vm383_vm2, %v8761_v57  ;;  %6667 = vmatprep.mubr.msk.f32.mxu1 %vm383_vm2, %v11516_v29  ;;  %v1529_v5 = vrot.slane %v11527_v37, 2  ;;  %v1531_v29 = vrot.slane %v11529_v24, 2 }
  0x97   :  { %v8795_v27 = vsel %vm1417_vm3, %v1528_v42, %v1529_v5  ;;  %v11536_v42 = vld [vmem:[#allocation51_spill] sm:$0xff] }
  0x98   :  { %6766 = vmatmul.mubr.msk.f32.gmra.mxu0 %vm383_vm2, %v8772_v20  ;;  %6668 = vmatmul.mubr.msk.f32.gmra.mxu1 %vm383_vm2, %v11517_v58  ;;  %11530 = vst [vmem:[#allocation22_spill] sm:$0xff] %v8795_v27  ;;  %v11532_v20 = vld [vmem:[#allocation45_spill] sm:$0xff]  ;;  %v8806_v58 = vsel %vm1417_vm3, %v1529_v5, %v1531_v29  ;;  %v1538_v24 = vrot.slane %v11536_v42, 2 }
  0x99   :  { %6768 = vmatprep.mubr.msk.f32.mxu0 %vm383_vm2, %v8778_v44  ;;  %6670 = vmatprep.mubr.msk.f32.mxu1 %vm383_vm2, %v11521_v40  ;;  %v1534_v57 = vrot.slane %v11532_v20, 2  ;;  %11533 = vst [vmem:[#allocation25_spill] sm:$0xff] %v8806_v58  ;;  %v1536_v40 = vrot.slane %v11534_v19, 2  ;;  %v11539_v5 = vld [vmem:[#allocation57_spill] sm:$0xff] }
  0x9b   :  { %v8812_v52 = vsel %vm1417_vm3, %v1533_v6, %v1534_v57  ;;  %v11541_v6 = vld [vmem:[#allocation58_spill] sm:$0xff] }
  0x9c   :  { %6769 = vmatmul.mubr.msk.f32.gmra.mxu0 %vm383_vm2, %v8789_v30  ;;  %6671 = vmatmul.mubr.msk.f32.gmra.mxu1 %vm383_vm2, %v11522_v9  ;;  %11535 = vst [vmem:[#allocation26_spill] sm:$0xff] %v8812_v52  ;;  %v11537_v30 = vld [vmem:[#allocation52_spill] sm:$0xff]  ;;  %v8823_v9 = vsel %vm1417_vm3, %v1534_v57, %v1536_v40  ;;  %v1543_v19 = vrot.slane %v11541_v6, 2  ;;  %v11544_v57 = vld [vmem:[#allocation63_spill] sm:$0xff] }
  0x9d   :  { %6771 = vmatprep.mubr.msk.f32.mxu0 %vm383_vm2, %v8795_v27  ;;  %6673 = vmatprep.mubr.msk.f32.mxu1 %vm383_vm2, %v11526_v16  ;;  %v1539_v44 = vrot.slane %v11537_v30, 2  ;;  %11538 = vst [vmem:[#allocation29_spill] sm:$0xff] %v8823_v9  ;;  %v1541_v16 = vrot.slane %v11539_v5, 2 }
  0x9f   :  { %v8829_v29 = vsel %vm1417_vm3, %v1538_v24, %v1539_v44  ;;  %v11546_v24 = vld [vmem:[#allocation65_spill] sm:$0xff] }
  0xa0   :  { %6772 = vmatmul.mubr.msk.f32.gmra.mxu0 %vm383_vm2, %v8806_v58  ;;  %6674 = vmatmul.mubr.msk.f32.gmra.mxu1 %vm383_vm2, %v11527_v37  ;;  %11540 = vst [vmem:[#allocation30_spill] sm:$0xff] %v8829_v29  ;;  %v11542_v58 = vld [vmem:[#allocation59_spill] sm:$0xff]  ;;  %v8840_v37 = vsel %vm1417_vm3, %v1539_v44, %v1541_v16  ;;  %v1548_v5 = vrot.slane %v11546_v24, 2  ;;  %v11549_v44 = vld [vmem:[#allocation70_spill] sm:$0xff] }
  0xa1   :  { %6774 = vmatprep.mubr.msk.f32.mxu0 %vm383_vm2, %v8812_v52  ;;  %6676 = vmatprep.mubr.msk.f32.mxu1 %vm383_vm2, %v11531_v22  ;;  %v1544_v27 = vrot.slane %v11542_v58, 2  ;;  %11543 = vst [vmem:[#allocation31_spill] sm:$0xff] %v8840_v37  ;;  %v1546_v22 = vrot.slane %v11544_v57, 2 }
  0xa3   :  { %v8846_v40 = vsel %vm1417_vm3, %v1543_v19, %v1544_v27  ;;  %v11551_v19 = vld [vmem:[#allocation72_spill] sm:$0xff] }
  0xa4   :  { %6775 = vmatmul.mubr.msk.f32.gmra.mxu0 %vm383_vm2, %v8823_v9  ;;  %6677 = vmatmul.mubr.msk.f32.gmra.mxu1 %vm383_vm2, %v11532_v20  ;;  %11545 = vst [vmem:[#allocation35_spill] sm:$0xff] %v8846_v40  ;;  %v11547_v9 = vld [vmem:[#allocation66_spill] sm:$0xff]  ;;  %v8857_v20 = vsel %vm1417_vm3, %v1544_v27, %v1546_v22  ;;  %v1553_v57 = vrot.slane %v11551_v19, 2 }
  0xa5   :  { %6777 = vmatprep.mubr.msk.f32.mxu0 %vm383_vm2, %v8829_v29  ;;  %6679 = vmatprep.mubr.msk.f32.mxu1 %vm383_vm2, %v11536_v42  ;;  %v1549_v52 = vrot.slane %v11547_v9, 2  ;;  %11548 = vst [vmem:[#allocation37_spill] sm:$0xff] %v8857_v20  ;;  %v1551_v42 = vrot.slane %v11549_v44, 2  ;;  %v11554_v27 = vld [vmem:[#allocation78_spill] sm:$0xff] }
  0xa7   :  { %v8863_v16 = vsel %vm1417_vm3, %v1548_v5, %v1549_v52  ;;  %v11556_v5 = vld [vmem:[#allocation79_spill] sm:$0xff] }
  0xa8   :  { %6778 = vmatmul.mubr.msk.f32.gmra.mxu0 %vm383_vm2, %v8840_v37  ;;  %6680 = vmatmul.mubr.msk.f32.gmra.mxu1 %vm383_vm2, %v11537_v30  ;;  %11550 = vst [vmem:[#allocation38_spill] sm:$0xff] %v8863_v16  ;;  %v11552_v37 = vld [vmem:[#allocation73_spill] sm:$0xff]  ;;  %v8874_v30 = vsel %vm1417_vm3, %v1549_v52, %v1551_v42  ;;  %v1558_v44 = vrot.slane %v11556_v5, 2  ;;  %v11559_v52 = vld [vmem:[#allocation84_spill] sm:$0xff] }
  0xa9   :  { %6780 = vmatprep.mubr.msk.f32.mxu0 %vm383_vm2, %v8846_v40  ;;  %6682 = vmatprep.mubr.msk.f32.mxu1 %vm383_vm2, %v11541_v6  ;;  %v1554_v29 = vrot.slane %v11552_v37, 2  ;;  %11553 = vst [vmem:[#allocation43_spill] sm:$0xff] %v8874_v30  ;;  %v1556_v6 = vrot.slane %v11554_v27, 2  ;;  %11587 = vst [vmem:[#allocation73_spill] sm:$0xff] %v9084_v55 }
  0xaa   :  { %11593 = vst [vmem:[#allocation84_spill] sm:$0xff] %v9110_v62 }
  0xab   :  { %v8880_v22 = vsel %vm1417_vm3, %v1553_v57, %v1554_v29  ;;  %v11561_v57 = vld [vmem:[#allocation87_spill] sm:$0xff] }
  0xac   :  { %6781 = vmatmul.mubr.msk.f32.gmra.mxu0 %vm383_vm2, %v8857_v20  ;;  %6683 = vmatmul.mubr.msk.f32.gmra.mxu1 %vm383_vm2, %v11542_v58  ;;  %11555 = vst [vmem:[#allocation44_spill] sm:$0xff] %v8880_v22  ;;  %v11557_v20 = vld [vmem:[#allocation80_spill] sm:$0xff]  ;;  %v8891_v58 = vsel %vm1417_vm3, %v1554_v29, %v1556_v6  ;;  %v1563_v27 = vrot.slane %v11561_v57, 2  ;;  %v11564_v29 = vld [vmem:[#allocation94_spill] sm:$0xff] }
  0xad   :  { %6783 = vmatprep.mubr.msk.f32.mxu0 %vm383_vm2, %v8863_v16  ;;  %6685 = vmatprep.mubr.msk.f32.mxu1 %vm383_vm2, %v11546_v24  ;;  %v1559_v40 = vrot.slane %v11557_v20, 2  ;;  %11558 = vst [vmem:[#allocation45_spill] sm:$0xff] %v8891_v58  ;;  %v1561_v24 = vrot.slane %v11559_v52, 2 }
  0xaf   :  { %v8897_v42 = vsel %vm1417_vm3, %v1558_v44, %v1559_v40  ;;  %v11566_v44 = vld [vmem:[#allocation97_spill] sm:$0xff] }
  0xb0   :  { %6784 = vmatmul.mubr.msk.f32.gmra.mxu0 %vm383_vm2, %v8874_v30  ;;  %6686 = vmatmul.mubr.msk.f32.gmra.mxu1 %vm383_vm2, %v11547_v9  ;;  %11560 = vst [vmem:[#allocation49_spill] sm:$0xff] %v8897_v42  ;;  %v11562_v30 = vld [vmem:[#allocation88_spill] sm:$0xff]  ;;  %v8908_v9 = vsel %vm1417_vm3, %v1559_v40, %v1561_v24  ;;  %v1568_v52 = vrot.slane %v11566_v44, 2  ;;  %v1571_v40 = vrot.slane %v8312_v28, 2  ;;  %v11570_v24 = vld [vmem:[#allocation103_spill] sm:$0xff] }
  0xb1   :  { %6786 = vmatprep.mubr.msk.f32.mxu0 %vm383_vm2, %v8880_v22  ;;  %6688 = vmatprep.mubr.msk.f32.mxu1 %vm383_vm2, %v11551_v19  ;;  %v1564_v16 = vrot.slane %v11562_v30, 2  ;;  %11563 = vst [vmem:[#allocation51_spill] sm:$0xff] %v8908_v9  ;;  %v1566_v19 = vrot.slane %v11564_v29, 2  ;;  %v11571_v29 = vld [vmem:[#allocation104_spill] sm:$0xff] }
  0xb3   :  { %v8914_v6 = vsel %vm1417_vm3, %v1563_v27, %v1564_v16  ;;  %v1573_v27 = vrot.slane %v11570_v24, 2 }
  0xb4   :  { %6787 = vmatmul.mubr.msk.f32.gmra.mxu0 %vm383_vm2, %v8891_v58  ;;  %6689 = vmatmul.mubr.msk.f32.gmra.mxu1 %vm383_vm2, %v11552_v37  ;;  %11565 = vst [vmem:[#allocation52_spill] sm:$0xff] %v8914_v6  ;;  %v11567_v58 = vld [vmem:[#allocation98_spill] sm:$0xff]  ;;  %v8925_v37 = vsel %vm1417_vm3, %v1564_v16, %v1566_v19  ;;  %v7395_v19 = vld [vmem:[%s11013_s0 + $0x20] sm:$0xff] }
  0xb5   :  { %6789 = vmatprep.mubr.msk.f32.mxu0 %vm383_vm2, %v8897_v42  ;;  %6691 = vmatprep.mubr.msk.f32.mxu1 %vm383_vm2, %v11556_v5  ;;  %v1569_v22 = vrot.slane %v11567_v58, 2  ;;  %11568 = vst [vmem:[#allocation57_spill] sm:$0xff] %v8925_v37  ;;  %v11584_v42 = vld [vmem:[#allocation39_spill] sm:$0xff] }
  0xb7   :  { %v8931_v5 = vsel %vm1417_vm3, %v1568_v52, %v1569_v22  ;;  %v8942_v28 = vsel %vm1417_vm3, %v1569_v22, %v1571_v40  ;;  %v7394_v22 = vld [vmem:[%s11013_s0 + $0x18] sm:$0xff]  ;;  %v8990_v52 = vld [vmem:[%s11013_s0 + $0x30] sm:$0xff] }
  0xb8   :  { %6790 = vmatmul.mubr.msk.f32.gmra.mxu0 %vm383_vm2, %v8908_v9  ;;  %6692 = vmatmul.mubr.msk.f32.gmra.mxu1 %vm383_vm2, %v11557_v20  ;;  %11569 = vst [vmem:[#allocation58_spill] sm:$0xff] %v8931_v5  ;;  %v1574_v9 = vrot.slane %v11571_v29, 2  ;;  %11572 = vst [vmem:[#allocation59_spill] sm:$0xff] %v8942_v28  ;;  %v1576_v20 = vrot.slane %v8373_v45, 2  ;;  %v11575_v45 = vld [vmem:[#allocation12_spill] sm:$0xff] }
  0xb9   :  { %6792 = vmatprep.mubr.msk.f32.mxu0 %vm383_vm2, %v8914_v6  ;;  %6694 = vmatprep.mubr.msk.f32.mxu1 %vm383_vm2, %v11561_v57  ;;  %v11576_v57 = vld [vmem:[#allocation15_spill] sm:$0xff]  ;;  %v8997_v40 = vld [vmem:[%s11014_s1 + $0x1c] sm:$0x7] }
  0xba   :  { %v8948_v16 = vsel %vm1417_vm3, %v1573_v27, %v1574_v9  ;;  %v11578_v27 = vld [vmem:[#allocation23_spill] sm:$0xff] }
  0xbb   :  { %11573 = vst [vmem:[#allocation63_spill] sm:$0xff] %v8948_v16 }
  0xbc   :  { %6793 = vmatmul.mubr.msk.f32.gmra.mxu0 %vm383_vm2, %v8925_v37  ;;  %6695 = vmatmul.mubr.msk.f32.gmra.mxu1 %vm383_vm2, %v11562_v30  ;;  %v8957_v30 = vsel %vm1417_vm3, %v1574_v9, %v1576_v20  ;;  %v9058_v37 = vld [vmem:[%s11013_s0 + $0x60] sm:$0xff] }
  0xbd   :  { %6795 = vmatprep.mubr.msk.f32.mxu0 %vm383_vm2, %v8931_v5  ;;  %6697 = vmatprep.mubr.msk.f32.mxu1 %vm383_vm2, %v11566_v44  ;;  %11574 = vst [vmem:[#allocation65_spill] sm:$0xff] %v8957_v30 }
  0xc0   :  { %6796 = vmatmul.mubr.msk.f32.gmra.mxu0 %vm383_vm2, %v8942_v28  ;;  %6698 = vmatmul.mubr.msk.f32.gmra.mxu1 %vm383_vm2, %v11567_v58  ;;  %v11582_v28 = vld [vmem:[#allocation34_spill] sm:$0xff] }
  0xc1   :  { %6798 = vmatprep.mubr.msk.f32.mxu0 %vm383_vm2, %v8948_v16  ;;  %6700 = vmatprep.mubr.msk.f32.mxu1 %vm383_vm2, %v11570_v24  ;;  %v9047_v16 = vld [vmem:[%s11013_s0 + $0x50] sm:$0xff] }
  0xc4   :  { %6799 = vmatmul.mubr.msk.f32.gmra.mxu0 %vm383_vm2, %v8957_v30  ;;  %6701 = vmatmul.mubr.msk.f32.gmra.mxu1 %vm383_vm2, %v11571_v29  ;;  %v9012_v29 = vld [vmem:[%s11014_s1 + $0x20] sm:$0x7]  ;;  %v11580_v30 = vld [vmem:[#allocation32_spill] sm:$0xff] }
  0xc5   :  { %6901 = vmatprep.mubr.msk.f32.mxu0 %vm383_vm2, %v11575_v45  ;;  %6803 = vmatprep.mubr.msk.f32.mxu1 %vm383_vm2, %v7394_v22  ;;  %v9019_v45 = vld [vmem:[%s11013_s0 + $0x38] sm:$0xff]  ;;  %v11579_v22 = vld [vmem:[#allocation27_spill] sm:$0xff] }
  0xc8   :  { %v8971_v58 = vpop.f32.mrf.mxu0  ;;  %6902 = vmatmul.mubr.msk.f32.vlgmr.msra.gmra.mxu0 %vm383_vm2, %v11576_v57  ;;  %v8975_v9 = vpop.f32.mrf.mxu1  ;;  %6804 = vmatmul.mubr.msk.f32.vlgmr.msra.gmra.mxu1 %vm383_vm2, %v7395_v19  ;;  %v9030_v19 = vld [vmem:[%s11013_s0 + $0x48] sm:$0xff] }
  0xc9   :  { %7096 = vmatpush3.msk.msra.mxu0 %vm512_vm0, %v8457_v15  ;;  %6998 = vmatpush3.msk.msra.mxu1 %vm512_vm0, %v8435_v21  ;;  %v11577_v15 = vld [vmem:[#allocation18_spill] sm:$0xff] }
  0xca   :  { %v8985_v44 = vpop.f32.mrf.mxu0  ;;  %6806 = vmatprep.mubr.msk.f32.mxu1 %vm383_vm2, %v8990_v52  ;;  %v8999_v24 = vpop.f32.mrf.mxu1  ;;  %6904 = vmatprep.mubr.msk.f32.mxu0 %vm383_vm2, %v11577_v15 }
  0xcb   :  { %7193 = vmatprep.subr.msk.mxu1 %vm512_vm0, %v8997_v40  ;;  %7291 = vmatprep.subr.msk.mxu0 %vm512_vm0, %v9012_v29 }
  0xcc   :  { %v9005_v21 = vpop.f32.mrf.mxu0  ;;  %6905 = vmatmul.mubr.msk.f32.gmra.mxu0 %vm383_vm2, %v11578_v27  ;;  %v9014_v20 = vpop.f32.mrf.mxu1  ;;  %6807 = vmatmul.mubr.msk.f32.gmra.mxu1 %vm383_vm2, %v9019_v45 }
  0xcd   :  { %6907 = vmatprep.mubr.msk.f32.mxu0 %vm383_vm2, %v11579_v22  ;;  %6809 = vmatprep.mubr.msk.f32.mxu1 %vm383_vm2, %v9030_v19 }
  0xce   :  { %v9025_v57 = vpop.f32.mrf.mxu0  ;;  %v9036_v27 = vpop.f32.mrf.mxu1 }
  0xd0   :  { %v9038_v15 = vpop.f32.mrf.mxu0  ;;  %6908 = vmatmul.mubr.msk.f32.gmra.mxu0 %vm383_vm2, %v11580_v30  ;;  %v9042_v22 = vpop.f32.mrf.mxu1  ;;  %6810 = vmatmul.mubr.msk.f32.gmra.mxu1 %vm383_vm2, %v9047_v16 }
  0xd1   :  { %11581 = vst [vmem:[#allocation66_spill] sm:$0xff] %v9042_v22  ;;  %6910 = vmatprep.mubr.msk.f32.mxu0 %vm383_vm2, %v11582_v28  ;;  %6812 = vmatprep.mubr.msk.f32.mxu1 %vm383_vm2, %v9058_v37  ;;  %v9073_v28 = vld [vmem:[%s11013_s0 + $0x68] sm:$0xff] }
  0xd2   :  { %v9053_v5 = vpop.f32.mrf.mxu0  ;;  %v9062_v30 = vpop.f32.mrf.mxu1 }
  0xd3   :  { %11583 = vst [vmem:[#allocation70_spill] sm:$0xff] %v9062_v30 }
  0xd4   :  { %v9064_v6 = vpop.f32.mrf.mxu0  ;;  %6911 = vmatmul.mubr.msk.f32.gmra.mxu0 %vm383_vm2, %v11584_v42  ;;  %v9068_v2 = vpop.f32.mrf.mxu1  ;;  %6813 = vmatmul.mubr.msk.f32.gmra.mxu1 %vm383_vm2, %v9073_v28 }
  0xd5   :  { %11585 = vst [vmem:[#allocation72_spill] sm:$0xff] %v9068_v2  ;;  %6913 = vmatprep.mubr.msk.f32.mxu0 %vm383_vm2, %v11586_v33  ;;  %6815 = vmatprep.mubr.msk.f32.mxu1 %vm383_vm2, %v9084_v55  ;;  %v9099_v33 = vld [vmem:[%s11013_s0 + $0x80] sm:$0xff]  ;;  %v11613_v2 = vld [vmem:[#allocation74_spill] sm:$0xff] }
  0xd6   :  { %v9079_v49 = vpop.f32.mrf.mxu0  ;;  %v9088_v42 = vpop.f32.mrf.mxu1  ;;  %11591 = vst [vmem:[#allocation80_spill] sm:$0xff] %v9099_v33 }
  0xd7   :  { %11588 = vst [vmem:[#allocation78_spill] sm:$0xff] %v9088_v42  ;;  %v11607_v42 = vld [vmem:[#allocation67_spill] sm:$0xff] }
  0xd8   :  { %v9090_v61 = vpop.f32.mrf.mxu0  ;;  %6914 = vmatmul.mubr.msk.f32.gmra.mxu0 %vm383_vm2, %v11589_v41  ;;  %v9094_v32 = vpop.f32.mrf.mxu1  ;;  %6816 = vmatmul.mubr.msk.f32.gmra.mxu1 %vm383_vm2, %v9099_v33  ;;  %v11622_v33 = vld [vmem:[#allocation83_spill] sm:$0xff] }
  0xd9   :  { %11590 = vst [vmem:[#allocation79_spill] sm:$0xff] %v9094_v32  ;;  %6916 = vmatprep.mubr.msk.f32.mxu0 %vm383_vm2, %v11592_v35  ;;  %6818 = vmatprep.mubr.msk.f32.mxu1 %vm383_vm2, %v9110_v62  ;;  %v9125_v35 = vld [vmem:[%s11013_s0 + $0x98] sm:$0xff] }
  0xda   :  { %v9105_v47 = vpop.f32.mrf.mxu0  ;;  %v9114_v41 = vpop.f32.mrf.mxu1  ;;  %11597 = vst [vmem:[#allocation94_spill] sm:$0xff] %v9125_v35  ;;  %v11601_v32 = vld [vmem:[#allocation60_spill] sm:$0xff] }
  0xdb   :  { %11594 = vst [vmem:[#allocation87_spill] sm:$0xff] %v9114_v41  ;;  %v9136_v41 = vld [vmem:[%s11013_s0 + $0xa8] sm:$0xff]  ;;  %v11616_v62 = vld [vmem:[#allocation76_spill] sm:$0xff] }
  0xdc   :  { %v9116_v56 = vpop.f32.mrf.mxu0  ;;  %6917 = vmatmul.mubr.msk.f32.gmra.mxu0 %vm383_vm2, %v11595_v60  ;;  %v9120_v10 = vpop.f32.mrf.mxu1  ;;  %6819 = vmatmul.mubr.msk.f32.gmra.mxu1 %vm383_vm2, %v9125_v35  ;;  %11599 = vst [vmem:[#allocation97_spill] sm:$0xff] %v9136_v41  ;;  %v11604_v35 = vld [vmem:[#allocation62_spill] sm:$0xff] }
  0xdd   :  { %11596 = vst [vmem:[#allocation88_spill] sm:$0xff] %v9120_v10  ;;  %6919 = vmatprep.mubr.msk.f32.mxu0 %vm383_vm2, %v11598_v59  ;;  %6821 = vmatprep.mubr.msk.f32.mxu1 %vm383_vm2, %v9136_v41  ;;  %v9151_v59 = vld [vmem:[%s11013_s0 + $0xb0] sm:$0xff] }
  0xde   :  { %v9131_v43 = vpop.f32.mrf.mxu0  ;;  %v9140_v60 = vpop.f32.mrf.mxu1  ;;  %11603 = vst [vmem:[#allocation104_spill] sm:$0xff] %v9151_v59 }
  0xdf   :  { %11600 = vst [vmem:[#allocation98_spill] sm:$0xff] %v9140_v60  ;;  %v9162_v60 = vld [vmem:[%s11013_s0 + $0xc0] sm:$0xff] }
  0xe0   :  { %v9142_v10 = vpop.f32.mrf.mxu0  ;;  %6920 = vmatmul.mubr.msk.f32.gmra.mxu0 %vm383_vm2, %v11601_v32  ;;  %v9146_v46 = vpop.f32.mrf.mxu1  ;;  %6822 = vmatmul.mubr.msk.f32.gmra.mxu1 %vm383_vm2, %v9151_v59  ;;  %11605 = vst [vmem:[#allocation12_spill] sm:$0xff] %v9162_v60 }
  0xe1   :  { %11602 = vst [vmem:[#allocation103_spill] sm:$0xff] %v9146_v46  ;;  %6922 = vmatprep.mubr.msk.f32.mxu0 %vm383_vm2, %v11604_v35  ;;  %6824 = vmatprep.mubr.msk.f32.mxu1 %vm383_vm2, %v9162_v60  ;;  %v9177_v35 = vld [vmem:[%s11013_s0 + $0xc8] sm:$0xff] }
  0xe2   :  { %v9157_v41 = vpop.f32.mrf.mxu0  ;;  %v9166_v32 = vpop.f32.mrf.mxu1  ;;  %11609 = vst [vmem:[#allocation136_spill] sm:$0xff] %v9177_v35 }
  0xe3   :  { %11606 = vst [vmem:[#allocation15_spill] sm:$0xff] %v9166_v32  ;;  %v9188_v32 = vld [vmem:[%s11013_s0 + $0xd8] sm:$0xff] }
  0xe4   :  { %v9168_v46 = vpop.f32.mrf.mxu0  ;;  %6923 = vmatmul.mubr.msk.f32.gmra.mxu0 %vm383_vm2, %v11607_v42  ;;  %v9172_v59 = vpop.f32.mrf.mxu1  ;;  %6825 = vmatmul.mubr.msk.f32.gmra.mxu1 %vm383_vm2, %v9177_v35  ;;  %11611 = vst [vmem:[#allocation137_spill] sm:$0xff] %v9188_v32 }
  0xe5   :  { %11608 = vst [vmem:[#allocation135_spill] sm:$0xff] %v9172_v59  ;;  %6925 = vmatprep.mubr.msk.f32.mxu0 %vm383_vm2, %v11610_v12  ;;  %6827 = vmatprep.mubr.msk.f32.mxu1 %vm383_vm2, %v9188_v32  ;;  %v9203_v12 = vld [vmem:[%s11013_s0 + $0xe0] sm:$0xff] }
  0xe6   :  { %v9183_v60 = vpop.f32.mrf.mxu0  ;;  %v9192_v42 = vpop.f32.mrf.mxu1  ;;  %11615 = vst [vmem:[#allocation140_spill] sm:$0xff] %v9203_v12 }
  0xe7   :  { %11612 = vst [vmem:[#allocation138_spill] sm:$0xff] %v9192_v42  ;;  %v9214_v42 = vld [vmem:[%s11013_s0 + $0xf0] sm:$0xff] }
  0xe8   :  { %v9194_v59 = vpop.f32.mrf.mxu0  ;;  %6926 = vmatmul.mubr.msk.f32.gmra.mxu0 %vm383_vm2, %v11613_v2  ;;  %v9198_v35 = vpop.f32.mrf.mxu1  ;;  %6828 = vmatmul.mubr.msk.f32.gmra.mxu1 %vm383_vm2, %v9203_v12  ;;  %11617 = vst [vmem:[#allocation141_spill] sm:$0xff] %v9214_v42 }
  0xe9   :  { %11614 = vst [vmem:[#allocation139_spill] sm:$0xff] %v9198_v35  ;;  %6928 = vmatprep.mubr.msk.f32.mxu0 %vm383_vm2, %v11616_v62  ;;  %6830 = vmatprep.mubr.msk.f32.mxu1 %vm383_vm2, %v9214_v42  ;;  %v9229_v62 = vld [vmem:[%s11013_s0 + $0xf8] sm:$0xff] }
  0xea   :  { %v9209_v32 = vpop.f32.mrf.mxu0  ;;  %v9218_v2 = vpop.f32.mrf.mxu1  ;;  %11621 = vst [vmem:[#allocation144_spill] sm:$0xff] %v9229_v62 }
  0xeb   :  { %11618 = vst [vmem:[#allocation142_spill] sm:$0xff] %v9218_v2 }
  0xec   :  { %v9220_v35 = vpop.f32.mrf.mxu0  ;;  %6929 = vmatmul.mubr.msk.f32.gmra.mxu0 %vm383_vm2, %v11619_v31  ;;  %v9224_v12 = vpop.f32.mrf.mxu1  ;;  %6831 = vmatmul.mubr.msk.f32.gmra.mxu1 %vm383_vm2, %v9229_v62  ;;  %v11626_v62 = vld [vmem:[#allocation91_spill] sm:$0xff] }
  0xed   :  { %11620 = vst [vmem:[#allocation143_spill] sm:$0xff] %v9224_v12  ;;  %6931 = vmatprep.mubr.msk.f32.mxu0 %vm383_vm2, %v11622_v33  ;;  %6833 = vmatprep.mubr.msk.f32.mxu1 %vm383_vm2, %v8084_v13  ;;  %v11624_v12 = vld [vmem:[#allocation89_spill] sm:$0xff] }
  0xee   :  { %v9235_v42 = vpop.f32.mrf.mxu0  ;;  %v9239_v2 = vpop.f32.mrf.mxu1 }
  0xef   :  { %11623 = vst [vmem:[#allocation145_spill] sm:$0xff] %v9239_v2 }
  0xf0   :  { %v9241_v31 = vpop.f32.mrf.mxu0  ;;  %6932 = vmatmul.mubr.msk.f32.gmra.mxu0 %vm383_vm2, %v11624_v12  ;;  %v9245_v30 = vpop.f32.mrf.mxu1  ;;  %6834 = vmatmul.mubr.msk.f32.gmra.mxu1 %vm383_vm2, %v8089_v50  ;;  %v11630_v50 = vld [vmem:[#allocation101_spill] sm:$0xff] }
  0xf1   :  { %11625 = vst [vmem:[#allocation146_spill] sm:$0xff] %v9245_v30  ;;  %6934 = vmatprep.mubr.msk.f32.mxu0 %vm383_vm2, %v11626_v62  ;;  %6836 = vmatprep.mubr.msk.f32.mxu1 %vm383_vm2, %v8152_v8 }
  0xf2   :  { %v9251_v33 = vpop.f32.mrf.mxu0  ;;  %v9255_v13 = vpop.f32.mrf.mxu1 }
  0xf3   :  { %11627 = vst [vmem:[#allocation147_spill] sm:$0xff] %v9255_v13  ;;  %v9276_v13 = vld [vmem:[%s11013_s0 + $0x180] sm:$0xff] }
  0xf4   :  { %v9257_v2 = vpop.f32.mrf.mxu0  ;;  %6935 = vmatmul.mubr.msk.f32.gmra.mxu0 %vm383_vm2, %v11628_v53  ;;  %v9261_v12 = vpop.f32.mrf.mxu1  ;;  %6837 = vmatmul.mubr.msk.f32.gmra.mxu1 %vm383_vm2, %v8157_v63  ;;  %11632 = vst [vmem:[#allocation150_spill] sm:$0xff] %v9276_v13  ;;  %v9281_v53 = vld [vmem:[%s11013_s0 + $0x188] sm:$0xff]  ;;  %v2628_v30 = vrot.slane %v9276_v13, 1 }
  0xf5   :  { %11629 = vst [vmem:[#allocation148_spill] sm:$0xff] %v9261_v12  ;;  %6937 = vmatprep.mubr.msk.f32.mxu0 %vm383_vm2, %v11630_v50  ;;  %6839 = vmatprep.mubr.msk.f32.mxu1 %vm383_vm2, %v8210_v17  ;;  %11633 = vst [vmem:[#allocation151_spill] sm:$0xff] %v9281_v53  ;;  %v11634_v50 = vld [vmem:[#allocation105_spill] sm:$0xff]  ;;  %v11636_v17 = vld [vmem:[#allocation107_spill] sm:$0xff]  ;;  %v2629_v22 = vrot.slane %v9281_v53, 1 }
  0xf6   :  { %v9267_v62 = vpop.f32.mrf.mxu0  ;;  %v9271_v8 = vpop.f32.mrf.mxu1 }
  0xf7   :  { %11631 = vst [vmem:[#allocation149_spill] sm:$0xff] %v9271_v8 }
  0xf8   :  { %v9283_v63 = vpop.f32.mrf.mxu0  ;;  %6938 = vmatmul.mubr.msk.f32.gmra.mxu0 %vm383_vm2, %v11634_v50  ;;  %v9287_v12 = vpop.f32.mrf.mxu1  ;;  %6840 = vmatmul.mubr.msk.f32.gmra.mxu1 %vm383_vm2, %v11488_v26  ;;  %v9302_v50 = vld [vmem:[%s11013_s0 + $0x190] sm:$0x3] }
  0xf9   :  { %11635 = vst [vmem:[#allocation152_spill] sm:$0xff] %v9287_v12  ;;  %6940 = vmatprep.mubr.msk.f32.mxu0 %vm383_vm2, %v11636_v17  ;;  %6842 = vmatprep.mubr.msk.f32.mxu1 %vm383_vm2, %v11492_v34  ;;  %11637 = vst [vmem:[#allocation153_spill] sm:$0xff] %v9302_v50  ;;  %v2631_v34 = vrot.slane %v9302_v50, 1 }
  0xfa   :  { %v9293_v8 = vpop.f32.mrf.mxu0  ;;  %v9304_v12 = vpop.f32.mrf.mxu1 }
  0xfb   :  { %11638 = vst [vmem:[#allocation154_spill] sm:$0xff] %v9304_v12  ;;  %v9322_v12 = vsel %vm220_vm1, %v2628_v30, %v2629_v22 }
  0xfc   :  { %v9306_v26 = vpop.f32.mrf.mxu0  ;;  %6941 = vmatmul.mubr.msk.f32.gmra.mxu0 %vm383_vm2, %v8382_v38  ;;  %v9310_v17 = vpop.f32.mrf.mxu1  ;;  %6843 = vmatmul.mubr.msk.f32.gmra.mxu1 %vm383_vm2, %v11493_v11  ;;  %11640 = vst [vmem:[#allocation156_spill] sm:$0xff] %v9322_v12 }
  0xfd   :  { %11639 = vst [vmem:[#allocation155_spill] sm:$0xff] %v9310_v17  ;;  %6943 = vmatprep.mubr.msk.f32.mxu0 %vm383_vm2, %v8391_v25  ;;  %6845 = vmatprep.mubr.msk.f32.mxu1 %vm383_vm2, %v8322_v48  ;;  %v9337_v48 = vsel %vm220_vm1, %v2629_v22, %v2631_v34  ;;  %v7414_v34 = vld [vmem:[%s11013_s0 + $0x1c8] sm:$0xff] }
  0xfe   :  { %v9317_v55 = vpop.f32.mrf.mxu0  ;;  %v9324_v18 = vpop.f32.mrf.mxu1  ;;  %11643 = vst [vmem:[#allocation159_spill] sm:$0xff] %v9337_v48 }
  0xff   :  { %11641 = vst [vmem:[#allocation157_spill] sm:$0xff] %v9324_v18 }
 0x100   :  { %v9326_v38 = vpop.f32.mrf.mxu0  ;;  %6944 = vmatmul.mubr.msk.f32.gmra.mxu0 %vm383_vm2, %v8407_v54  ;;  %v9330_v11 = vpop.f32.mrf.mxu1  ;;  %6846 = vmatmul.mubr.msk.f32.gmra.mxu1 %vm383_vm2, %v8327_v36  ;;  %v11646_v36 = vld [vmem:[#allocation13_spill] sm:$0xff] }
 0x101   :  { %11642 = vst [vmem:[#allocation158_spill] sm:$0xff] %v9330_v11  ;;  %6946 = vmatprep.mubr.msk.f32.mxu0 %vm383_vm2, %v9322_v12  ;;  %6848 = vmatprep.mubr.msk.f32.mxu1 %vm383_vm2, %v9276_v13  ;;  %v7415_v11 = vld [vmem:[%s11013_s0 + $0x1d0] sm:$0xff]  ;;  %v11652_v13 = vld [vmem:[#allocation24_spill] sm:$0xff] }
 0x102   :  { %v9339_v30 = vpop.f32.mrf.mxu0  ;;  %v9343_v25 = vpop.f32.mrf.mxu1 }
 0x103   :  { %11644 = vst [vmem:[#allocation160_spill] sm:$0xff] %v9343_v25 }
 0x104   :  { %v9345_v18 = vpop.f32.mrf.mxu0  ;;  %6947 = vmatmul.mubr.msk.f32.gmra.mxu0 %vm383_vm2, %v9337_v48  ;;  %v9349_v54 = vpop.f32.mrf.mxu1  ;;  %6849 = vmatmul.mubr.msk.f32.gmra.mxu1 %vm383_vm2, %v9281_v53  ;;  %v11648_v48 = vld [vmem:[#allocation17_spill] sm:$0xff] }
 0x105   :  { %11645 = vst [vmem:[#allocation161_spill] sm:$0xff] %v9349_v54  ;;  %6949 = vmatprep.mubr.msk.f32.mxu0 %vm383_vm2, %v11646_v36  ;;  %6851 = vmatprep.mubr.msk.f32.mxu1 %vm383_vm2, %v7414_v34  ;;  %v11649_v36 = vld [vmem:[#allocation21_spill] sm:$0xff] }
 0x106   :  { %v9355_v22 = vpop.f32.mrf.mxu0  ;;  %v9361_v12 = vpop.f32.mrf.mxu1  ;;  %v9375_v34 = vld [vmem:[%s11013_s0 + $0x1e0] sm:$0xff] }
 0x107   :  { %11647 = vst [vmem:[#allocation13_spill] sm:$0xff] %v9361_v12  ;;  %11650 = vst [vmem:[#allocation17_spill] sm:$0xff] %v9375_v34 }
 0x108   :  { %v6707_v25 = vpop.f32.mrf.mxu0  ;;  %6950 = vmatmul.mubr.msk.f32.gmra.mxu0 %vm383_vm2, %v11648_v48  ;;  %v6609_v54 = vpop.f32.mrf.mxu1  ;;  %6852 = vmatmul.mubr.msk.f32.gmra.mxu1 %vm383_vm2, %v7415_v11 }
 0x109   :  { %6952 = vmatprep.mubr.msk.f32.mxu0 %vm383_vm2, %v11649_v36  ;;  %v1104_v50 = vadd.f32 %v6609_v54, %v8971_v58  ;;  %6854 = vmatprep.mubr.msk.f32.mxu1 %vm383_vm2, %v9375_v34  ;;  %v9387_v54 = vld [vmem:[%s11013_s0 + $0x1e8] sm:$0xff]  ;;  %v11654_v58 = vld [vmem:[#allocation28_spill] sm:$0xff] }
 0x10a   :  { %v1777_v17 = vpop.f32.mrf.mxu0  ;;  %v1098_v48 = vpop.f32.mrf.mxu1  ;;  %11653 = vst [vmem:[#allocation163_spill] sm:$0xff] %v9387_v54 }
 0x10b   :  { %v9379_v12 = vadd.f32 %v6707_v25, %v1104_v50  ;;  %v1099_v53 = vadd.f32 %v1098_v48, %v8985_v44  ;;  %v9399_v48 = vld [vmem:[%s11013_s0 + $0x1f8] sm:$0xff] }
 0x10c   :  { %v6710_v11 = vpop.f32.mrf.mxu0  ;;  %6953 = vmatmul.mubr.msk.f32.gmra.mxu0 %vm383_vm2, %v11652_v13  ;;  %v6612_v36 = vpop.f32.mrf.mxu1  ;;  %6855 = vmatmul.mubr.msk.f32.gmra.mxu1 %vm383_vm2, %v9387_v54 }
 0x10d   :  { %11651 = vst [vmem:[#allocation162_spill] sm:$0xff] %v9379_v12  ;;  %6955 = vmatprep.mubr.msk.f32.mxu0 %vm383_vm2, %v11654_v58  ;;  %v9393_v25 = vadd.f32 %v1777_v17, %v1099_v53  ;;  %v1114_v44 = vadd.f32 %v6612_v36, %v9005_v21  ;;  %6857 = vmatprep.mubr.msk.f32.mxu1 %vm383_vm2, %v9399_v48  ;;  %v11656_v58 = vld [vmem:[#allocation33_spill] sm:$0xff]  ;;  %v11658_v17 = vld [vmem:[#allocation36_spill] sm:$0xff] }
 0x10e   :  { %v1787_v50 = vpop.f32.mrf.mxu0  ;;  %v1108_v13 = vpop.f32.mrf.mxu1  ;;  %v9411_v21 = vld [vmem:[%s11013_s0 + $0x200] sm:$0xff] }
 0x10f   :  { %v9403_v12 = vadd.f32 %v6710_v11, %v1114_v44  ;;  %v1109_v54 = vadd.f32 %v1108_v13, %v9025_v57  ;;  %11657 = vst [vmem:[#allocation165_spill] sm:$0xff] %v9411_v21  ;;  %v9423_v11 = vld [vmem:[%s11013_s0 + $0x210] sm:$0xff] }
 0x110   :  { %v6713_v34 = vpop.f32.mrf.mxu0  ;;  %6956 = vmatmul.mubr.msk.f32.gmra.mxu0 %vm383_vm2, %v11656_v58  ;;  %v6615_v53 = vpop.f32.mrf.mxu1  ;;  %6858 = vmatmul.mubr.msk.f32.gmra.mxu1 %vm383_vm2, %v9411_v21 }
 0x111   :  { %11655 = vst [vmem:[#allocation164_spill] sm:$0xff] %v9403_v12  ;;  %6958 = vmatprep.mubr.msk.f32.mxu0 %vm383_vm2, %v11658_v17  ;;  %v9417_v36 = vadd.f32 %v1787_v50, %v1109_v54  ;;  %v1124_v57 = vadd.f32 %v6615_v53, %v9038_v15  ;;  %6860 = vmatprep.mubr.msk.f32.mxu1 %vm383_vm2, %v9423_v11  ;;  %v11660_v17 = vld [vmem:[#allocation40_spill] sm:$0xff]  ;;  %v11662_v50 = vld [vmem:[#allocation42_spill] sm:$0xff] }
 0x112   :  { %v1797_v13 = vpop.f32.mrf.mxu0  ;;  %v1118_v44 = vpop.f32.mrf.mxu1  ;;  %v9435_v15 = vld [vmem:[%s11013_s0 + $0x218] sm:$0xff] }
 0x113   :  { %v9427_v58 = vadd.f32 %v6713_v34, %v1124_v57  ;;  %v1119_v12 = vadd.f32 %v1118_v44, %v9053_v5  ;;  %11661 = vst [vmem:[#allocation167_spill] sm:$0xff] %v9435_v15  ;;  %v9447_v57 = vld [vmem:[%s11013_s0 + $0x228] sm:$0xff] }
 0x114   :  { %v6716_v21 = vpop.f32.mrf.mxu0  ;;  %6959 = vmatmul.mubr.msk.f32.gmra.mxu0 %vm383_vm2, %v11660_v17  ;;  %v6618_v54 = vpop.f32.mrf.mxu1  ;;  %6861 = vmatmul.mubr.msk.f32.gmra.mxu1 %vm383_vm2, %v9435_v15 }
 0x115   :  { %11659 = vst [vmem:[#allocation166_spill] sm:$0xff] %v9427_v58  ;;  %6961 = vmatprep.mubr.msk.f32.mxu0 %vm383_vm2, %v11662_v50  ;;  %v9441_v34 = vadd.f32 %v1797_v13, %v1119_v12  ;;  %v1134_v5 = vadd.f32 %v6618_v54, %v9064_v6  ;;  %6863 = vmatprep.mubr.msk.f32.mxu1 %vm383_vm2, %v9447_v57  ;;  %v11664_v50 = vld [vmem:[#allocation47_spill] sm:$0xff]  ;;  %v11666_v13 = vld [vmem:[#allocation50_spill] sm:$0xff] }
 0x116   :  { %v1807_v53 = vpop.f32.mrf.mxu0  ;;  %v1128_v44 = vpop.f32.mrf.mxu1  ;;  %v9459_v6 = vld [vmem:[%s11013_s0 + $0x230] sm:$0xff] }
 0x117   :  { %v9451_v17 = vadd.f32 %v6716_v21, %v1134_v5  ;;  %v1129_v58 = vadd.f32 %v1128_v44, %v9079_v49  ;;  %11665 = vst [vmem:[#allocation169_spill] sm:$0xff] %v9459_v6  ;;  %v9471_v5 = vld [vmem:[%s11013_s0 + $0x240] sm:$0xff] }
 0x118   :  { %v6719_v15 = vpop.f32.mrf.mxu0  ;;  %6962 = vmatmul.mubr.msk.f32.gmra.mxu0 %vm383_vm2, %v11664_v50  ;;  %v6621_v12 = vpop.f32.mrf.mxu1  ;;  %6864 = vmatmul.mubr.msk.f32.gmra.mxu1 %vm383_vm2, %v9459_v6 }
 0x119   :  { %11663 = vst [vmem:[#allocation168_spill] sm:$0xff] %v9451_v17  ;;  %6964 = vmatprep.mubr.msk.f32.mxu0 %vm383_vm2, %v11666_v13  ;;  %v9465_v21 = vadd.f32 %v1807_v53, %v1129_v58  ;;  %v1144_v49 = vadd.f32 %v6621_v12, %v9090_v61  ;;  %6866 = vmatprep.mubr.msk.f32.mxu1 %vm383_vm2, %v9471_v5  ;;  %v11668_v13 = vld [vmem:[#allocation54_spill] sm:$0xff]  ;;  %v11670_v53 = vld [vmem:[#allocation56_spill] sm:$0xff] }
 0x11a   :  { %v1817_v54 = vpop.f32.mrf.mxu0  ;;  %v1138_v44 = vpop.f32.mrf.mxu1  ;;  %v9483_v61 = vld [vmem:[%s11013_s0 + $0x248] sm:$0xff] }
 0x11b   :  { %v9475_v50 = vadd.f32 %v6719_v15, %v1144_v49  ;;  %v1139_v17 = vadd.f32 %v1138_v44, %v9105_v47  ;;  %11669 = vst [vmem:[#allocation171_spill] sm:$0xff] %v9483_v61  ;;  %v9495_v49 = vld [vmem:[%s11013_s0 + $0x258] sm:$0xff] }
 0x11c   :  { %v6722_v6 = vpop.f32.mrf.mxu0  ;;  %6965 = vmatmul.mubr.msk.f32.gmra.mxu0 %vm383_vm2, %v11668_v13  ;;  %v6624_v58 = vpop.f32.mrf.mxu1  ;;  %6867 = vmatmul.mubr.msk.f32.gmra.mxu1 %vm383_vm2, %v9483_v61 }
 0x11d   :  { %11667 = vst [vmem:[#allocation170_spill] sm:$0xff] %v9475_v50  ;;  %6967 = vmatprep.mubr.msk.f32.mxu0 %vm383_vm2, %v11670_v53  ;;  %v9489_v15 = vadd.f32 %v1817_v54, %v1139_v17  ;;  %v1154_v47 = vadd.f32 %v6624_v58, %v9116_v56  ;;  %6869 = vmatprep.mubr.msk.f32.mxu1 %vm383_vm2, %v9495_v49  ;;  %v11672_v53 = vld [vmem:[#allocation61_spill] sm:$0xff]  ;;  %v11674_v54 = vld [vmem:[#allocation64_spill] sm:$0xff] }
 0x11e   :  { %v1827_v12 = vpop.f32.mrf.mxu0  ;;  %v1148_v44 = vpop.f32.mrf.mxu1  ;;  %v9507_v56 = vld [vmem:[%s11013_s0 + $0x260] sm:$0xff] }
 0x11f   :  { %v9499_v13 = vadd.f32 %v6722_v6, %v1154_v47  ;;  %v1149_v50 = vadd.f32 %v1148_v44, %v9131_v43  ;;  %11673 = vst [vmem:[#allocation173_spill] sm:$0xff] %v9507_v56  ;;  %v9519_v47 = vld [vmem:[%s11013_s0 + $0x270] sm:$0xff] }
 0x120   :  { %v6725_v61 = vpop.f32.mrf.mxu0  ;;  %6968 = vmatmul.mubr.msk.f32.gmra.mxu0 %vm383_vm2, %v11672_v53  ;;  %v6627_v17 = vpop.f32.mrf.mxu1  ;;  %6870 = vmatmul.mubr.msk.f32.gmra.mxu1 %vm383_vm2, %v9507_v56 }
 0x121   :  { %11671 = vst [vmem:[#allocation172_spill] sm:$0xff] %v9499_v13  ;;  %6970 = vmatprep.mubr.msk.f32.mxu0 %vm383_vm2, %v11674_v54  ;;  %v9513_v6 = vadd.f32 %v1827_v12, %v1149_v50  ;;  %v1164_v43 = vadd.f32 %v6627_v17, %v9142_v10  ;;  %6872 = vmatprep.mubr.msk.f32.mxu1 %vm383_vm2, %v9519_v47  ;;  %v11676_v54 = vld [vmem:[#allocation68_spill] sm:$0xff]  ;;  %v11678_v12 = vld [vmem:[#allocation71_spill] sm:$0xff] }
 0x122   :  { %v1837_v58 = vpop.f32.mrf.mxu0  ;;  %v1158_v44 = vpop.f32.mrf.mxu1  ;;  %v9531_v10 = vld [vmem:[%s11013_s0 + $0x278] sm:$0xff] }
 0x123   :  { %v9523_v53 = vadd.f32 %v6725_v61, %v1164_v43  ;;  %v1159_v13 = vadd.f32 %v1158_v44, %v9157_v41  ;;  %11677 = vst [vmem:[#allocation175_spill] sm:$0xff] %v9531_v10  ;;  %v9543_v43 = vld [vmem:[%s11013_s0 + $0x288] sm:$0xff] }
 0x124   :  { %v6728_v56 = vpop.f32.mrf.mxu0  ;;  %6971 = vmatmul.mubr.msk.f32.gmra.mxu0 %vm383_vm2, %v11676_v54  ;;  %v6630_v50 = vpop.f32.mrf.mxu1  ;;  %6873 = vmatmul.mubr.msk.f32.gmra.mxu1 %vm383_vm2, %v9531_v10 }
 0x125   :  { %11675 = vst [vmem:[#allocation174_spill] sm:$0xff] %v9523_v53  ;;  %6973 = vmatprep.mubr.msk.f32.mxu0 %vm383_vm2, %v11678_v12  ;;  %v9537_v61 = vadd.f32 %v1837_v58, %v1159_v13  ;;  %v1174_v41 = vadd.f32 %v6630_v50, %v9168_v46  ;;  %6875 = vmatprep.mubr.msk.f32.mxu1 %vm383_vm2, %v9543_v43  ;;  %v11680_v12 = vld [vmem:[#allocation75_spill] sm:$0xff]  ;;  %v11682_v58 = vld [vmem:[#allocation77_spill] sm:$0xff] }
 0x126   :  { %v1847_v17 = vpop.f32.mrf.mxu0  ;;  %v1168_v44 = vpop.f32.mrf.mxu1  ;;  %v9555_v46 = vld [vmem:[%s11013_s0 + $0x290] sm:$0xff] }
 0x127   :  { %v9547_v54 = vadd.f32 %v6728_v56, %v1174_v41  ;;  %v1169_v53 = vadd.f32 %v1168_v44, %v9183_v60  ;;  %11681 = vst [vmem:[#allocation177_spill] sm:$0xff] %v9555_v46  ;;  %v9567_v41 = vld [vmem:[%s11013_s0 + $0x2a0] sm:$0xff] }
 0x128   :  { %v6731_v10 = vpop.f32.mrf.mxu0  ;;  %6974 = vmatmul.mubr.msk.f32.gmra.mxu0 %vm383_vm2, %v11680_v12  ;;  %v6633_v13 = vpop.f32.mrf.mxu1  ;;  %6876 = vmatmul.mubr.msk.f32.gmra.mxu1 %vm383_vm2, %v9555_v46 }
 0x129   :  { %11679 = vst [vmem:[#allocation176_spill] sm:$0xff] %v9547_v54  ;;  %6976 = vmatprep.mubr.msk.f32.mxu0 %vm383_vm2, %v11682_v58  ;;  %v9561_v56 = vadd.f32 %v1847_v17, %v1169_v53  ;;  %v1184_v60 = vadd.f32 %v6633_v13, %v9194_v59  ;;  %6878 = vmatprep.mubr.msk.f32.mxu1 %vm383_vm2, %v9567_v41  ;;  %v11684_v58 = vld [vmem:[#allocation82_spill] sm:$0xff]  ;;  %v11686_v17 = vld [vmem:[#allocation85_spill] sm:$0xff] }
 0x12a   :  { %v1857_v50 = vpop.f32.mrf.mxu0  ;;  %v1178_v44 = vpop.f32.mrf.mxu1  ;;  %v9579_v59 = vld [vmem:[%s11013_s0 + $0x2a8] sm:$0xff] }
 0x12b   :  { %v9571_v12 = vadd.f32 %v6731_v10, %v1184_v60  ;;  %v1179_v54 = vadd.f32 %v1178_v44, %v9209_v32  ;;  %11685 = vst [vmem:[#allocation179_spill] sm:$0xff] %v9579_v59  ;;  %v9591_v60 = vld [vmem:[%s11013_s0 + $0x2b8] sm:$0xff] }
 0x12c   :  { %v6734_v46 = vpop.f32.mrf.mxu0  ;;  %6977 = vmatmul.mubr.msk.f32.gmra.mxu0 %vm383_vm2, %v11684_v58  ;;  %v6636_v53 = vpop.f32.mrf.mxu1  ;;  %6879 = vmatmul.mubr.msk.f32.gmra.mxu1 %vm383_vm2, %v9579_v59 }
 0x12d   :  { %11683 = vst [vmem:[#allocation178_spill] sm:$0xff] %v9571_v12  ;;  %6979 = vmatprep.mubr.msk.f32.mxu0 %vm383_vm2, %v11686_v17  ;;  %v9585_v10 = vadd.f32 %v1857_v50, %v1179_v54  ;;  %v1194_v32 = vadd.f32 %v6636_v53, %v9220_v35  ;;  %6881 = vmatprep.mubr.msk.f32.mxu1 %vm383_vm2, %v9591_v60  ;;  %v11688_v17 = vld [vmem:[#allocation90_spill] sm:$0xff]  ;;  %v9603_v35 = vld [vmem:[%s11013_s0 + $0x2c0] sm:$0xff] }
 0x12e   :  { %v1867_v13 = vpop.f32.mrf.mxu0  ;;  %v1188_v44 = vpop.f32.mrf.mxu1  ;;  %11689 = vst [vmem:[#allocation181_spill] sm:$0xff] %v9603_v35  ;;  %v11690_v50 = vld [vmem:[#allocation93_spill] sm:$0xff] }
 0x12f   :  { %v9595_v58 = vadd.f32 %v6734_v46, %v1194_v32  ;;  %v1189_v12 = vadd.f32 %v1188_v44, %v9235_v42  ;;  %v9615_v32 = vld [vmem:[%s11013_s0 + $0x2d0] sm:$0xff] }
 0x130   :  { %v6737_v59 = vpop.f32.mrf.mxu0  ;;  %6980 = vmatmul.mubr.msk.f32.gmra.mxu0 %vm383_vm2, %v11688_v17  ;;  %v6639_v54 = vpop.f32.mrf.mxu1  ;;  %6882 = vmatmul.mubr.msk.f32.gmra.mxu1 %vm383_vm2, %v9603_v35 }
 0x131   :  { %11687 = vst [vmem:[#allocation180_spill] sm:$0xff] %v9595_v58  ;;  %6982 = vmatprep.mubr.msk.f32.mxu0 %vm383_vm2, %v11690_v50  ;;  %v9609_v46 = vadd.f32 %v1867_v13, %v1189_v12  ;;  %v1204_v42 = vadd.f32 %v6639_v54, %v9241_v31  ;;  %6884 = vmatprep.mubr.msk.f32.mxu1 %vm383_vm2, %v9615_v32  ;;  %v11692_v50 = vld [vmem:[#allocation100_spill] sm:$0xff]  ;;  %v11693_v13 = vld [vmem:[#allocation102_spill] sm:$0xff] }
 0x132   :  { %v1877_v53 = vpop.f32.mrf.mxu0  ;;  %v1198_v44 = vpop.f32.mrf.mxu1  ;;  %v9627_v31 = vld [vmem:[%s11013_s0 + $0x2d8] sm:$0xff] }
 0x133   :  { %v9619_v17 = vadd.f32 %v6737_v59, %v1204_v42  ;;  %v1199_v58 = vadd.f32 %v1198_v44, %v9251_v33  ;;  %v9639_v42 = vld [vmem:[%s11013_s0 + $0x2e8] sm:$0xff] }
 0x134   :  { %v6740_v35 = vpop.f32.mrf.mxu0  ;;  %6983 = vmatmul.mubr.msk.f32.gmra.mxu0 %vm383_vm2, %v11692_v50  ;;  %v6642_v12 = vpop.f32.mrf.mxu1  ;;  %6885 = vmatmul.mubr.msk.f32.gmra.mxu1 %vm383_vm2, %v9627_v31  ;;  %v9646_v50 = vld [vmem:[%s11013_s0 + $0x330] sm:$0xff] }
 0x135   :  { %11691 = vst [vmem:[#allocation182_spill] sm:$0xff] %v9619_v17  ;;  %6985 = vmatprep.mubr.msk.f32.mxu0 %vm383_vm2, %v11693_v13  ;;  %v9633_v59 = vadd.f32 %v1877_v53, %v1199_v58  ;;  %v1214_v33 = vadd.f32 %v6642_v12, %v9257_v2  ;;  %6887 = vmatprep.mubr.msk.f32.mxu1 %vm383_vm2, %v9639_v42  ;;  %v9651_v58 = vld [vmem:[%s11013_s0 + $0x338] sm:$0xff]  ;;  %v11696_v13 = vld [vmem:[#allocation106_spill] sm:$0xff]  ;;  %v9661_v17 = vld [vmem:[%s11013_s0 + $0x2f0] sm:$0xff] }
 0x136   :  { %v1887_v54 = vpop.f32.mrf.mxu0  ;;  %v1208_v44 = vpop.f32.mrf.mxu1 }
 0x137   :  { %11694 = vst [vmem:[#allocation183_spill] sm:$0xff] %v9633_v59  ;;  %v9653_v2 = vadd.f32 %v6740_v35, %v1214_v33  ;;  %v1209_v53 = vadd.f32 %v1208_v44, %v9267_v62  ;;  %v9673_v44 = vld [vmem:[%s11013_s0 + $0x300] sm:$0xff] }
 0x138   :  { %v6743_v12 = vpop.f32.mrf.mxu0  ;;  %6986 = vmatmul.mubr.msk.f32.gmra.mxu0 %vm383_vm2, %v11696_v13  ;;  %v6645_v59 = vpop.f32.mrf.mxu1  ;;  %6888 = vmatmul.mubr.msk.f32.gmra.mxu1 %vm383_vm2, %v9661_v17  ;;  %11698 = vst [vmem:[#allocation186_spill] sm:$0xff] %v9673_v44  ;;  %v2633_v13 = vrot.slane %v9646_v50, 1 }
 0x139   :  { %11695 = vst [vmem:[#allocation184_spill] sm:$0xff] %v9653_v2  ;;  %6988 = vmatprep.mubr.msk.f32.mxu0 %vm383_vm2, %v8366_v51  ;;  %v9667_v35 = vadd.f32 %v1887_v54, %v1209_v53  ;;  %v1224_v62 = vadd.f32 %v6645_v59, %v9283_v63  ;;  %6890 = vmatprep.mubr.msk.f32.mxu1 %vm383_vm2, %v9673_v44  ;;  %v2634_v2 = vrot.slane %v9651_v58, 1  ;;  %v9682_v54 = vld [vmem:[%s11013_s0 + $0x340] sm:$0x3]  ;;  %v9692_v44 = vld [vmem:[%s11013_s0 + $0x308] sm:$0xff] }
 0x13a   :  { %v1897_v33 = vpop.f32.mrf.mxu0  ;;  %11699 = vst [vmem:[#allocation187_spill] sm:$0xff] %v9682_v54  ;;  %v1218_v53 = vpop.f32.mrf.mxu1  ;;  %11701 = vst [vmem:[#allocation189_spill] sm:$0xff] %v9692_v44 }
 0x13b   :  { %11697 = vst [vmem:[#allocation185_spill] sm:$0xff] %v9667_v35  ;;  %v9684_v63 = vadd.f32 %v6743_v12, %v1224_v62  ;;  %v1219_v59 = vadd.f32 %v1218_v53, %v9293_v8  ;;  %v2636_v12 = vrot.slane %v9682_v54, 1 }
 0x13c   :  { %v6746_v51 = vpop.f32.mrf.mxu0  ;;  %6989 = vmatmul.mubr.msk.f32.gmra.mxu0 %vm383_vm2, %v8385_v0  ;;  %v6648_v35 = vpop.f32.mrf.mxu1  ;;  %6891 = vmatmul.mubr.msk.f32.gmra.mxu1 %vm383_vm2, %v9692_v44  ;;  %v9705_v0 = vld [vmem:[%s11013_s0 + $0x318] sm:$0xff] }
 0x13d   :  { %11700 = vst [vmem:[#allocation188_spill] sm:$0xff] %v9684_v63  ;;  %6991 = vmatprep.mubr.msk.f32.mxu0 %vm383_vm2, %v8397_v23  ;;  %v9699_v62 = vadd.f32 %v1897_v33, %v1219_v59  ;;  %v1234_v8 = vadd.f32 %v6648_v35, %v9306_v26  ;;  %6893 = vmatprep.mubr.msk.f32.mxu1 %vm383_vm2, %v9705_v0  ;;  %v9720_v35 = vld [vmem:[%s11013_s0 + $0x320] sm:$0xff] }
 0x13e   :  { %v1907_v53 = vpop.f32.mrf.mxu0  ;;  %v9710_v63 = vsel %vm220_vm1, %v2633_v13, %v2634_v2  ;;  %v1228_v44 = vpop.f32.mrf.mxu1 }
 0x13f   :  { %11702 = vst [vmem:[#allocation190_spill] sm:$0xff] %v9710_v63  ;;  %v9712_v23 = vadd.f32 %v6746_v51, %v1234_v8  ;;  %v1229_v33 = vadd.f32 %v1228_v44, %v9317_v55  ;;  %v9727_v51 = vsel %vm220_vm1, %v2634_v2, %v2636_v12 }
 0x140   :  { %v6749_v59 = vpop.f32.mrf.mxu0  ;;  %6992 = vmatmul.mubr.msk.f32.gmra.mxu0 %vm383_vm2, %v8412_v3  ;;  %v6651_v26 = vpop.f32.mrf.mxu1  ;;  %6894 = vmatmul.mubr.msk.f32.gmra.mxu1 %vm383_vm2, %v9720_v35  ;;  %11704 = vst [vmem:[#allocation192_spill] sm:$0xff] %v9727_v51 }
 0x141   :  { %11703 = vst [vmem:[#allocation191_spill] sm:$0xff] %v9712_v23  ;;  %6994 = vmatprep.mubr.msk.f32.mxu0 %vm383_vm2, %v9710_v63  ;;  %v9729_v55 = vadd.f32 %v1907_v53, %v1229_v33  ;;  %v1244_v13 = vadd.f32 %v6651_v26, %v9326_v38  ;;  %6896 = vmatprep.mubr.msk.f32.mxu1 %vm383_vm2, %v9646_v50 }
 0x142   :  { %v1917_v44 = vpop.f32.mrf.mxu0  ;;  %v1238_v8 = vpop.f32.mrf.mxu1 }
 0x143   :  { %v9734_v3 = vadd.f32 %v6749_v59, %v1244_v13  ;;  %v1239_v54 = vadd.f32 %v1238_v8, %v9339_v30  ;;  %v11707_v8 = vld [vmem:[#allocation66_spill] sm:$0xff] }
 0x144   :  { %v6752_v23 = vpop.f32.mrf.mxu0  ;;  %6995 = vmatmul.mubr.msk.f32.gmra.mxu0 %vm383_vm2, %v9727_v51  ;;  %v6654_v63 = vpop.f32.mrf.mxu1  ;;  %6897 = vmatmul.mubr.msk.f32.gmra.mxu1 %vm383_vm2, %v9651_v58  ;;  %v11726_v51 = vld [vmem:[#allocation104_spill] sm:$0xff] }
 0x145   :  { %7097 = vmatprep.mubr.msk.f32.mxu0 %vm383_vm2, %v8990_v52  ;;  %v9743_v38 = vadd.f32 %v1917_v44, %v1239_v54  ;;  %v1254_v2 = vadd.f32 %v6654_v63, %v9345_v18  ;;  %6999 = vmatprep.mubr.msk.f32.mxu1 %vm383_vm2, %v8430_v14  ;;  %v11705_v44 = vld [vmem:[#allocation115_spill] sm:$0xff] }
 0x146   :  { %v1927_v12 = vpop.f32.mrf.mxu0  ;;  %v1248_v30 = vpop.f32.mrf.mxu1 }
 0x147   :  { %v9748_v53 = vadd.f32 %v6752_v23, %v1254_v2  ;;  %v1249_v33 = vadd.f32 %v1248_v30, %v9355_v22  ;;  %v11708_v30 = vld [vmem:[#allocation116_spill] sm:$0xff] }
 0x148   :  { %v6755_v59 = vpop.f32.mrf.mxu0  ;;  %7098 = vmatmul.mubr.msk.f32.vlgmr.msra.gmra.mxu0 %vm383_vm2, %v9019_v45  ;;  %v6657_v26 = vpop.f32.mrf.mxu1  ;;  %7000 = vmatmul.mubr.msk.f32.vlgmr.msra.gmra.mxu1 %vm383_vm2, %v8442_v1 }
 0x149   :  { %7292 = vmatpush3.msk.msra.mxu0 %vm512_vm0, %v9012_v29  ;;  %v9757_v18 = vadd.f32 %v1927_v12, %v1249_v33  ;;  %v1264_v14 = vadd.f32 %v6657_v26, %v8975_v9  ;;  %7194 = vmatpush3.msk.msra.mxu1 %vm512_vm0, %v8997_v40 }
 0x14a   :  { %v1937_v23 = vpop.f32.mrf.mxu0  ;;  %7002 = vmatprep.mubr.msk.f32.mxu1 %vm383_vm2, %v8450_v4  ;;  %v1258_v52 = vpop.f32.mrf.mxu1  ;;  %7100 = vmatprep.mubr.msk.f32.mxu0 %vm383_vm2, %v9030_v19 }
 0x14b   :  { %v9766_v45 = vadd.f32 %v6755_v59, %v1264_v14  ;;  %v1259_v1 = vadd.f32 %v1258_v52, %v8999_v24  ;;  %v11709_v59 = vld [vmem:[#allocation70_spill] sm:$0xff]  ;;  %v11710_v14 = vld [vmem:[#allocation80_spill] sm:$0xff]  ;;  %v11711_v52 = vld [vmem:[#allocation117_spill] sm:$0xff] }
 0x14c   :  { %v6758_v29 = vpop.f32.mrf.mxu0  ;;  %7101 = vmatmul.mubr.msk.f32.gmra.mxu0 %vm383_vm2, %v9047_v16  ;;  %v6660_v9 = vpop.f32.mrf.mxu1  ;;  %7003 = vmatmul.mubr.msk.f32.gmra.mxu1 %vm383_vm2, %v8472_v7 }
 0x14d   :  { %7103 = vmatprep.mubr.msk.f32.mxu0 %vm383_vm2, %v9058_v37  ;;  %v9775_v40 = vadd.f32 %v1937_v23, %v1259_v1  ;;  %v1274_v22 = vadd.f32 %v6660_v9, %v9014_v20  ;;  %7005 = vmatprep.mubr.msk.f32.mxu1 %vm383_vm2, %v8478_v39  ;;  %v11706_v37 = vld [vmem:[#allocation73_spill] sm:$0xff]  ;;  %v11712_v1 = vld [vmem:[#allocation84_spill] sm:$0xff] }
 0x14e   :  { %v1947_v19 = vpop.f32.mrf.mxu0  ;;  %v1268_v24 = vpop.f32.mrf.mxu1  ;;  %v11714_v9 = vld [vmem:[#allocation72_spill] sm:$0xff] }
 0x14f   :  { %v9780_v54 = vadd.f32 %v6758_v29, %v1274_v22  ;;  %v1269_v16 = vadd.f32 %v1268_v24, %v9036_v27  ;;  %v11715_v24 = vld [vmem:[#allocation118_spill] sm:$0xff] }
 0x150   :  { %v6761_v63 = vpop.f32.mrf.mxu0  ;;  %7104 = vmatmul.mubr.msk.f32.gmra.mxu0 %vm383_vm2, %v9073_v28  ;;  %v6663_v13 = vpop.f32.mrf.mxu1  ;;  %7006 = vmatmul.mubr.msk.f32.gmra.mxu1 %vm383_vm2, %v11705_v44 }
 0x151   :  { %7106 = vmatprep.mubr.msk.f32.mxu0 %vm383_vm2, %v11706_v37  ;;  %v9789_v20 = vadd.f32 %v1947_v19, %v1269_v16  ;;  %v1284_v2 = vadd.f32 %v6663_v13, %v11707_v8  ;;  %7008 = vmatprep.mubr.msk.f32.mxu1 %vm383_vm2, %v11708_v30  ;;  %v11717_v13 = vld [vmem:[#allocation78_spill] sm:$0xff] }
 0x152   :  { %v1957_v12 = vpop.f32.mrf.mxu0  ;;  %v1278_v27 = vpop.f32.mrf.mxu1 }
 0x153   :  { %v9794_v33 = vadd.f32 %v6761_v63, %v1284_v2  ;;  %v1279_v28 = vadd.f32 %v1278_v27, %v11709_v59  ;;  %v11718_v2 = vld [vmem:[#allocation94_spill] sm:$0xff]  ;;  %v11719_v59 = vld [vmem:[#allocation119_spill] sm:$0xff] }
 0x154   :  { %v6764_v26 = vpop.f32.mrf.mxu0  ;;  %7107 = vmatmul.mubr.msk.f32.gmra.mxu0 %vm383_vm2, %v11710_v14  ;;  %v6666_v23 = vpop.f32.mrf.mxu1  ;;  %7009 = vmatmul.mubr.msk.f32.gmra.mxu1 %vm383_vm2, %v11711_v52  ;;  %v11722_v14 = vld [vmem:[#allocation79_spill] sm:$0xff] }
 0x155   :  { %7109 = vmatprep.mubr.msk.f32.mxu0 %vm383_vm2, %v11712_v1  ;;  %v9803_v29 = vadd.f32 %v1957_v12, %v1279_v28  ;;  %v1294_v22 = vadd.f32 %v6666_v23, %v11714_v9  ;;  %7011 = vmatprep.mubr.msk.f32.mxu1 %vm383_vm2, %v11715_v24  ;;  %v11720_v12 = vld [vmem:[#allocation97_spill] sm:$0xff] }
 0x156   :  { %v1967_v19 = vpop.f32.mrf.mxu0  ;;  %v1288_v16 = vpop.f32.mrf.mxu1 }
 0x157   :  { %11713 = vst [vmem:[#allocation115_spill] sm:$0xff] %v9803_v29  ;;  %v9808_v63 = vadd.f32 %v6764_v26, %v1294_v22  ;;  %v1289_v37 = vadd.f32 %v1288_v16, %v11717_v13  ;;  %v11723_v26 = vld [vmem:[#allocation120_spill] sm:$0xff]  ;;  %v11725_v16 = vld [vmem:[#allocation87_spill] sm:$0xff] }
 0x158   :  { %v6767_v8 = vpop.f32.mrf.mxu0  ;;  %7110 = vmatmul.mubr.msk.f32.gmra.mxu0 %vm383_vm2, %v11718_v2  ;;  %v6669_v27 = vpop.f32.mrf.mxu1  ;;  %7012 = vmatmul.mubr.msk.f32.gmra.mxu1 %vm383_vm2, %v11719_v59  ;;  %v11727_v59 = vld [vmem:[#allocation121_spill] sm:$0xff] }
 0x159   :  { %11716 = vst [vmem:[#allocation73_spill] sm:$0xff] %v9808_v63  ;;  %7112 = vmatprep.mubr.msk.f32.mxu0 %vm383_vm2, %v11720_v12  ;;  %v9817_v28 = vadd.f32 %v1967_v19, %v1289_v37  ;;  %v1304_v23 = vadd.f32 %v6669_v27, %v11722_v14  ;;  %7014 = vmatprep.mubr.msk.f32.mxu1 %vm383_vm2, %v11723_v26  ;;  %v11728_v19 = vld [vmem:[#allocation12_spill] sm:$0xff]  ;;  %v11735_v26 = vld [vmem:[#allocation123_spill] sm:$0xff] }
 0x15a   :  { %v1977_v1 = vpop.f32.mrf.mxu0  ;;  %v1298_v9 = vpop.f32.mrf.mxu1  ;;  %v11730_v27 = vld [vmem:[#allocation88_spill] sm:$0xff] }
 0x15b   :  { %11721 = vst [vmem:[#allocation66_spill] sm:$0xff] %v9817_v28  ;;  %v9822_v22 = vadd.f32 %v6767_v8, %v1304_v23  ;;  %v1299_v13 = vadd.f32 %v1298_v9, %v11725_v16  ;;  %v11731_v8 = vld [vmem:[#allocation122_spill] sm:$0xff]  ;;  %v11734_v28 = vld [vmem:[#allocation136_spill] sm:$0xff] }
 0x15c   :  { %v6770_v2 = vpop.f32.mrf.mxu0  ;;  %7113 = vmatmul.mubr.msk.f32.gmra.mxu0 %vm383_vm2, %v11726_v51  ;;  %v6672_v63 = vpop.f32.mrf.mxu1  ;;  %7015 = vmatmul.mubr.msk.f32.gmra.mxu1 %vm383_vm2, %v11727_v59  ;;  %v11733_v16 = vld [vmem:[#allocation98_spill] sm:$0xff] }
 0x15d   :  { %11724 = vst [vmem:[#allocation116_spill] sm:$0xff] %v9822_v22  ;;  %7115 = vmatprep.mubr.msk.f32.mxu0 %vm383_vm2, %v11728_v19  ;;  %v9831_v37 = vadd.f32 %v1977_v1, %v1299_v13  ;;  %v1314_v12 = vadd.f32 %v6672_v63, %v11730_v27  ;;  %7017 = vmatprep.mubr.msk.f32.mxu1 %vm383_vm2, %v11731_v8  ;;  %v11736_v1 = vld [vmem:[#allocation137_spill] sm:$0xff]  ;;  %v11738_v13 = vld [vmem:[#allocation103_spill] sm:$0xff] }
 0x15e   :  { %v1987_v14 = vpop.f32.mrf.mxu0  ;;  %v1308_v23 = vpop.f32.mrf.mxu1  ;;  %v11743_v8 = vld [vmem:[#allocation125_spill] sm:$0xff] }
 0x15f   :  { %11729 = vst [vmem:[#allocation70_spill] sm:$0xff] %v9831_v37  ;;  %v9836_v9 = vadd.f32 %v6770_v2, %v1314_v12  ;;  %v1309_v51 = vadd.f32 %v1308_v23, %v11733_v16  ;;  %v11739_v2 = vld [vmem:[#allocation124_spill] sm:$0xff]  ;;  %v11741_v16 = vld [vmem:[#allocation15_spill] sm:$0xff] }
 0x160   :  { %v6773_v22 = vpop.f32.mrf.mxu0  ;;  %7116 = vmatmul.mubr.msk.f32.gmra.mxu0 %vm383_vm2, %v11734_v28  ;;  %v6675_v59 = vpop.f32.mrf.mxu1  ;;  %7018 = vmatmul.mubr.msk.f32.gmra.mxu1 %vm383_vm2, %v11735_v26  ;;  %v11742_v37 = vld [vmem:[#allocation140_spill] sm:$0xff] }
 0x161   :  { %11732 = vst [vmem:[#allocation80_spill] sm:$0xff] %v9836_v9  ;;  %7118 = vmatprep.mubr.msk.f32.mxu0 %vm383_vm2, %v11736_v1  ;;  %v9845_v63 = vadd.f32 %v1987_v14, %v1309_v51  ;;  %v1324_v19 = vadd.f32 %v6675_v59, %v11738_v13  ;;  %7020 = vmatprep.mubr.msk.f32.mxu1 %vm383_vm2, %v11739_v2  ;;  %v11744_v14 = vld [vmem:[#allocation141_spill] sm:$0xff]  ;;  %v11746_v51 = vld [vmem:[#allocation135_spill] sm:$0xff] }
 0x162   :  { %v1997_v27 = vpop.f32.mrf.mxu0  ;;  %v1318_v12 = vpop.f32.mrf.mxu1  ;;  %v11751_v2 = vld [vmem:[#allocation127_spill] sm:$0xff] }
 0x163   :  { %11737 = vst [vmem:[#allocation117_spill] sm:$0xff] %v9845_v63  ;;  %v9850_v23 = vadd.f32 %v6773_v22, %v1324_v19  ;;  %v1319_v28 = vadd.f32 %v1318_v12, %v11741_v16  ;;  %v11747_v22 = vld [vmem:[#allocation126_spill] sm:$0xff]  ;;  %v11750_v63 = vld [vmem:[#allocation144_spill] sm:$0xff] }
 0x164   :  { %v6776_v9 = vpop.f32.mrf.mxu0  ;;  %7119 = vmatmul.mubr.msk.f32.gmra.mxu0 %vm383_vm2, %v11742_v37  ;;  %v6678_v26 = vpop.f32.mrf.mxu1  ;;  %7021 = vmatmul.mubr.msk.f32.gmra.mxu1 %vm383_vm2, %v11743_v8  ;;  %v11749_v16 = vld [vmem:[#allocation138_spill] sm:$0xff] }
 0x165   :  { %11740 = vst [vmem:[#allocation84_spill] sm:$0xff] %v9850_v23  ;;  %7121 = vmatprep.mubr.msk.f32.mxu0 %vm383_vm2, %v11744_v14  ;;  %v9859_v59 = vadd.f32 %v1997_v27, %v1319_v28  ;;  %v1334_v1 = vadd.f32 %v6678_v26, %v11746_v51  ;;  %7023 = vmatprep.mubr.msk.f32.mxu1 %vm383_vm2, %v11747_v22  ;;  %v7444_v26 = vld [vmem:[%s11013_s0 + $0x108] sm:$0xff]  ;;  %v11754_v51 = vld [vmem:[#allocation128_spill] sm:$0xff] }
 0x166   :  { %v2007_v13 = vpop.f32.mrf.mxu0  ;;  %v1328_v19 = vpop.f32.mrf.mxu1 }
 0x167   :  { %11745 = vst [vmem:[#allocation72_spill] sm:$0xff] %v9859_v59  ;;  %v9864_v12 = vadd.f32 %v6776_v9, %v1334_v1  ;;  %v1329_v37 = vadd.f32 %v1328_v19, %v11749_v16  ;;  %v11753_v9 = vld [vmem:[#allocation139_spill] sm:$0xff]  ;;  %v11756_v19 = vld [vmem:[#allocation142_spill] sm:$0xff] }
 0x168   :  { %v6779_v23 = vpop.f32.mrf.mxu0  ;;  %7122 = vmatmul.mubr.msk.f32.gmra.mxu0 %vm383_vm2, %v11750_v63  ;;  %v6681_v8 = vpop.f32.mrf.mxu1  ;;  %7024 = vmatmul.mubr.msk.f32.gmra.mxu1 %vm383_vm2, %v11751_v2  ;;  %v7445_v2 = vld [vmem:[%s11013_s0 + $0x110] sm:$0xff]  ;;  %v11782_v59 = vld [vmem:[#allocation154_spill] sm:$0xff] }
 0x169   :  { %11748 = vst [vmem:[#allocation118_spill] sm:$0xff] %v9864_v12  ;;  %7124 = vmatprep.mubr.msk.f32.mxu0 %vm383_vm2, %v7444_v26  ;;  %v9875_v27 = vadd.f32 %v2007_v13, %v1329_v37  ;;  %v1344_v28 = vadd.f32 %v6681_v8, %v11753_v9  ;;  %7026 = vmatprep.mubr.msk.f32.mxu1 %vm383_vm2, %v11754_v51  ;;  %v11757_v37 = vld [vmem:[#allocation129_spill] sm:$0xff]  ;;  %v11759_v26 = vld [vmem:[#allocation143_spill] sm:$0xff]  ;;  %v7447_v51 = vld [vmem:[%s11013_s0 + $0x128] sm:$0xff] }
 0x16a   :  { %v2017_v14 = vpop.f32.mrf.mxu0  ;;  %v1338_v1 = vpop.f32.mrf.mxu1  ;;  %v7446_v8 = vld [vmem:[%s11013_s0 + $0x120] sm:$0xff] }
 0x16b   :  { %11752 = vst [vmem:[#allocation78_spill] sm:$0xff] %v9875_v27  ;;  %v9880_v63 = vadd.f32 %v6779_v23, %v1344_v28  ;;  %v1339_v16 = vadd.f32 %v1338_v1, %v11756_v19  ;;  %v11760_v1 = vld [vmem:[#allocation130_spill] sm:$0xff] }
 0x16c   :  { %v6782_v12 = vpop.f32.mrf.mxu0  ;;  %7125 = vmatmul.mubr.msk.f32.gmra.mxu0 %vm383_vm2, %v7445_v2  ;;  %v6684_v13 = vpop.f32.mrf.mxu1  ;;  %7027 = vmatmul.mubr.msk.f32.gmra.mxu1 %vm383_vm2, %v11757_v37 }
 0x16d   :  { %11755 = vst [vmem:[#allocation94_spill] sm:$0xff] %v9880_v63  ;;  %7127 = vmatprep.mubr.msk.f32.mxu0 %vm383_vm2, %v7446_v8  ;;  %v9893_v23 = vadd.f32 %v2017_v14, %v1339_v16  ;;  %v1354_v9 = vadd.f32 %v6684_v13, %v11759_v26  ;;  %7029 = vmatprep.mubr.msk.f32.mxu1 %vm383_vm2, %v11760_v1  ;;  %v11762_v63 = vld [vmem:[#allocation145_spill] sm:$0xff]  ;;  %v11763_v16 = vld [vmem:[#allocation131_spill] sm:$0xff]  ;;  %v7448_v13 = vld [vmem:[%s11013_s0 + $0x138] sm:$0xff] }
 0x16e   :  { %v2027_v28 = vpop.f32.mrf.mxu0  ;;  %v1348_v19 = vpop.f32.mrf.mxu1  ;;  %v7449_v1 = vld [vmem:[%s11013_s0 + $0x140] sm:$0xff] }
 0x16f   :  { %11758 = vst [vmem:[#allocation97_spill] sm:$0xff] %v9893_v23  ;;  %v9898_v2 = vadd.f32 %v6782_v12, %v1354_v9  ;;  %v1349_v27 = vadd.f32 %v1348_v19, %v11762_v63  ;;  %v11765_v63 = vld [vmem:[#allocation146_spill] sm:$0xff]  ;;  %v11766_v9 = vld [vmem:[#allocation132_spill] sm:$0xff] }
 0x170   :  { %v6785_v37 = vpop.f32.mrf.mxu0  ;;  %7128 = vmatmul.mubr.msk.f32.gmra.mxu0 %vm383_vm2, %v7447_v51  ;;  %v6687_v14 = vpop.f32.mrf.mxu1  ;;  %7030 = vmatmul.mubr.msk.f32.gmra.mxu1 %vm383_vm2, %v11763_v16 }
 0x171   :  { %11761 = vst [vmem:[#allocation79_spill] sm:$0xff] %v9898_v2  ;;  %7130 = vmatprep.mubr.msk.f32.mxu0 %vm383_vm2, %v7448_v13  ;;  %v9911_v12 = vadd.f32 %v2027_v28, %v1349_v27  ;;  %v1364_v8 = vadd.f32 %v6687_v14, %v11765_v63  ;;  %7032 = vmatprep.mubr.msk.f32.mxu1 %vm383_vm2, %v11766_v9  ;;  %v11768_v2 = vld [vmem:[#allocation147_spill] sm:$0xff]  ;;  %v11769_v28 = vld [vmem:[#allocation86_spill] sm:$0xff]  ;;  %v7451_v9 = vld [vmem:[%s11013_s0 + $0x158] sm:$0xff] }
 0x172   :  { %v2037_v26 = vpop.f32.mrf.mxu0  ;;  %v1358_v19 = vpop.f32.mrf.mxu1  ;;  %v7450_v14 = vld [vmem:[%s11013_s0 + $0x150] sm:$0xff] }
 0x173   :  { %11764 = vst [vmem:[#allocation87_spill] sm:$0xff] %v9911_v12  ;;  %v9916_v51 = vadd.f32 %v6785_v37, %v1364_v8  ;;  %v1359_v23 = vadd.f32 %v1358_v19, %v11768_v2  ;;  %v11771_v2 = vld [vmem:[#allocation148_spill] sm:$0xff] }
 0x174   :  { %v6788_v16 = vpop.f32.mrf.mxu0  ;;  %7131 = vmatmul.mubr.msk.f32.gmra.mxu0 %vm383_vm2, %v7449_v1  ;;  %v6690_v27 = vpop.f32.mrf.mxu1  ;;  %7033 = vmatmul.mubr.msk.f32.gmra.mxu1 %vm383_vm2, %v11769_v28  ;;  %v11772_v8 = vld [vmem:[#allocation92_spill] sm:$0xff] }
 0x175   :  { %11767 = vst [vmem:[#allocation104_spill] sm:$0xff] %v9916_v51  ;;  %7133 = vmatprep.mubr.msk.f32.mxu0 %vm383_vm2, %v7450_v14  ;;  %v9929_v37 = vadd.f32 %v2037_v26, %v1359_v23  ;;  %v1374_v13 = vadd.f32 %v6690_v27, %v11771_v2  ;;  %7035 = vmatprep.mubr.msk.f32.mxu1 %vm383_vm2, %v11772_v8  ;;  %v11774_v51 = vld [vmem:[#allocation149_spill] sm:$0xff]  ;;  %v11775_v26 = vld [vmem:[#allocation95_spill] sm:$0xff]  ;;  %v7452_v27 = vld [vmem:[%s11013_s0 + $0x168] sm:$0xff] }
 0x176   :  { %v2047_v63 = vpop.f32.mrf.mxu0  ;;  %v1368_v19 = vpop.f32.mrf.mxu1 }
 0x177   :  { %11770 = vst [vmem:[#allocation12_spill] sm:$0xff] %v9929_v37  ;;  %v9934_v1 = vadd.f32 %v6788_v16, %v1374_v13  ;;  %v1369_v12 = vadd.f32 %v1368_v19, %v11774_v51  ;;  %v11777_v51 = vld [vmem:[#allocation152_spill] sm:$0xff]  ;;  %v11779_v19 = vld [vmem:[#allocation150_spill] sm:$0xff]  ;;  %v11780_v37 = vld [vmem:[#allocation151_spill] sm:$0xff] }
 0x178   :  { %v6791_v28 = vpop.f32.mrf.mxu0  ;;  %7134 = vmatmul.mubr.msk.f32.gmra.mxu0 %vm383_vm2, %v7451_v9  ;;  %v6693_v23 = vpop.f32.mrf.mxu1  ;;  %7036 = vmatmul.mubr.msk.f32.gmra.mxu1 %vm383_vm2, %v11775_v26  ;;  %v11778_v13 = vld [vmem:[#allocation96_spill] sm:$0xff]  ;;  %v3100_v9 = vrot.slane %v11779_v19, 2  ;;  %v3101_v8 = vrot.slane %v11780_v37, 2 }
 0x179   :  { %11773 = vst [vmem:[#allocation88_spill] sm:$0xff] %v9934_v1  ;;  %7136 = vmatprep.mubr.msk.f32.mxu0 %vm383_vm2, %v7452_v27  ;;  %v9947_v16 = vadd.f32 %v2047_v63, %v1369_v12  ;;  %v1384_v14 = vadd.f32 %v6693_v23, %v11777_v51  ;;  %7038 = vmatprep.mubr.msk.f32.mxu1 %vm383_vm2, %v11778_v13  ;;  %v7453_v12 = vld [vmem:[%s11013_s0 + $0x170] sm:$0xff]  ;;  %v11783_v23 = vld [vmem:[#allocation133_spill] sm:$0xff] }
 0x17a   :  { %v2057_v2 = vpop.f32.mrf.mxu0  ;;  %v1378_v1 = vpop.f32.mrf.mxu1 }
 0x17b   :  { %11776 = vst [vmem:[#allocation98_spill] sm:$0xff] %v9947_v16  ;;  %v9954_v26 = vadd.f32 %v6791_v28, %v1384_v14  ;;  %v1379_v22 = vadd.f32 %v1378_v1, %v11782_v59  ;;  %v11785_v28 = vld [vmem:[#allocation155_spill] sm:$0xff]  ;;  %v11786_v59 = vld [vmem:[#allocation134_spill] sm:$0xff]  ;;  %v9973_v1 = vld [vmem:[%s11013_s0 + $0x198] sm:$0xff] }
 0x17c   :  { %v6794_v29 = vpop.f32.mrf.mxu0  ;;  %7137 = vmatmul.mubr.msk.f32.gmra.mxu0 %vm383_vm2, %v7453_v12  ;;  %v6696_v63 = vpop.f32.mrf.mxu1  ;;  %7039 = vmatmul.mubr.msk.f32.gmra.mxu1 %vm383_vm2, %v11783_v23  ;;  %11787 = vst [vmem:[#allocation103_spill] sm:$0xff] %v9973_v1  ;;  %v11788_v12 = vld [vmem:[#allocation153_spill] sm:$0xff]  ;;  %v9977_v23 = vsel %vm1417_vm3, %v3100_v9, %v3101_v8 }
 0x17d   :  { %11781 = vst [vmem:[#allocation136_spill] sm:$0xff] %v9954_v26  ;;  %7139 = vmatprep.mubr.msk.f32.mxu0 %vm383_vm2, %v11779_v19  ;;  %v9965_v27 = vadd.f32 %v2057_v2, %v1379_v22  ;;  %v1394_v51 = vadd.f32 %v6696_v63, %v11785_v28  ;;  %7041 = vmatprep.mubr.msk.f32.mxu1 %vm383_vm2, %v11786_v59  ;;  %v3103_v26 = vrot.slane %v11788_v12, 2  ;;  %11789 = vst [vmem:[#allocation15_spill] sm:$0xff] %v9977_v23  ;;  %v11791_v22 = vld [vmem:[#allocation157_spill] sm:$0xff] }
 0x17e   :  { %v2067_v14 = vpop.f32.mrf.mxu0  ;;  %v1388_v16 = vpop.f32.mrf.mxu1  ;;  %v9991_v9 = vld [vmem:[%s11013_s0 + $0x1a0] sm:$0xff] }
 0x17f   :  { %11784 = vst [vmem:[#allocation137_spill] sm:$0xff] %v9965_v27  ;;  %v9979_v19 = vadd.f32 %v6794_v29, %v1394_v51  ;;  %v1389_v2 = vadd.f32 %v1388_v16, %v11791_v22  ;;  %v11792_v27 = vld [vmem:[#allocation5_spill] sm:$0xff]  ;;  %11793 = vst [vmem:[#allocation141_spill] sm:$0xff] %v9991_v9  ;;  %v11795_v51 = vld [vmem:[#allocation158_spill] sm:$0xff] }
 0x180   :  { %v6797_v63 = vpop.f32.mrf.mxu0  ;;  %7140 = vmatmul.mubr.msk.f32.gmra.mxu0 %vm383_vm2, %v11780_v37  ;;  %v6699_v28 = vpop.f32.mrf.mxu1  ;;  %7042 = vmatmul.mubr.msk.f32.gmra.mxu1 %vm383_vm2, %v11792_v27  ;;  %v9999_v37 = vsel %vm1417_vm3, %v3101_v8, %v3103_v26  ;;  %v11798_v27 = vld [vmem:[#allocation160_spill] sm:$0xff]  ;;  %v11800_v8 = vld [vmem:[#allocation161_spill] sm:$0xff] }
 0x181   :  { %11790 = vst [vmem:[#allocation140_spill] sm:$0xff] %v9979_v19  ;;  %7142 = vmatprep.mubr.msk.f32.mxu0 %vm383_vm2, %v9973_v1  ;;  %v9993_v29 = vadd.f32 %v2067_v14, %v1389_v2  ;;  %v1404_v16 = vadd.f32 %v6699_v28, %v11795_v51  ;;  %7044 = vmatprep.mubr.msk.f32.mxu1 %vm383_vm2, %v9977_v23  ;;  %11796 = vst [vmem:[#allocation138_spill] sm:$0xff] %v9999_v37  ;;  %v11799_v2 = vld [vmem:[#allocation17_spill] sm:$0xff]  ;;  %v11803_v23 = vld [vmem:[#allocation163_spill] sm:$0xff] }
 0x182   :  { %v2077_v12 = vpop.f32.mrf.mxu0  ;;  %v1398_v22 = vpop.f32.mrf.mxu1 }
 0x183   :  { %11794 = vst [vmem:[#allocation135_spill] sm:$0xff] %v9993_v29  ;;  %v10001_v19 = vadd.f32 %v6797_v63, %v1404_v16  ;;  %v1399_v1 = vadd.f32 %v1398_v22, %v11798_v27  ;;  %v11801_v63 = vld [vmem:[#allocation6_spill] sm:$0xff]  ;;  %v11802_v22 = vld [vmem:[#allocation13_spill] sm:$0xff] }
 0x184   :  { %v6800_v59 = vpop.f32.mrf.mxu0  ;;  %7143 = vmatmul.mubr.msk.f32.gmra.mxu0 %vm383_vm2, %v9991_v9  ;;  %v6702_v14 = vpop.f32.mrf.mxu1  ;;  %7045 = vmatmul.mubr.msk.f32.gmra.mxu1 %vm383_vm2, %v9999_v37  ;;  %v11804_v9 = vld [vmem:[#allocation7_spill] sm:$0xff] }
 0x185   :  { %11797 = vst [vmem:[#allocation144_spill] sm:$0xff] %v10001_v19  ;;  %7145 = vmatprep.mubr.msk.f32.mxu0 %vm383_vm2, %v11799_v2  ;;  %v10010_v28 = vadd.f32 %v2077_v12, %v1399_v1  ;;  %v1414_v26 = vadd.f32 %v6702_v14, %v11800_v8  ;;  %7047 = vmatprep.mubr.msk.f32.mxu1 %vm383_vm2, %v11801_v63  ;;  %v11805_v12 = vld [vmem:[#allocation162_spill] sm:$0xff] }
 0x186   :  { %v2087_v51 = vpop.f32.mrf.mxu0  ;;  %v1408_v27 = vpop.f32.mrf.mxu1 }
 0x187   :  { %v10015_v16 = vadd.f32 %v6800_v59, %v1414_v26  ;;  %v1409_v19 = vadd.f32 %v1408_v27, %v11802_v22  ;;  %v11806_v59 = vld [vmem:[#allocation8_spill] sm:$0xff]  ;;  %v11808_v27 = vld [vmem:[#allocation165_spill] sm:$0xff] }
 0x188   :  { %v6903_v29 = vpop.f32.mrf.mxu0  ;;  %7146 = vmatmul.mubr.msk.f32.gmra.mxu0 %vm383_vm2, %v11803_v23  ;;  %v6805_v37 = vpop.f32.mrf.mxu1  ;;  %7048 = vmatmul.mubr.msk.f32.gmra.mxu1 %vm383_vm2, %v11804_v9  ;;  %v11809_v22 = vld [vmem:[#allocation9_spill] sm:$0xff] }
 0x189   :  { %7148 = vmatprep.mubr.msk.f32.mxu0 %vm383_vm2, %v9399_v48  ;;  %v10024_v1 = vadd.f32 %v2087_v51, %v1409_v19  ;;  %v2563_v14 = vadd.f32 %v6805_v37, %v11805_v12  ;;  %7050 = vmatprep.mubr.msk.f32.mxu1 %vm383_vm2, %v11806_v59  ;;  %v11810_v19 = vld [vmem:[#allocation164_spill] sm:$0xff] }
 0x18a   :  { %v2717_v2 = vpop.f32.mrf.mxu0  ;;  %v2243_v8 = vpop.f32.mrf.mxu1 }
 0x18b   :  { %v10029_v26 = vadd.f32 %v6903_v29, %v2563_v14  ;;  %v2562_v23 = vadd.f32 %v2243_v8, %v9393_v25  ;;  %v11811_v29 = vld [vmem:[#allocation10_spill] sm:$0xff] }
 0x18c   :  { %v6906_v63 = vpop.f32.mrf.mxu0  ;;  %7149 = vmatmul.mubr.msk.f32.gmra.mxu0 %vm383_vm2, %v11808_v27  ;;  %v6808_v9 = vpop.f32.mrf.mxu1  ;;  %7051 = vmatmul.mubr.msk.f32.gmra.mxu1 %vm383_vm2, %v11809_v22  ;;  %v11813_v27 = vld [vmem:[#allocation167_spill] sm:$0xff] }
 0x18d   :  { %11807 = vst [vmem:[#allocation139_spill] sm:$0xff] %v10029_v26  ;;  %7151 = vmatprep.mubr.msk.f32.mxu0 %vm383_vm2, %v9423_v11  ;;  %v10038_v48 = vadd.f32 %v2717_v2, %v2562_v23  ;;  %v2565_v37 = vadd.f32 %v6808_v9, %v11810_v19  ;;  %7053 = vmatprep.mubr.msk.f32.mxu1 %vm383_vm2, %v11811_v29  ;;  %v11814_v22 = vld [vmem:[#allocation11_spill] sm:$0xff]  ;;  %v11815_v2 = vld [vmem:[#allocation166_spill] sm:$0xff] }
 0x18e   :  { %v2727_v51 = vpop.f32.mrf.mxu0  ;;  %v2253_v25 = vpop.f32.mrf.mxu1 }
 0x18f   :  { %v10043_v12 = vadd.f32 %v6906_v63, %v2565_v37  ;;  %v2564_v14 = vadd.f32 %v2253_v25, %v9417_v36  ;;  %v11816_v63 = vld [vmem:[#allocation14_spill] sm:$0xff] }
 0x190   :  { %v6909_v8 = vpop.f32.mrf.mxu0  ;;  %7152 = vmatmul.mubr.msk.f32.gmra.mxu0 %vm383_vm2, %v11813_v27  ;;  %v6811_v26 = vpop.f32.mrf.mxu1  ;;  %7054 = vmatmul.mubr.msk.f32.gmra.mxu1 %vm383_vm2, %v11814_v22  ;;  %v11818_v27 = vld [vmem:[#allocation169_spill] sm:$0xff]  ;;  %v11819_v22 = vld [vmem:[#allocation16_spill] sm:$0xff] }
 0x191   :  { %11812 = vst [vmem:[#allocation142_spill] sm:$0xff] %v10043_v12  ;;  %7154 = vmatprep.mubr.msk.f32.mxu0 %vm383_vm2, %v9447_v57  ;;  %v10052_v11 = vadd.f32 %v2727_v51, %v2564_v14  ;;  %v2567_v23 = vadd.f32 %v6811_v26, %v11815_v2  ;;  %7056 = vmatprep.mubr.msk.f32.mxu1 %vm383_vm2, %v11816_v63  ;;  %v11820_v26 = vld [vmem:[#allocation168_spill] sm:$0xff] }
 0x192   :  { %v2737_v9 = vpop.f32.mrf.mxu0  ;;  %v2263_v36 = vpop.f32.mrf.mxu1 }
 0x193   :  { %v10057_v19 = vadd.f32 %v6909_v8, %v2567_v23  ;;  %v2566_v37 = vadd.f32 %v2263_v36, %v9441_v34  ;;  %v11821_v8 = vld [vmem:[#allocation19_spill] sm:$0xff] }
 0x194   :  { %v6912_v25 = vpop.f32.mrf.mxu0  ;;  %7155 = vmatmul.mubr.msk.f32.gmra.mxu0 %vm383_vm2, %v11818_v27  ;;  %v6814_v12 = vpop.f32.mrf.mxu1  ;;  %7057 = vmatmul.mubr.msk.f32.gmra.mxu1 %vm383_vm2, %v11819_v22  ;;  %v11823_v27 = vld [vmem:[#allocation171_spill] sm:$0xff]  ;;  %v11824_v22 = vld [vmem:[#allocation20_spill] sm:$0xff] }
 0x195   :  { %11817 = vst [vmem:[#allocation143_spill] sm:$0xff] %v10057_v19  ;;  %7157 = vmatprep.mubr.msk.f32.mxu0 %vm383_vm2, %v9471_v5  ;;  %v10066_v57 = vadd.f32 %v2737_v9, %v2566_v37  ;;  %v2569_v51 = vadd.f32 %v6814_v12, %v11820_v26  ;;  %7059 = vmatprep.mubr.msk.f32.mxu1 %vm383_vm2, %v11821_v8  ;;  %v11825_v12 = vld [vmem:[#allocation170_spill] sm:$0xff] }
 0x196   :  { %v2747_v14 = vpop.f32.mrf.mxu0  ;;  %v2273_v34 = vpop.f32.mrf.mxu1 }
 0x197   :  { %v10071_v2 = vadd.f32 %v6912_v25, %v2569_v51  ;;  %v2568_v23 = vadd.f32 %v2273_v34, %v9465_v21  ;;  %v11826_v25 = vld [vmem:[#allocation22_spill] sm:$0xff] }
 0x198   :  { %v6915_v36 = vpop.f32.mrf.mxu0  ;;  %7158 = vmatmul.mubr.msk.f32.gmra.mxu0 %vm383_vm2, %v11823_v27  ;;  %v6817_v19 = vpop.f32.mrf.mxu1  ;;  %7060 = vmatmul.mubr.msk.f32.gmra.mxu1 %vm383_vm2, %v11824_v22  ;;  %v11828_v27 = vld [vmem:[#allocation173_spill] sm:$0xff] }
 0x199   :  { %11822 = vst [vmem:[#allocation145_spill] sm:$0xff] %v10071_v2  ;;  %7160 = vmatprep.mubr.msk.f32.mxu0 %vm383_vm2, %v9495_v49  ;;  %v10080_v5 = vadd.f32 %v2747_v14, %v2568_v23  ;;  %v2571_v9 = vadd.f32 %v6817_v19, %v11825_v12  ;;  %7062 = vmatprep.mubr.msk.f32.mxu1 %vm383_vm2, %v11826_v25  ;;  %v11829_v22 = vld [vmem:[#allocation25_spill] sm:$0xff]  ;;  %v11830_v19 = vld [vmem:[#allocation172_spill] sm:$0xff] }
 0x19a   :  { %v2757_v37 = vpop.f32.mrf.mxu0  ;;  %v2283_v21 = vpop.f32.mrf.mxu1 }
 0x19b   :  { %v10085_v26 = vadd.f32 %v6915_v36, %v2571_v9  ;;  %v2570_v51 = vadd.f32 %v2283_v21, %v9489_v15  ;;  %v11831_v36 = vld [vmem:[#allocation26_spill] sm:$0xff] }
 0x19c   :  { %v6918_v34 = vpop.f32.mrf.mxu0  ;;  %7161 = vmatmul.mubr.msk.f32.gmra.mxu0 %vm383_vm2, %v11828_v27  ;;  %v6820_v2 = vpop.f32.mrf.mxu1  ;;  %7063 = vmatmul.mubr.msk.f32.gmra.mxu1 %vm383_vm2, %v11829_v22  ;;  %v11833_v27 = vld [vmem:[#allocation175_spill] sm:$0xff]  ;;  %v11834_v22 = vld [vmem:[#allocation29_spill] sm:$0xff] }
 0x19d   :  { %11827 = vst [vmem:[#allocation146_spill] sm:$0xff] %v10085_v26  ;;  %7163 = vmatprep.mubr.msk.f32.mxu0 %vm383_vm2, %v9519_v47  ;;  %v10094_v49 = vadd.f32 %v2757_v37, %v2570_v51  ;;  %v2573_v14 = vadd.f32 %v6820_v2, %v11830_v19  ;;  %7065 = vmatprep.mubr.msk.f32.mxu1 %vm383_vm2, %v11831_v36  ;;  %v11835_v2 = vld [vmem:[#allocation174_spill] sm:$0xff] }
 0x19e   :  { %v2767_v23 = vpop.f32.mrf.mxu0  ;;  %v2293_v15 = vpop.f32.mrf.mxu1 }
 0x19f   :  { %v10099_v12 = vadd.f32 %v6918_v34, %v2573_v14  ;;  %v2572_v9 = vadd.f32 %v2293_v15, %v9513_v6  ;;  %v11836_v34 = vld [vmem:[#allocation30_spill] sm:$0xff] }
 0x1a0   :  { %v6921_v21 = vpop.f32.mrf.mxu0  ;;  %7164 = vmatmul.mubr.msk.f32.gmra.mxu0 %vm383_vm2, %v11833_v27  ;;  %v6823_v26 = vpop.f32.mrf.mxu1  ;;  %7066 = vmatmul.mubr.msk.f32.gmra.mxu1 %vm383_vm2, %v11834_v22  ;;  %v11838_v27 = vld [vmem:[#allocation177_spill] sm:$0xff]  ;;  %v11839_v22 = vld [vmem:[#allocation31_spill] sm:$0xff] }
 0x1a1   :  { %11832 = vst [vmem:[#allocation147_spill] sm:$0xff] %v10099_v12  ;;  %7166 = vmatprep.mubr.msk.f32.mxu0 %vm383_vm2, %v9543_v43  ;;  %v10108_v47 = vadd.f32 %v2767_v23, %v2572_v9  ;;  %v2575_v37 = vadd.f32 %v6823_v26, %v11835_v2  ;;  %7068 = vmatprep.mubr.msk.f32.mxu1 %vm383_vm2, %v11836_v34  ;;  %v11840_v26 = vld [vmem:[#allocation176_spill] sm:$0xff] }
 0x1a2   :  { %v2777_v51 = vpop.f32.mrf.mxu0  ;;  %v2303_v6 = vpop.f32.mrf.mxu1 }
 0x1a3   :  { %v10113_v19 = vadd.f32 %v6921_v21, %v2575_v37  ;;  %v2574_v14 = vadd.f32 %v2303_v6, %v9537_v61  ;;  %v11841_v21 = vld [vmem:[#allocation35_spill] sm:$0xff] }
 0x1a4   :  { %v6924_v15 = vpop.f32.mrf.mxu0  ;;  %7167 = vmatmul.mubr.msk.f32.gmra.mxu0 %vm383_vm2, %v11838_v27  ;;  %v6826_v12 = vpop.f32.mrf.mxu1  ;;  %7069 = vmatmul.mubr.msk.f32.gmra.mxu1 %vm383_vm2, %v11839_v22  ;;  %v11843_v27 = vld [vmem:[#allocation179_spill] sm:$0xff]  ;;  %v11844_v22 = vld [vmem:[#allocation37_spill] sm:$0xff] }
 0x1a5   :  { %11837 = vst [vmem:[#allocation148_spill] sm:$0xff] %v10113_v19  ;;  %7169 = vmatprep.mubr.msk.f32.mxu0 %vm383_vm2, %v9567_v41  ;;  %v10122_v43 = vadd.f32 %v2777_v51, %v2574_v14  ;;  %v2577_v23 = vadd.f32 %v6826_v12, %v11840_v26  ;;  %7071 = vmatprep.mubr.msk.f32.mxu1 %vm383_vm2, %v11841_v21  ;;  %v11845_v12 = vld [vmem:[#allocation178_spill] sm:$0xff] }
 0x1a6   :  { %v2787_v9 = vpop.f32.mrf.mxu0  ;;  %v2313_v61 = vpop.f32.mrf.mxu1 }
 0x1a7   :  { %v10127_v2 = vadd.f32 %v6924_v15, %v2577_v23  ;;  %v2576_v37 = vadd.f32 %v2313_v61, %v9561_v56  ;;  %v11846_v15 = vld [vmem:[#allocation38_spill] sm:$0xff] }
 0x1a8   :  { %v6927_v6 = vpop.f32.mrf.mxu0  ;;  %7170 = vmatmul.mubr.msk.f32.gmra.mxu0 %vm383_vm2, %v11843_v27  ;;  %v6829_v19 = vpop.f32.mrf.mxu1  ;;  %7072 = vmatmul.mubr.msk.f32.gmra.mxu1 %vm383_vm2, %v11844_v22  ;;  %v11848_v27 = vld [vmem:[#allocation181_spill] sm:$0xff]  ;;  %v11849_v22 = vld [vmem:[#allocation43_spill] sm:$0xff] }
 0x1a9   :  { %11842 = vst [vmem:[#allocation149_spill] sm:$0xff] %v10127_v2  ;;  %7172 = vmatprep.mubr.msk.f32.mxu0 %vm383_vm2, %v9591_v60  ;;  %v10136_v41 = vadd.f32 %v2787_v9, %v2576_v37  ;;  %v2579_v51 = vadd.f32 %v6829_v19, %v11845_v12  ;;  %7074 = vmatprep.mubr.msk.f32.mxu1 %vm383_vm2, %v11846_v15  ;;  %v11850_v19 = vld [vmem:[#allocation180_spill] sm:$0xff] }
 0x1aa   :  { %v2797_v14 = vpop.f32.mrf.mxu0  ;;  %v2323_v56 = vpop.f32.mrf.mxu1 }
 0x1ab   :  { %v10141_v26 = vadd.f32 %v6927_v6, %v2579_v51  ;;  %v2578_v23 = vadd.f32 %v2323_v56, %v9585_v10  ;;  %v11851_v6 = vld [vmem:[#allocation44_spill] sm:$0xff] }
 0x1ac   :  { %v6930_v61 = vpop.f32.mrf.mxu0  ;;  %7173 = vmatmul.mubr.msk.f32.gmra.mxu0 %vm383_vm2, %v11848_v27  ;;  %v6832_v2 = vpop.f32.mrf.mxu1  ;;  %7075 = vmatmul.mubr.msk.f32.gmra.mxu1 %vm383_vm2, %v11849_v22 }
 0x1ad   :  { %11847 = vst [vmem:[#allocation152_spill] sm:$0xff] %v10141_v26  ;;  %7175 = vmatprep.mubr.msk.f32.mxu0 %vm383_vm2, %v9615_v32  ;;  %v10150_v60 = vadd.f32 %v2797_v14, %v2578_v23  ;;  %v2581_v9 = vadd.f32 %v6832_v2, %v11850_v19  ;;  %7077 = vmatprep.mubr.msk.f32.mxu1 %vm383_vm2, %v11851_v6  ;;  %v11853_v26 = vld [vmem:[#allocation45_spill] sm:$0xff]  ;;  %v11855_v2 = vld [vmem:[#allocation182_spill] sm:$0xff] }
 0x1ae   :  { %v2807_v37 = vpop.f32.mrf.mxu0  ;;  %v2333_v10 = vpop.f32.mrf.mxu1 }
 0x1af   :  { %v10155_v12 = vadd.f32 %v6930_v61, %v2581_v9  ;;  %v2580_v51 = vadd.f32 %v2333_v10, %v9609_v46  ;;  %v11856_v61 = vld [vmem:[#allocation49_spill] sm:$0xff]  ;;  %v11858_v9 = vld [vmem:[#allocation183_spill] sm:$0xff] }
 0x1b0   :  { %v6933_v56 = vpop.f32.mrf.mxu0  ;;  %7176 = vmatmul.mubr.msk.f32.gmra.mxu0 %vm383_vm2, %v9627_v31  ;;  %v6835_v27 = vpop.f32.mrf.mxu1  ;;  %7078 = vmatmul.mubr.msk.f32.gmra.mxu1 %vm383_vm2, %v11853_v26  ;;  %v11859_v26 = vld [vmem:[#allocation51_spill] sm:$0xff] }
 0x1b1   :  { %11852 = vst [vmem:[#allocation96_spill] sm:$0xff] %v10155_v12  ;;  %7178 = vmatprep.mubr.msk.f32.mxu0 %vm383_vm2, %v9639_v42  ;;  %v10164_v32 = vadd.f32 %v2807_v37, %v2580_v51  ;;  %v2583_v14 = vadd.f32 %v6835_v27, %v11855_v2  ;;  %7080 = vmatprep.mubr.msk.f32.mxu1 %vm383_vm2, %v11856_v61  ;;  %v11860_v42 = vld [vmem:[#allocation186_spill] sm:$0xff]  ;;  %v11861_v51 = vld [vmem:[#allocation184_spill] sm:$0xff]  ;;  %v11866_v61 = vld [vmem:[#allocation57_spill] sm:$0xff] }
 0x1b2   :  { %v2817_v23 = vpop.f32.mrf.mxu0  ;;  %v2343_v46 = vpop.f32.mrf.mxu1 }
 0x1b3   :  { %11854 = vst [vmem:[#allocation150_spill] sm:$0xff] %v10164_v32  ;;  %v10169_v19 = vadd.f32 %v6933_v56, %v2583_v14  ;;  %v2582_v31 = vadd.f32 %v2343_v46, %v11858_v9  ;;  %v11862_v56 = vld [vmem:[#allocation52_spill] sm:$0xff]  ;;  %v11864_v9 = vld [vmem:[#allocation185_spill] sm:$0xff] }
 0x1b4   :  { %v6936_v10 = vpop.f32.mrf.mxu0  ;;  %7179 = vmatmul.mubr.msk.f32.gmra.mxu0 %vm383_vm2, %v9661_v17  ;;  %v6838_v12 = vpop.f32.mrf.mxu1  ;;  %7081 = vmatmul.mubr.msk.f32.gmra.mxu1 %vm383_vm2, %v11859_v26  ;;  %v11865_v32 = vld [vmem:[#allocation189_spill] sm:$0xff] }
 0x1b5   :  { %11857 = vst [vmem:[#allocation151_spill] sm:$0xff] %v10169_v19  ;;  %7181 = vmatprep.mubr.msk.f32.mxu0 %vm383_vm2, %v11860_v42  ;;  %v10178_v37 = vadd.f32 %v2817_v23, %v2582_v31  ;;  %v2585_v27 = vadd.f32 %v6838_v12, %v11861_v51  ;;  %7083 = vmatprep.mubr.msk.f32.mxu1 %vm383_vm2, %v11862_v56  ;;  %v11868_v23 = vld [vmem:[#allocation188_spill] sm:$0xff]  ;;  %v3105_v51 = vrot.slane %v9646_v50, 2 }
 0x1b6   :  { %v2827_v2 = vpop.f32.mrf.mxu0  ;;  %v2353_v14 = vpop.f32.mrf.mxu1 }
 0x1b7   :  { %v10183_v46 = vadd.f32 %v6936_v10, %v2585_v27  ;;  %v2584_v17 = vadd.f32 %v2353_v14, %v11864_v9  ;;  %v11869_v10 = vld [vmem:[#allocation58_spill] sm:$0xff] }
 0x1b8   :  { %v6939_v19 = vpop.f32.mrf.mxu0  ;;  %7182 = vmatmul.mubr.msk.f32.gmra.mxu0 %vm383_vm2, %v11865_v32  ;;  %v6841_v26 = vpop.f32.mrf.mxu1  ;;  %7084 = vmatmul.mubr.msk.f32.gmra.mxu1 %vm383_vm2, %v11866_v61  ;;  %v3106_v32 = vrot.slane %v9651_v58, 2 }
 0x1b9   :  { %11863 = vst [vmem:[#allocation154_spill] sm:$0xff] %v10183_v46  ;;  %7184 = vmatprep.mubr.msk.f32.mxu0 %vm383_vm2, %v9705_v0  ;;  %v10192_v12 = vadd.f32 %v2827_v2, %v2584_v17  ;;  %v2587_v31 = vadd.f32 %v6841_v26, %v11868_v23  ;;  %7086 = vmatprep.mubr.msk.f32.mxu1 %vm383_vm2, %v11869_v10  ;;  %v11871_v2 = vld [vmem:[#allocation59_spill] sm:$0xff] }
 0x1ba   :  { %v2837_v42 = vpop.f32.mrf.mxu0  ;;  %v2363_v27 = vpop.f32.mrf.mxu1  ;;  %v11872_v17 = vld [vmem:[#allocation191_spill] sm:$0xff] }
 0x1bb   :  { %11867 = vst [vmem:[#allocation155_spill] sm:$0xff] %v10192_v12  ;;  %v10199_v14 = vadd.f32 %v6939_v19, %v2587_v31  ;;  %v2586_v9 = vadd.f32 %v2363_v27, %v9699_v62  ;;  %v11873_v19 = vld [vmem:[#allocation63_spill] sm:$0xff]  ;;  %v10216_v62 = vld [vmem:[%s11013_s0 + $0x348] sm:$0xff] }
 0x1bc   :  { %v6942_v46 = vpop.f32.mrf.mxu0  ;;  %7185 = vmatmul.mubr.msk.f32.gmra.mxu0 %vm383_vm2, %v9720_v35  ;;  %v6844_v0 = vpop.f32.mrf.mxu1  ;;  %7087 = vmatmul.mubr.msk.f32.gmra.mxu1 %vm383_vm2, %v11871_v2  ;;  %v11874_v35 = vld [vmem:[#allocation187_spill] sm:$0xff] }
 0x1bd   :  { %11870 = vst [vmem:[#allocation153_spill] sm:$0xff] %v10199_v14  ;;  %7187 = vmatprep.mubr.msk.f32.mxu0 %vm383_vm2, %v9646_v50  ;;  %v10208_v26 = vadd.f32 %v2837_v42, %v2586_v9  ;;  %v2589_v23 = vadd.f32 %v6844_v0, %v11872_v17  ;;  %7089 = vmatprep.mubr.msk.f32.mxu1 %vm383_vm2, %v11873_v19  ;;  %v3108_v31 = vrot.slane %v11874_v35, 2  ;;  %v11876_v17 = vld [vmem:[#allocation65_spill] sm:$0xff] }
 0x1be   :  { %v2847_v12 = vpop.f32.mrf.mxu0  ;;  %v2373_v27 = vpop.f32.mrf.mxu1  ;;  %v10220_v14 = vsel %vm1417_vm3, %v3105_v51, %v3106_v32  ;;  %v10234_v51 = vld [vmem:[%s11013_s0 + $0x350] sm:$0xff] }
 0x1bf   :  { %v10222_v50 = vadd.f32 %v6942_v46, %v2589_v23  ;;  %v2588_v42 = vadd.f32 %v2373_v27, %v9729_v55 }
 0x1c0   :  { %v6945_v9 = vpop.f32.mrf.mxu0  ;;  %7188 = vmatmul.mubr.msk.f32.gmra.mxu0 %vm383_vm2, %v9651_v58  ;;  %v6847_v0 = vpop.f32.mrf.mxu1  ;;  %7090 = vmatmul.mubr.msk.f32.gmra.mxu1 %vm383_vm2, %v11876_v17  ;;  %v10242_v58 = vsel %vm1417_vm3, %v3106_v32, %v3108_v31 }
 0x1c1   :  { %11875 = vst [vmem:[#allocation157_spill] sm:$0xff] %v10222_v50  ;;  %7190 = vmatprep.mubr.msk.f32.mxu0 %vm383_vm2, %v10216_v62  ;;  %v10236_v46 = vadd.f32 %v2847_v12, %v2588_v42  ;;  %v2591_v55 = vadd.f32 %v6847_v0, %v9734_v3  ;;  %7092 = vmatprep.mubr.msk.f32.mxu1 %vm383_vm2, %v10220_v14  ;;  %v11878_v42 = vld [vmem:[#allocation18_spill] sm:$0xff] }
 0x1c2   :  { %v2857_v23 = vpop.f32.mrf.mxu0  ;;  %v2383_v35 = vpop.f32.mrf.mxu1 }
 0x1c3   :  { %v10244_v27 = vadd.f32 %v6945_v9, %v2591_v55  ;;  %v2590_v50 = vadd.f32 %v2383_v35, %v9743_v38 }
 0x1c4   :  { %v6948_v17 = vpop.f32.mrf.mxu0  ;;  %7191 = vmatmul.mubr.msk.f32.gmra.mxu0 %vm383_vm2, %v10234_v51  ;;  %v6850_v12 = vpop.f32.mrf.mxu1  ;;  %7093 = vmatmul.mubr.msk.f32.gmra.mxu1 %vm383_vm2, %v10242_v58 }
 0x1c5   :  { %11877 = vst [vmem:[#allocation158_spill] sm:$0xff] %v10244_v27  ;;  %7293 = vmatprep.mubr.msk.f32.mxu0 %vm383_vm2, %v8450_v4  ;;  %v10253_v3 = vadd.f32 %v2857_v23, %v2590_v50  ;;  %v2593_v32 = vadd.f32 %v6850_v12, %v9748_v53  ;;  %7195 = vmatprep.mubr.msk.f32.mxu1 %vm383_vm2, %v11878_v42  ;;  %v11879_v27 = vld [vmem:[#allocation23_spill] sm:$0xff]  ;;  %v11882_v42 = vld [vmem:[#allocation34_spill] sm:$0xff] }
 0x1c6   :  { %v2867_v31 = vpop.f32.mrf.mxu0  ;;  %v2393_v38 = vpop.f32.mrf.mxu1 }
 0x1c7   :  { %v10258_v9 = vadd.f32 %v6948_v17, %v2593_v32  ;;  %v2592_v0 = vadd.f32 %v2393_v38, %v9757_v18  ;;  %v11880_v17 = vld [vmem:[#allocation27_spill] sm:$0xff]  ;;  %v11881_v32 = vld [vmem:[#allocation32_spill] sm:$0xff] }
 0x1c8   :  { %v6951_v55 = vpop.f32.mrf.mxu0  ;;  %7294 = vmatmul.mubr.msk.f32.vlgmr.msra.gmra.mxu0 %vm383_vm2, %v8472_v7  ;;  %v6853_v35 = vpop.f32.mrf.mxu1  ;;  %7196 = vmatmul.mubr.msk.f32.vlgmr.msra.gmra.mxu1 %vm383_vm2, %v11879_v27 }
 0x1c9   :  { %7296 = vmatprep.mubr.msk.f32.mxu0 %vm383_vm2, %v8478_v39  ;;  %v10267_v4 = vadd.f32 %v2867_v31, %v2592_v0  ;;  %v2595_v53 = vadd.f32 %v6853_v35, %v9766_v45  ;;  %7198 = vmatprep.mubr.msk.f32.mxu1 %vm383_vm2, %v11880_v17  ;;  %v11884_v35 = vld [vmem:[#allocation39_spill] sm:$0xff] }
 0x1ca   :  { %v2877_v50 = vpop.f32.mrf.mxu0  ;;  %v2403_v18 = vpop.f32.mrf.mxu1 }
 0x1cb   :  { %v10272_v23 = vadd.f32 %v6951_v55, %v2595_v53  ;;  %v2594_v7 = vadd.f32 %v2403_v18, %v9775_v40  ;;  %v11888_v18 = vld [vmem:[#allocation115_spill] sm:$0xff] }
 0x1cc   :  { %v6954_v12 = vpop.f32.mrf.mxu0  ;;  %7297 = vmatmul.mubr.msk.f32.gmra.mxu0 %vm383_vm2, %v11705_v44  ;;  %v6856_v27 = vpop.f32.mrf.mxu1  ;;  %7199 = vmatmul.mubr.msk.f32.gmra.mxu1 %vm383_vm2, %v11881_v32  ;;  %v11890_v32 = vld [vmem:[#allocation46_spill] sm:$0xff] }
 0x1cd   :  { %7299 = vmatprep.mubr.msk.f32.mxu0 %vm383_vm2, %v11708_v30  ;;  %v10281_v39 = vadd.f32 %v2877_v50, %v2594_v7  ;;  %v2597_v45 = vadd.f32 %v6856_v27, %v9780_v54  ;;  %7201 = vmatprep.mubr.msk.f32.mxu1 %vm383_vm2, %v11882_v42  ;;  %v11886_v50 = vld [vmem:[#allocation41_spill] sm:$0xff] }
 0x1ce   :  { %v2887_v31 = vpop.f32.mrf.mxu0  ;;  %v2413_v40 = vpop.f32.mrf.mxu1 }
 0x1cf   :  { %v10286_v38 = vadd.f32 %v6954_v12, %v2597_v45  ;;  %v2596_v44 = vadd.f32 %v2413_v40, %v9789_v20  ;;  %v11889_v12 = vld [vmem:[#allocation119_spill] sm:$0xff]  ;;  %v11893_v45 = vld [vmem:[#allocation73_spill] sm:$0xff]  ;;  %v11894_v40 = vld [vmem:[#allocation48_spill] sm:$0xff] }
 0x1d0   :  { %v6957_v0 = vpop.f32.mrf.mxu0  ;;  %7300 = vmatmul.mubr.msk.f32.gmra.mxu0 %vm383_vm2, %v11711_v52  ;;  %v6859_v55 = vpop.f32.mrf.mxu1  ;;  %7202 = vmatmul.mubr.msk.f32.gmra.mxu1 %vm383_vm2, %v11884_v35 }
 0x1d1   :  { %11883 = vst [vmem:[#allocation160_spill] sm:$0xff] %v10286_v38  ;;  %7302 = vmatprep.mubr.msk.f32.mxu0 %vm383_vm2, %v11715_v24  ;;  %v10295_v54 = vadd.f32 %v2887_v31, %v2596_v44  ;;  %v2599_v30 = vadd.f32 %v6859_v55, %v9794_v33  ;;  %7204 = vmatprep.mubr.msk.f32.mxu1 %vm383_vm2, %v11886_v50  ;;  %v11891_v24 = vld [vmem:[#allocation120_spill] sm:$0xff]  ;;  %v11896_v55 = vld [vmem:[#allocation66_spill] sm:$0xff]  ;;  %v11897_v50 = vld [vmem:[#allocation121_spill] sm:$0xff] }
 0x1d2   :  { %v2897_v53 = vpop.f32.mrf.mxu0  ;;  %v2423_v20 = vpop.f32.mrf.mxu1  ;;  %v11976_v38 = vld [vmem:[#allocation138_spill] sm:$0xff] }
 0x1d3   :  { %11885 = vst [vmem:[#allocation17_spill] sm:$0xff] %v10295_v54  ;;  %v10300_v17 = vadd.f32 %v6957_v0, %v2599_v30  ;;  %v2598_v52 = vadd.f32 %v2423_v20, %v11888_v18  ;;  %v11898_v18 = vld [vmem:[#allocation53_spill] sm:$0xff] }
 0x1d4   :  { %v6960_v7 = vpop.f32.mrf.mxu0  ;;  %7303 = vmatmul.mubr.msk.f32.gmra.mxu0 %vm383_vm2, %v11889_v12  ;;  %v6862_v27 = vpop.f32.mrf.mxu1  ;;  %7205 = vmatmul.mubr.msk.f32.gmra.mxu1 %vm383_vm2, %v11890_v32  ;;  %v11901_v12 = vld [vmem:[#allocation116_spill] sm:$0xff] }
 0x1d5   :  { %11887 = vst [vmem:[#allocation161_spill] sm:$0xff] %v10300_v17  ;;  %7305 = vmatprep.mubr.msk.f32.mxu0 %vm383_vm2, %v11891_v24  ;;  %v10309_v33 = vadd.f32 %v2897_v53, %v2598_v52  ;;  %v2601_v31 = vadd.f32 %v6862_v27, %v11893_v45  ;;  %7207 = vmatprep.mubr.msk.f32.mxu1 %vm383_vm2, %v11894_v40  ;;  %v11899_v53 = vld [vmem:[#allocation122_spill] sm:$0xff] }
 0x1d6   :  { %v2907_v42 = vpop.f32.mrf.mxu0  ;;  %v2433_v44 = vpop.f32.mrf.mxu1 }
 0x1d7   :  { %11892 = vst [vmem:[#allocation6_spill] sm:$0xff] %v10309_v33  ;;  %v10314_v0 = vadd.f32 %v6960_v7, %v2601_v31  ;;  %v2600_v35 = vadd.f32 %v2433_v44, %v11896_v55  ;;  %v11902_v7 = vld [vmem:[#allocation55_spill] sm:$0xff]  ;;  %v11904_v31 = vld [vmem:[#allocation70_spill] sm:$0xff]  ;;  %v11973_v33 = vld [vmem:[#allocation140_spill] sm:$0xff] }
 0x1d8   :  { %v6963_v30 = vpop.f32.mrf.mxu0  ;;  %7306 = vmatmul.mubr.msk.f32.gmra.mxu0 %vm383_vm2, %v11897_v50  ;;  %v6865_v20 = vpop.f32.mrf.mxu1  ;;  %7208 = vmatmul.mubr.msk.f32.gmra.mxu1 %vm383_vm2, %v11898_v18  ;;  %v11905_v55 = vld [vmem:[#allocation123_spill] sm:$0xff]  ;;  %v11906_v18 = vld [vmem:[#allocation60_spill] sm:$0xff] }
 0x1d9   :  { %11895 = vst [vmem:[#allocation13_spill] sm:$0xff] %v10314_v0  ;;  %7308 = vmatprep.mubr.msk.f32.mxu0 %vm383_vm2, %v11899_v53  ;;  %v10323_v52 = vadd.f32 %v2907_v42, %v2600_v35  ;;  %v2603_v27 = vadd.f32 %v6865_v20, %v11901_v12  ;;  %7210 = vmatprep.mubr.msk.f32.mxu1 %vm383_vm2, %v11902_v7  ;;  %v11907_v42 = vld [vmem:[#allocation124_spill] sm:$0xff] }
 0x1da   :  { %v2917_v32 = vpop.f32.mrf.mxu0  ;;  %v2443_v24 = vpop.f32.mrf.mxu1  ;;  %v11909_v20 = vld [vmem:[#allocation80_spill] sm:$0xff] }
 0x1db   :  { %11900 = vst [vmem:[#allocation163_spill] sm:$0xff] %v10323_v52  ;;  %v10328_v45 = vadd.f32 %v6963_v30, %v2603_v27  ;;  %v2602_v40 = vadd.f32 %v2443_v24, %v11904_v31  ;;  %v11910_v30 = vld [vmem:[#allocation62_spill] sm:$0xff]  ;;  %v11912_v24 = vld [vmem:[#allocation117_spill] sm:$0xff]  ;;  %v11914_v52 = vld [vmem:[#allocation67_spill] sm:$0xff] }
 0x1dc   :  { %v6966_v44 = vpop.f32.mrf.mxu0  ;;  %7309 = vmatmul.mubr.msk.f32.gmra.mxu0 %vm383_vm2, %v11905_v55  ;;  %v6868_v50 = vpop.f32.mrf.mxu1  ;;  %7211 = vmatmul.mubr.msk.f32.gmra.mxu1 %vm383_vm2, %v11906_v18 }
 0x1dd   :  { %11903 = vst [vmem:[#allocation7_spill] sm:$0xff] %v10328_v45  ;;  %7311 = vmatprep.mubr.msk.f32.mxu0 %vm383_vm2, %v11907_v42  ;;  %v10337_v35 = vadd.f32 %v2917_v32, %v2602_v40  ;;  %v2605_v53 = vadd.f32 %v6868_v50, %v11909_v20  ;;  %7213 = vmatprep.mubr.msk.f32.mxu1 %vm383_vm2, %v11910_v30  ;;  %v11913_v45 = vld [vmem:[#allocation125_spill] sm:$0xff]  ;;  %v11915_v32 = vld [vmem:[#allocation126_spill] sm:$0xff]  ;;  %v11917_v50 = vld [vmem:[#allocation84_spill] sm:$0xff] }
 0x1de   :  { %v2927_v12 = vpop.f32.mrf.mxu0  ;;  %v2453_v27 = vpop.f32.mrf.mxu1 }
 0x1df   :  { %11908 = vst [vmem:[#allocation162_spill] sm:$0xff] %v10337_v35  ;;  %v10342_v7 = vadd.f32 %v6966_v44, %v2605_v53  ;;  %v2604_v31 = vadd.f32 %v2453_v27, %v11912_v24  ;;  %v11918_v44 = vld [vmem:[#allocation69_spill] sm:$0xff]  ;;  %v11920_v27 = vld [vmem:[#allocation72_spill] sm:$0xff]  ;;  %v11922_v35 = vld [vmem:[#allocation74_spill] sm:$0xff] }
 0x1e0   :  { %v6969_v55 = vpop.f32.mrf.mxu0  ;;  %7312 = vmatmul.mubr.msk.f32.gmra.mxu0 %vm383_vm2, %v11913_v45  ;;  %v6871_v18 = vpop.f32.mrf.mxu1  ;;  %7214 = vmatmul.mubr.msk.f32.gmra.mxu1 %vm383_vm2, %v11914_v52 }
 0x1e1   :  { %11911 = vst [vmem:[#allocation8_spill] sm:$0xff] %v10342_v7  ;;  %7314 = vmatprep.mubr.msk.f32.mxu0 %vm383_vm2, %v11915_v32  ;;  %v10351_v40 = vadd.f32 %v2927_v12, %v2604_v31  ;;  %v2607_v42 = vadd.f32 %v6871_v18, %v11917_v50  ;;  %7216 = vmatprep.mubr.msk.f32.mxu1 %vm383_vm2, %v11918_v44  ;;  %v11921_v7 = vld [vmem:[#allocation127_spill] sm:$0xff]  ;;  %v11923_v12 = vld [vmem:[#allocation128_spill] sm:$0xff]  ;;  %v11925_v18 = vld [vmem:[#allocation118_spill] sm:$0xff] }
 0x1e2   :  { %v2937_v20 = vpop.f32.mrf.mxu0  ;;  %v2463_v53 = vpop.f32.mrf.mxu1 }
 0x1e3   :  { %11916 = vst [vmem:[#allocation165_spill] sm:$0xff] %v10351_v40  ;;  %v10356_v30 = vadd.f32 %v6969_v55, %v2607_v42  ;;  %v2606_v45 = vadd.f32 %v2463_v53, %v11920_v27  ;;  %v11926_v55 = vld [vmem:[#allocation76_spill] sm:$0xff]  ;;  %v11928_v53 = vld [vmem:[#allocation78_spill] sm:$0xff]  ;;  %v11930_v40 = vld [vmem:[#allocation81_spill] sm:$0xff] }
 0x1e4   :  { %v6972_v24 = vpop.f32.mrf.mxu0  ;;  %7315 = vmatmul.mubr.msk.f32.gmra.mxu0 %vm383_vm2, %v11921_v7  ;;  %v6874_v52 = vpop.f32.mrf.mxu1  ;;  %7217 = vmatmul.mubr.msk.f32.gmra.mxu1 %vm383_vm2, %v11922_v35 }
 0x1e5   :  { %11919 = vst [vmem:[#allocation164_spill] sm:$0xff] %v10356_v30  ;;  %7317 = vmatprep.mubr.msk.f32.mxu0 %vm383_vm2, %v11923_v12  ;;  %v10365_v31 = vadd.f32 %v2937_v20, %v2606_v45  ;;  %v2609_v32 = vadd.f32 %v6874_v52, %v11925_v18  ;;  %7219 = vmatprep.mubr.msk.f32.mxu1 %vm383_vm2, %v11926_v55  ;;  %v11929_v30 = vld [vmem:[#allocation129_spill] sm:$0xff]  ;;  %v11931_v20 = vld [vmem:[#allocation130_spill] sm:$0xff] }
 0x1e6   :  { %v2947_v50 = vpop.f32.mrf.mxu0  ;;  %v2473_v42 = vpop.f32.mrf.mxu1  ;;  %v11933_v52 = vld [vmem:[#allocation94_spill] sm:$0xff] }
 0x1e7   :  { %11924 = vst [vmem:[#allocation10_spill] sm:$0xff] %v10365_v31  ;;  %v10370_v44 = vadd.f32 %v6972_v24, %v2609_v32  ;;  %v2608_v7 = vadd.f32 %v2473_v42, %v11928_v53  ;;  %v11934_v24 = vld [vmem:[#allocation83_spill] sm:$0xff]  ;;  %v11936_v42 = vld [vmem:[#allocation97_spill] sm:$0xff] }
 0x1e8   :  { %v6975_v27 = vpop.f32.mrf.mxu0  ;;  %7318 = vmatmul.mubr.msk.f32.gmra.mxu0 %vm383_vm2, %v11929_v30  ;;  %v6877_v35 = vpop.f32.mrf.mxu1  ;;  %7220 = vmatmul.mubr.msk.f32.gmra.mxu1 %vm383_vm2, %v11930_v40  ;;  %v11938_v31 = vld [vmem:[#allocation89_spill] sm:$0xff] }
 0x1e9   :  { %11927 = vst [vmem:[#allocation167_spill] sm:$0xff] %v10370_v44  ;;  %7320 = vmatprep.mubr.msk.f32.mxu0 %vm383_vm2, %v11931_v20  ;;  %v10379_v45 = vadd.f32 %v2947_v50, %v2608_v7  ;;  %v2611_v12 = vadd.f32 %v6877_v35, %v11933_v52  ;;  %7222 = vmatprep.mubr.msk.f32.mxu1 %vm383_vm2, %v11934_v24  ;;  %v11937_v44 = vld [vmem:[#allocation131_spill] sm:$0xff]  ;;  %v11939_v50 = vld [vmem:[#allocation132_spill] sm:$0xff] }
 0x1ea   :  { %v2957_v18 = vpop.f32.mrf.mxu0  ;;  %v2483_v32 = vpop.f32.mrf.mxu1  ;;  %v11941_v35 = vld [vmem:[#allocation79_spill] sm:$0xff] }
 0x1eb   :  { %11932 = vst [vmem:[#allocation166_spill] sm:$0xff] %v10379_v45  ;;  %v10384_v55 = vadd.f32 %v6975_v27, %v2611_v12  ;;  %v2610_v30 = vadd.f32 %v2483_v32, %v11936_v42  ;;  %v11942_v27 = vld [vmem:[#allocation91_spill] sm:$0xff] }
 0x1ec   :  { %v6978_v53 = vpop.f32.mrf.mxu0  ;;  %7321 = vmatmul.mubr.msk.f32.gmra.mxu0 %vm383_vm2, %v11937_v44  ;;  %v6880_v40 = vpop.f32.mrf.mxu1  ;;  %7223 = vmatmul.mubr.msk.f32.gmra.mxu1 %vm383_vm2, %v11938_v31  ;;  %v11944_v32 = vld [vmem:[#allocation87_spill] sm:$0xff] }
 0x1ed   :  { %11935 = vst [vmem:[#allocation14_spill] sm:$0xff] %v10384_v55  ;;  %7323 = vmatprep.mubr.msk.f32.mxu0 %vm383_vm2, %v11939_v50  ;;  %v10393_v7 = vadd.f32 %v2957_v18, %v2610_v30  ;;  %v2613_v20 = vadd.f32 %v6880_v40, %v11941_v35  ;;  %7225 = vmatprep.mubr.msk.f32.mxu1 %vm383_vm2, %v11942_v27  ;;  %v11945_v55 = vld [vmem:[#allocation86_spill] sm:$0xff]  ;;  %v11946_v45 = vld [vmem:[#allocation99_spill] sm:$0xff]  ;;  %v11947_v18 = vld [vmem:[#allocation92_spill] sm:$0xff] }
 0x1ee   :  { %v2967_v52 = vpop.f32.mrf.mxu0  ;;  %v2493_v12 = vpop.f32.mrf.mxu1  ;;  %v11949_v40 = vld [vmem:[#allocation104_spill] sm:$0xff] }
 0x1ef   :  { %11940 = vst [vmem:[#allocation169_spill] sm:$0xff] %v10393_v7  ;;  %v10398_v24 = vadd.f32 %v6978_v53, %v2613_v20  ;;  %v2612_v44 = vadd.f32 %v2493_v12, %v11944_v32  ;;  %v11950_v53 = vld [vmem:[#allocation101_spill] sm:$0xff]  ;;  %v11952_v12 = vld [vmem:[#allocation12_spill] sm:$0xff] }
 0x1f0   :  { %v6981_v42 = vpop.f32.mrf.mxu0  ;;  %7324 = vmatmul.mubr.msk.f32.gmra.mxu0 %vm383_vm2, %v11945_v55  ;;  %v6883_v31 = vpop.f32.mrf.mxu1  ;;  %7226 = vmatmul.mubr.msk.f32.gmra.mxu1 %vm383_vm2, %v11946_v45  ;;  %v11954_v7 = vld [vmem:[#allocation105_spill] sm:$0xff] }
 0x1f1   :  { %11943 = vst [vmem:[#allocation168_spill] sm:$0xff] %v10398_v24  ;;  %7326 = vmatprep.mubr.msk.f32.mxu0 %vm383_vm2, %v11947_v18  ;;  %v10407_v30 = vadd.f32 %v2967_v52, %v2612_v44  ;;  %v2615_v50 = vadd.f32 %v6883_v31, %v11949_v40  ;;  %7228 = vmatprep.mubr.msk.f32.mxu1 %vm383_vm2, %v11950_v53  ;;  %v11953_v24 = vld [vmem:[#allocation95_spill] sm:$0xff]  ;;  %v11956_v44 = vld [vmem:[#allocation88_spill] sm:$0xff]  ;;  %v11959_v53 = vld [vmem:[#allocation98_spill] sm:$0xff] }
 0x1f2   :  { %v2977_v35 = vpop.f32.mrf.mxu0  ;;  %v2503_v20 = vpop.f32.mrf.mxu1 }
 0x1f3   :  { %11948 = vst [vmem:[#allocation19_spill] sm:$0xff] %v10407_v30  ;;  %v10412_v27 = vadd.f32 %v6981_v42, %v2615_v50  ;;  %v2614_v55 = vadd.f32 %v2503_v20, %v11952_v12  ;;  %v11957_v42 = vld [vmem:[#allocation107_spill] sm:$0xff]  ;;  %v11960_v12 = vld [vmem:[#allocation133_spill] sm:$0xff] }
 0x1f4   :  { %v6984_v32 = vpop.f32.mrf.mxu0  ;;  %7327 = vmatmul.mubr.msk.f32.gmra.mxu0 %vm383_vm2, %v11953_v24  ;;  %v6886_v45 = vpop.f32.mrf.mxu1  ;;  %7229 = vmatmul.mubr.msk.f32.gmra.mxu1 %vm383_vm2, %v11954_v7  ;;  %v11972_v30 = vld [vmem:[#allocation15_spill] sm:$0xff] }
 0x1f5   :  { %11951 = vst [vmem:[#allocation171_spill] sm:$0xff] %v10412_v27  ;;  %7329 = vmatprep.mubr.msk.f32.mxu0 %vm383_vm2, %v11778_v13  ;;  %v10421_v52 = vadd.f32 %v2977_v35, %v2614_v55  ;;  %v2617_v31 = vadd.f32 %v6886_v45, %v11956_v44  ;;  %7231 = vmatprep.mubr.msk.f32.mxu1 %vm383_vm2, %v11957_v42  ;;  %v11961_v27 = vld [vmem:[#allocation109_spill] sm:$0xff]  ;;  %v11962_v13 = vld [vmem:[#allocation134_spill] sm:$0xff]  ;;  %v11963_v35 = vld [vmem:[#allocation103_spill] sm:$0xff] }
 0x1f6   :  { %v2987_v18 = vpop.f32.mrf.mxu0  ;;  %v2513_v40 = vpop.f32.mrf.mxu1  ;;  %v4512_v55 = vrot.slane %v11963_v35, 2  ;;  %v11965_v44 = vld [vmem:[#allocation136_spill] sm:$0xff]  ;;  %v11966_v42 = vld [vmem:[#allocation111_spill] sm:$0xff] }
 0x1f7   :  { %11955 = vst [vmem:[#allocation170_spill] sm:$0xff] %v10421_v52  ;;  %v10426_v50 = vadd.f32 %v6984_v32, %v2617_v31  ;;  %v2616_v24 = vadd.f32 %v2513_v40, %v11959_v53  ;;  %v11967_v40 = vld [vmem:[#allocation141_spill] sm:$0xff] }
 0x1f8   :  { %v6987_v20 = vpop.f32.mrf.mxu0  ;;  %7330 = vmatmul.mubr.msk.f32.gmra.mxu0 %vm383_vm2, %v11960_v12  ;;  %v6889_v7 = vpop.f32.mrf.mxu1  ;;  %7232 = vmatmul.mubr.msk.f32.gmra.mxu1 %vm383_vm2, %v11961_v27  ;;  %v4513_v53 = vrot.slane %v11967_v40, 2  ;;  %v68_v12 = vld [vmem:[%s11013_s0 + $0x1a8] sm:$0x3]  ;;  %v4040_v27 = vrot.slane %v11963_v35, 1 }
 0x1f9   :  { %11958 = vst [vmem:[#allocation22_spill] sm:$0xff] %v10426_v50  ;;  %7332 = vmatprep.mubr.msk.f32.mxu0 %vm383_vm2, %v11962_v13  ;;  %v10436_v45 = vadd.f32 %v2987_v18, %v2616_v24  ;;  %v2619_v32 = vadd.f32 %v6889_v7, %v11965_v44  ;;  %7234 = vmatprep.mubr.msk.f32.mxu1 %vm383_vm2, %v11966_v42  ;;  %v4041_v13 = vrot.slane %v11967_v40, 1  ;;  %v11969_v18 = vld [vmem:[#allocation137_spill] sm:$0xff]  ;;  %v4515_v0 = vrot.slane %v68_v12, 2 }
 0x1fa   :  { %v2997_v31 = vpop.f32.mrf.mxu0  ;;  %v2523_v50 = vpop.f32.mrf.mxu1  ;;  %v11970_v44 = vld [vmem:[#allocation5_spill] sm:$0xff] }
 0x1fb   :  { %11964 = vst [vmem:[#allocation173_spill] sm:$0xff] %v10436_v45  ;;  %v10447_v52 = vadd.f32 %v6987_v20, %v2619_v32  ;;  %v2618_v24 = vadd.f32 %v2523_v50, %v11969_v18  ;;  %v11971_v45 = vld [vmem:[#allocation113_spill] sm:$0xff]  ;;  %v11974_v32 = vld [vmem:[#allocation156_spill] sm:$0xff]  ;;  %v4514_v50 = vsel %vm1417_vm3, %v4512_v55, %v4513_v53  ;;  %v4043_v18 = vrot.slane %v68_v12, 1 }
 0x1fc   :  { %v6990_v7 = vpop.f32.mrf.mxu0  ;;  %7333 = vmatmul.mubr.msk.f32.gmra.mxu0 %vm383_vm2, %v11970_v44  ;;  %v6892_v42 = vpop.f32.mrf.mxu1  ;;  %7235 = vmatmul.mubr.msk.f32.gmra.mxu1 %vm383_vm2, %v11971_v45  ;;  %v11975_v45 = vld [vmem:[#allocation135_spill] sm:$0xff]  ;;  %v4516_v55 = vsel %vm1417_vm3, %v4513_v53, %v4515_v0  ;;  %v11979_v53 = vld [vmem:[#allocation21_spill] sm:$0xff] }
 0x1fd   :  { %11968 = vst [vmem:[#allocation172_spill] sm:$0xff] %v10447_v52  ;;  %7335 = vmatprep.mubr.msk.f32.mxu0 %vm383_vm2, %v11972_v30  ;;  %v10456_v35 = vadd.f32 %v2997_v31, %v2618_v24  ;;  %v2621_v40 = vadd.f32 %v6892_v42, %v11973_v33  ;;  %7237 = vmatprep.mubr.msk.f32.mxu1 %vm383_vm2, %v11974_v32  ;;  %v11977_v33 = vld [vmem:[#allocation159_spill] sm:$0xff]  ;;  %v11978_v24 = vld [vmem:[#allocation144_spill] sm:$0xff] }
 0x1fe   :  { %v3007_v20 = vpop.f32.mrf.mxu0  ;;  %v2533_v44 = vpop.f32.mrf.mxu1  ;;  %v4042_v52 = vsel %vm220_vm1, %v4040_v27, %v4041_v13  ;;  %v4044_v42 = vsel %vm220_vm1, %v4041_v13, %v4043_v18 }
 0x1ff   :  { %v10463_v17 = vadd.f32 %v6990_v7, %v2621_v40  ;;  %v2620_v54 = vadd.f32 %v2533_v44, %v11975_v45  ;;  %v11980_v45 = vld [vmem:[#allocation9_spill] sm:$0xff] }
 0x200   :  { %v6993_v30 = vpop.f32.mrf.mxu0  ;;  %7336 = vmatmul.mubr.msk.f32.gmra.mxu0 %vm383_vm2, %v11976_v38  ;;  %v6895_v31 = vpop.f32.mrf.mxu1  ;;  %7238 = vmatmul.mubr.msk.f32.gmra.mxu1 %vm383_vm2, %v11977_v33 }
 0x201   :  { %7338 = vmatprep.mubr.msk.f32.mxu0 %vm383_vm2, %v4514_v50  ;;  %v10472_v12 = vadd.f32 %v3007_v20, %v2620_v54  ;;  %v2623_v27 = vadd.f32 %v6895_v31, %v11978_v24  ;;  %7240 = vmatprep.mubr.msk.f32.mxu1 %vm383_vm2, %v4042_v52  ;;  %v11981_v31 = vld [vmem:[#allocation24_spill] sm:$0xff] }
 0x202   :  { %v3017_v7 = vpop.f32.mrf.mxu0  ;;  %v2543_v40 = vpop.f32.mrf.mxu1  ;;  %v11983_v24 = vld [vmem:[#allocation28_spill] sm:$0xff] }
 0x203   :  { %v10477_v32 = vadd.f32 %v6993_v30, %v2623_v27  ;;  %v2622_v38 = vadd.f32 %v2543_v40, %v10010_v28  ;;  %v11984_v40 = vld [vmem:[#allocation11_spill] sm:$0xff] }
 0x204   :  { %v6996_v44 = vpop.f32.mrf.mxu0  ;;  %7339 = vmatmul.mubr.msk.f32.gmra.mxu0 %vm383_vm2, %v4516_v55  ;;  %v6898_v50 = vpop.f32.mrf.mxu1  ;;  %7241 = vmatmul.mubr.msk.f32.gmra.mxu1 %vm383_vm2, %v4044_v42 }
 0x205   :  { %7341 = vmatprep.mubr.msk.f32.mxu0 %vm383_vm2, %v11806_v59  ;;  %v10484_v54 = vadd.f32 %v3017_v7, %v2622_v38  ;;  %v2625_v0 = vadd.f32 %v6898_v50, %v10015_v16  ;;  %7243 = vmatprep.mubr.msk.f32.mxu1 %vm383_vm2, %v11979_v53  ;;  %v11982_v59 = vld [vmem:[#allocation139_spill] sm:$0xff]  ;;  %v11986_v50 = vld [vmem:[#allocation142_spill] sm:$0xff]  ;;  %v11987_v53 = vld [vmem:[#allocation36_spill] sm:$0xff] }
 0x206   :  { %v3027_v52 = vpop.f32.mrf.mxu0  ;;  %v2553_v13 = vpop.f32.mrf.mxu1 }
 0x207   :  { %v10489_v20 = vadd.f32 %v6996_v44, %v2625_v0  ;;  %v2624_v28 = vadd.f32 %v2553_v13, %v10024_v1  ;;  %v11985_v44 = vld [vmem:[#allocation33_spill] sm:$0xff] }
 0x208   :  { %v7099_v18 = vpop.f32.mrf.mxu0  ;;  %7342 = vmatmul.mubr.msk.f32.gmra.mxu0 %vm383_vm2, %v11980_v45  ;;  %v7001_v30 = vpop.f32.mrf.mxu1  ;;  %7244 = vmatmul.mubr.msk.f32.gmra.mxu1 %vm383_vm2, %v11981_v31  ;;  %v11988_v45 = vld [vmem:[#allocation16_spill] sm:$0xff] }
 0x209   :  { %7344 = vmatprep.mubr.msk.f32.mxu0 %vm383_vm2, %v11811_v29  ;;  %v10498_v16 = vadd.f32 %v3027_v52, %v2624_v28  ;;  %v3509_v33 = vadd.f32 %v7001_v30, %v11982_v59  ;;  %7246 = vmatprep.mubr.msk.f32.mxu1 %vm383_vm2, %v11983_v24  ;;  %v11989_v31 = vld [vmem:[#allocation40_spill] sm:$0xff]  ;;  %v11990_v59 = vld [vmem:[#allocation143_spill] sm:$0xff]  ;;  %v11991_v24 = vld [vmem:[#allocation42_spill] sm:$0xff] }
 0x20a   :  { %v3655_v55 = vpop.f32.mrf.mxu0  ;;  %v3189_v1 = vpop.f32.mrf.mxu1 }
 0x20b   :  { %v10503_v27 = vadd.f32 %v7099_v18, %v3509_v33  ;;  %v3508_v7 = vadd.f32 %v3189_v1, %v10038_v48 }
 0x20c   :  { %v7102_v42 = vpop.f32.mrf.mxu0  ;;  %7345 = vmatmul.mubr.msk.f32.gmra.mxu0 %vm383_vm2, %v11984_v40  ;;  %v7004_v38 = vpop.f32.mrf.mxu1  ;;  %7247 = vmatmul.mubr.msk.f32.gmra.mxu1 %vm383_vm2, %v11985_v44  ;;  %v11992_v40 = vld [vmem:[#allocation20_spill] sm:$0xff]  ;;  %v11993_v44 = vld [vmem:[#allocation47_spill] sm:$0xff] }
 0x20d   :  { %7347 = vmatprep.mubr.msk.f32.mxu0 %vm383_vm2, %v11816_v63  ;;  %v10512_v29 = vadd.f32 %v3655_v55, %v3508_v7  ;;  %v3511_v0 = vadd.f32 %v7004_v38, %v11986_v50  ;;  %7249 = vmatprep.mubr.msk.f32.mxu1 %vm383_vm2, %v11987_v53  ;;  %v11994_v50 = vld [vmem:[#allocation145_spill] sm:$0xff]  ;;  %v11995_v53 = vld [vmem:[#allocation50_spill] sm:$0xff] }
 0x20e   :  { %v3665_v52 = vpop.f32.mrf.mxu0  ;;  %v3199_v48 = vpop.f32.mrf.mxu1 }
 0x20f   :  { %v10517_v13 = vadd.f32 %v7102_v42, %v3511_v0  ;;  %v3510_v28 = vadd.f32 %v3199_v48, %v10052_v11 }
 0x210   :  { %v7105_v18 = vpop.f32.mrf.mxu0  ;;  %7348 = vmatmul.mubr.msk.f32.gmra.mxu0 %vm383_vm2, %v11988_v45  ;;  %v7007_v30 = vpop.f32.mrf.mxu1  ;;  %7250 = vmatmul.mubr.msk.f32.gmra.mxu1 %vm383_vm2, %v11989_v31  ;;  %v11996_v45 = vld [vmem:[#allocation25_spill] sm:$0xff]  ;;  %v11997_v31 = vld [vmem:[#allocation54_spill] sm:$0xff] }
 0x211   :  { %7350 = vmatprep.mubr.msk.f32.mxu0 %vm383_vm2, %v11821_v8  ;;  %v10526_v63 = vadd.f32 %v3665_v52, %v3510_v28  ;;  %v3513_v33 = vadd.f32 %v7007_v30, %v11990_v59  ;;  %7252 = vmatprep.mubr.msk.f32.mxu1 %vm383_vm2, %v11991_v24  ;;  %v11998_v59 = vld [vmem:[#allocation146_spill] sm:$0xff]  ;;  %v11999_v24 = vld [vmem:[#allocation56_spill] sm:$0xff] }
 0x212   :  { %v3675_v55 = vpop.f32.mrf.mxu0  ;;  %v3209_v11 = vpop.f32.mrf.mxu1 }
 0x213   :  { %v10531_v1 = vadd.f32 %v7105_v18, %v3513_v33  ;;  %v3512_v7 = vadd.f32 %v3209_v11, %v10066_v57 }
 0x214   :  { %v7108_v42 = vpop.f32.mrf.mxu0  ;;  %7351 = vmatmul.mubr.msk.f32.gmra.mxu0 %vm383_vm2, %v11992_v40  ;;  %v7010_v38 = vpop.f32.mrf.mxu1  ;;  %7253 = vmatmul.mubr.msk.f32.gmra.mxu1 %vm383_vm2, %v11993_v44  ;;  %v12000_v40 = vld [vmem:[#allocation29_spill] sm:$0xff] }
 0x215   :  { %7353 = vmatprep.mubr.msk.f32.mxu0 %vm383_vm2, %v11826_v25  ;;  %v10540_v8 = vadd.f32 %v3675_v55, %v3512_v7  ;;  %v3515_v0 = vadd.f32 %v7010_v38, %v11994_v50  ;;  %7255 = vmatprep.mubr.msk.f32.mxu1 %vm383_vm2, %v11995_v53  ;;  %v12001_v44 = vld [vmem:[#allocation61_spill] sm:$0xff]  ;;  %v12002_v50 = vld [vmem:[#allocation147_spill] sm:$0xff]  ;;  %v12003_v53 = vld [vmem:[#allocation64_spill] sm:$0xff] }
 0x216   :  { %v3685_v52 = vpop.f32.mrf.mxu0  ;;  %v3219_v57 = vpop.f32.mrf.mxu1 }
 0x217   :  { %v10545_v48 = vadd.f32 %v7108_v42, %v3515_v0  ;;  %v3514_v28 = vadd.f32 %v3219_v57, %v10080_v5 }
 0x218   :  { %v7111_v18 = vpop.f32.mrf.mxu0  ;;  %7354 = vmatmul.mubr.msk.f32.gmra.mxu0 %vm383_vm2, %v11996_v45  ;;  %v7013_v30 = vpop.f32.mrf.mxu1  ;;  %7256 = vmatmul.mubr.msk.f32.gmra.mxu1 %vm383_vm2, %v11997_v31  ;;  %v12004_v45 = vld [vmem:[#allocation31_spill] sm:$0xff]  ;;  %v12005_v31 = vld [vmem:[#allocation68_spill] sm:$0xff] }
 0x219   :  { %7356 = vmatprep.mubr.msk.f32.mxu0 %vm383_vm2, %v11831_v36  ;;  %v10554_v25 = vadd.f32 %v3685_v52, %v3514_v28  ;;  %v3517_v33 = vadd.f32 %v7013_v30, %v11998_v59  ;;  %7258 = vmatprep.mubr.msk.f32.mxu1 %vm383_vm2, %v11999_v24  ;;  %v12006_v59 = vld [vmem:[#allocation148_spill] sm:$0xff]  ;;  %v12007_v24 = vld [vmem:[#allocation71_spill] sm:$0xff] }
 0x21a   :  { %v3695_v55 = vpop.f32.mrf.mxu0  ;;  %v3229_v5 = vpop.f32.mrf.mxu1 }
 0x21b   :  { %v10559_v11 = vadd.f32 %v7111_v18, %v3517_v33  ;;  %v3516_v7 = vadd.f32 %v3229_v5, %v10094_v49 }
 0x21c   :  { %v7114_v42 = vpop.f32.mrf.mxu0  ;;  %7357 = vmatmul.mubr.msk.f32.gmra.mxu0 %vm383_vm2, %v12000_v40  ;;  %v7016_v38 = vpop.f32.mrf.mxu1  ;;  %7259 = vmatmul.mubr.msk.f32.gmra.mxu1 %vm383_vm2, %v12001_v44  ;;  %v12008_v40 = vld [vmem:[#allocation37_spill] sm:$0xff]  ;;  %v12009_v44 = vld [vmem:[#allocation75_spill] sm:$0xff] }
 0x21d   :  { %7359 = vmatprep.mubr.msk.f32.mxu0 %vm383_vm2, %v11836_v34  ;;  %v10568_v36 = vadd.f32 %v3695_v55, %v3516_v7  ;;  %v3519_v0 = vadd.f32 %v7016_v38, %v12002_v50  ;;  %7261 = vmatprep.mubr.msk.f32.mxu1 %vm383_vm2, %v12003_v53  ;;  %v12010_v50 = vld [vmem:[#allocation149_spill] sm:$0xff] }
 0x21e   :  { %v3705_v52 = vpop.f32.mrf.mxu0  ;;  %v3239_v49 = vpop.f32.mrf.mxu1  ;;  %v12011_v53 = vld [vmem:[#allocation77_spill] sm:$0xff] }
 0x21f   :  { %v10573_v57 = vadd.f32 %v7114_v42, %v3519_v0  ;;  %v3518_v28 = vadd.f32 %v3239_v49, %v10108_v47 }
 0x220   :  { %v7117_v18 = vpop.f32.mrf.mxu0  ;;  %7360 = vmatmul.mubr.msk.f32.gmra.mxu0 %vm383_vm2, %v12004_v45  ;;  %v7019_v30 = vpop.f32.mrf.mxu1  ;;  %7262 = vmatmul.mubr.msk.f32.gmra.mxu1 %vm383_vm2, %v12005_v31  ;;  %v12013_v31 = vld [vmem:[#allocation152_spill] sm:$0xff] }
 0x221   :  { %7362 = vmatprep.mubr.msk.f32.mxu0 %vm383_vm2, %v11841_v21  ;;  %v10582_v34 = vadd.f32 %v3705_v52, %v3518_v28  ;;  %v3521_v33 = vadd.f32 %v7019_v30, %v12006_v59  ;;  %7264 = vmatprep.mubr.msk.f32.mxu1 %vm383_vm2, %v12007_v24  ;;  %v12012_v30 = vld [vmem:[#allocation82_spill] sm:$0xff] }
 0x222   :  { %v3715_v55 = vpop.f32.mrf.mxu0  ;;  %v3249_v47 = vpop.f32.mrf.mxu1 }
 0x223   :  { %v10587_v5 = vadd.f32 %v7117_v18, %v3521_v33  ;;  %v3520_v7 = vadd.f32 %v3249_v47, %v10122_v43 }
 0x224   :  { %v7120_v42 = vpop.f32.mrf.mxu0  ;;  %7363 = vmatmul.mubr.msk.f32.gmra.mxu0 %vm383_vm2, %v12008_v40  ;;  %v7022_v38 = vpop.f32.mrf.mxu1  ;;  %7265 = vmatmul.mubr.msk.f32.gmra.mxu1 %vm383_vm2, %v12009_v44  ;;  %v12016_v40 = vld [vmem:[#allocation90_spill] sm:$0xff]  ;;  %v12018_v44 = vld [vmem:[#allocation96_spill] sm:$0xff] }
 0x225   :  { %7365 = vmatprep.mubr.msk.f32.mxu0 %vm383_vm2, %v11846_v15  ;;  %v10596_v21 = vadd.f32 %v3715_v55, %v3520_v7  ;;  %v3523_v0 = vadd.f32 %v7022_v38, %v12010_v50  ;;  %7267 = vmatprep.mubr.msk.f32.mxu1 %vm383_vm2, %v12011_v53  ;;  %v12014_v55 = vld [vmem:[#allocation85_spill] sm:$0xff] }
 0x226   :  { %v3725_v52 = vpop.f32.mrf.mxu0  ;;  %v3259_v43 = vpop.f32.mrf.mxu1  ;;  %v12015_v7 = vld [vmem:[#allocation45_spill] sm:$0xff] }
 0x227   :  { %v10601_v49 = vadd.f32 %v7120_v42, %v3523_v0  ;;  %v3522_v28 = vadd.f32 %v3259_v43, %v10136_v41  ;;  %v12020_v43 = vld [vmem:[#allocation150_spill] sm:$0xff] }
 0x228   :  { %v7123_v18 = vpop.f32.mrf.mxu0  ;;  %7366 = vmatmul.mubr.msk.f32.gmra.mxu0 %vm383_vm2, %v11849_v22  ;;  %v7025_v45 = vpop.f32.mrf.mxu1  ;;  %7268 = vmatmul.mubr.msk.f32.gmra.mxu1 %vm383_vm2, %v12012_v30 }
 0x229   :  { %7368 = vmatprep.mubr.msk.f32.mxu0 %vm383_vm2, %v11851_v6  ;;  %v10610_v15 = vadd.f32 %v3725_v52, %v3522_v28  ;;  %v3525_v59 = vadd.f32 %v7025_v45, %v12013_v31  ;;  %7270 = vmatprep.mubr.msk.f32.mxu1 %vm383_vm2, %v12014_v55  ;;  %v12017_v6 = vld [vmem:[#allocation49_spill] sm:$0xff]  ;;  %v12021_v45 = vld [vmem:[#allocation51_spill] sm:$0xff]  ;;  %v12022_v31 = vld [vmem:[#allocation100_spill] sm:$0xff] }
 0x22a   :  { %v3735_v33 = vpop.f32.mrf.mxu0  ;;  %v3269_v41 = vpop.f32.mrf.mxu1  ;;  %v12019_v52 = vld [vmem:[#allocation93_spill] sm:$0xff] }
 0x22b   :  { %v10615_v24 = vadd.f32 %v7123_v18, %v3525_v59  ;;  %v3524_v22 = vadd.f32 %v3269_v41, %v10150_v60 }
 0x22c   :  { %v7126_v47 = vpop.f32.mrf.mxu0  ;;  %7369 = vmatmul.mubr.msk.f32.gmra.mxu0 %vm383_vm2, %v12015_v7  ;;  %v7028_v42 = vpop.f32.mrf.mxu1  ;;  %7271 = vmatmul.mubr.msk.f32.gmra.mxu1 %vm383_vm2, %v12016_v40 }
 0x22d   :  { %7371 = vmatprep.mubr.msk.f32.mxu0 %vm383_vm2, %v12017_v6  ;;  %v10624_v38 = vadd.f32 %v3735_v33, %v3524_v22  ;;  %v3527_v50 = vadd.f32 %v7028_v42, %v12018_v44  ;;  %7273 = vmatprep.mubr.msk.f32.mxu1 %vm383_vm2, %v12019_v52  ;;  %v12023_v33 = vld [vmem:[#allocation151_spill] sm:$0xff]  ;;  %v12024_v22 = vld [vmem:[#allocation102_spill] sm:$0xff] }
 0x22e   :  { %v3745_v0 = vpop.f32.mrf.mxu0  ;;  %v3279_v60 = vpop.f32.mrf.mxu1  ;;  %v12025_v44 = vld [vmem:[#allocation106_spill] sm:$0xff] }
 0x22f   :  { %v10629_v53 = vadd.f32 %v7126_v47, %v3527_v50  ;;  %v3526_v28 = vadd.f32 %v3279_v60, %v12020_v43  ;;  %v12026_v50 = vld [vmem:[#allocation154_spill] sm:$0xff]  ;;  %v12027_v60 = vld [vmem:[#allocation108_spill] sm:$0xff] }
 0x230   :  { %v7129_v18 = vpop.f32.mrf.mxu0  ;;  %7372 = vmatmul.mubr.msk.f32.gmra.mxu0 %vm383_vm2, %v12021_v45  ;;  %v7031_v30 = vpop.f32.mrf.mxu1  ;;  %7274 = vmatmul.mubr.msk.f32.gmra.mxu1 %vm383_vm2, %v12022_v31 }
 0x231   :  { %7374 = vmatprep.mubr.msk.f32.mxu0 %vm383_vm2, %v11862_v56  ;;  %v10638_v59 = vadd.f32 %v3745_v0, %v3526_v28  ;;  %v3529_v55 = vadd.f32 %v7031_v30, %v12023_v33  ;;  %7276 = vmatprep.mubr.msk.f32.mxu1 %vm383_vm2, %v12024_v22  ;;  %v12028_v28 = vld [vmem:[#allocation155_spill] sm:$0xff]  ;;  %v12029_v30 = vld [vmem:[#allocation110_spill] sm:$0xff]  ;;  %v12030_v33 = vld [vmem:[#allocation153_spill] sm:$0xff] }
 0x232   :  { %v3755_v41 = vpop.f32.mrf.mxu0  ;;  %v3289_v47 = vpop.f32.mrf.mxu1  ;;  %v12031_v22 = vld [vmem:[#allocation112_spill] sm:$0xff] }
 0x233   :  { %v10643_v7 = vadd.f32 %v7129_v18, %v3529_v55  ;;  %v3528_v42 = vadd.f32 %v3289_v47, %v10178_v37  ;;  %v4518_v47 = vrot.slane %v10234_v51, 2 }
 0x234   :  { %v7132_v40 = vpop.f32.mrf.mxu0  ;;  %7375 = vmatmul.mubr.msk.f32.gmra.mxu0 %vm383_vm2, %v11866_v61  ;;  %v7034_v6 = vpop.f32.mrf.mxu1  ;;  %7277 = vmatmul.mubr.msk.f32.gmra.mxu1 %vm383_vm2, %v12025_v44 }
 0x235   :  { %7377 = vmatprep.mubr.msk.f32.mxu0 %vm383_vm2, %v11869_v10  ;;  %v10652_v56 = vadd.f32 %v3755_v41, %v3528_v42  ;;  %v3531_v0 = vadd.f32 %v7034_v6, %v12026_v50  ;;  %7279 = vmatprep.mubr.msk.f32.mxu1 %vm383_vm2, %v12027_v60  ;;  %v4517_v10 = vrot.slane %v10216_v62, 2  ;;  %v4045_v42 = vrot.slane %v10216_v62, 1  ;;  %v12033_v60 = vld [vmem:[#allocation114_spill] sm:$0xff] }
 0x236   :  { %v3765_v52 = vpop.f32.mrf.mxu0  ;;  %v3299_v37 = vpop.f32.mrf.mxu1 }
 0x237   :  { %v10657_v43 = vadd.f32 %v7132_v40, %v3531_v0  ;;  %v3530_v61 = vadd.f32 %v3299_v37, %v12028_v28  ;;  %v12032_v0 = vld [vmem:[#allocation65_spill] sm:$0xff] }
 0x238   :  { %v7135_v18 = vpop.f32.mrf.mxu0  ;;  %7378 = vmatmul.mubr.msk.f32.gmra.mxu0 %vm383_vm2, %v11871_v2  ;;  %v7037_v45 = vpop.f32.mrf.mxu1  ;;  %7280 = vmatmul.mubr.msk.f32.gmra.mxu1 %vm383_vm2, %v12029_v30  ;;  %v122_v2 = vld [vmem:[%s11013_s0 + $0x358] sm:$0x3]  ;;  %v12034_v28 = vld [vmem:[#allocation157_spill] sm:$0xff] }
 0x239   :  { %7380 = vmatprep.mubr.msk.f32.mxu0 %vm383_vm2, %v11873_v19  ;;  %v10667_v31 = vadd.f32 %v3765_v52, %v3530_v61  ;;  %v3533_v55 = vadd.f32 %v7037_v45, %v12030_v33  ;;  %7282 = vmatprep.mubr.msk.f32.mxu1 %vm383_vm2, %v12031_v22  ;;  %v4046_v19 = vrot.slane %v10234_v51, 1  ;;  %v4520_v37 = vrot.slane %v122_v2, 2 }
 0x23a   :  { %v3775_v41 = vpop.f32.mrf.mxu0  ;;  %v3309_v40 = vpop.f32.mrf.mxu1  ;;  %v4048_v45 = vrot.slane %v122_v2, 1 }
 0x23b   :  { %v10678_v6 = vadd.f32 %v7135_v18, %v3533_v55  ;;  %v3532_v44 = vadd.f32 %v3309_v40, %v10208_v26  ;;  %v12035_v18 = vld [vmem:[#allocation190_spill] sm:$0xff]  ;;  %v4519_v26 = vsel %vm1417_vm3, %v4517_v10, %v4518_v47  ;;  %v4047_v33 = vsel %vm220_vm1, %v4045_v42, %v4046_v19  ;;  %v12036_v40 = vld [vmem:[#allocation192_spill] sm:$0xff] }
 0x23c   :  { %v7138_v50 = vpop.f32.mrf.mxu0  ;;  %7381 = vmatmul.mubr.msk.f32.gmra.mxu0 %vm383_vm2, %v12032_v0  ;;  %v7040_v52 = vpop.f32.mrf.mxu1  ;;  %7283 = vmatmul.mubr.msk.f32.gmra.mxu1 %vm383_vm2, %v12033_v60  ;;  %v4521_v10 = vsel %vm1417_vm3, %v4518_v47, %v4520_v37 }
 0x23d   :  { %7383 = vmatprep.mubr.msk.f32.mxu0 %vm383_vm2, %v10220_v14  ;;  %v10687_v62 = vadd.f32 %v3775_v41, %v3532_v44  ;;  %v3535_v51 = vadd.f32 %v7040_v52, %v12034_v28  ;;  %7285 = vmatprep.mubr.msk.f32.mxu1 %vm383_vm2, %v12035_v18  ;;  %v12037_v44 = vld [vmem:[#allocation158_spill] sm:$0xff] }
 0x23e   :  { %v3785_v61 = vpop.f32.mrf.mxu0  ;;  %v3319_v30 = vpop.f32.mrf.mxu1 }
 0x23f   :  { %v10694_v55 = vadd.f32 %v7138_v50, %v3535_v51  ;;  %v3534_v22 = vadd.f32 %v3319_v30, %v10236_v46  ;;  %v4049_v46 = vsel %vm220_vm1, %v4046_v19, %v4048_v45 }
 0x240   :  { %v7141_v14 = vpop.f32.mrf.mxu0  ;;  %7384 = vmatmul.mubr.msk.f32.gmra.mxu0 %vm383_vm2, %v10242_v58  ;;  %v7043_v41 = vpop.f32.mrf.mxu1  ;;  %7286 = vmatmul.mubr.msk.f32.gmra.mxu1 %vm383_vm2, %v12036_v40 }
 0x241   :  { %7386 = vmatprep.mubr.msk.f32.mxu0 %vm383_vm2, %v4519_v26  ;;  %v10703_v2 = vadd.f32 %v3785_v61, %v3534_v22  ;;  %v3537_v42 = vadd.f32 %v7043_v41, %v12037_v44  ;;  %7288 = vmatprep.mubr.msk.f32.mxu1 %vm383_vm2, %v4047_v33  ;;  %v12038_v44 = vld [vmem:[#allocation160_spill] sm:$0xff] }
 0x242   :  { %v3795_v50 = vpop.f32.mrf.mxu0  ;;  %v3329_v0 = vpop.f32.mrf.mxu1 }
 0x243   :  { %v10708_v52 = vadd.f32 %v7141_v14, %v3537_v42  ;;  %v3536_v58 = vadd.f32 %v3329_v0, %v10253_v3  ;;  %v12039_v0 = vld [vmem:[#allocation17_spill] sm:$0xff] }
 0x244   :  { %v7144_v60 = vpop.f32.mrf.mxu0  ;;  %7387 = vmatmul.mubr.msk.f32.gmra.mxu0 %vm383_vm2, %v4521_v10  ;;  %v7046_v28 = vpop.f32.mrf.mxu1  ;;  %7289 = vmatmul.mubr.msk.f32.gmra.mxu1 %vm383_vm2, %v4049_v46 }
 0x245   :  { %v10713_v47 = vadd.f32 %v3795_v50, %v3536_v58  ;;  %v3539_v37 = vadd.f32 %v7046_v28, %v10258_v9 }
 0x246   :  { %v3805_v51 = vpop.f32.mrf.mxu0  ;;  %v3339_v61 = vpop.f32.mrf.mxu1 }
 0x247   :  { %v10716_v18 = vadd.f32 %v7144_v60, %v3539_v37  ;;  %v3538_v19 = vadd.f32 %v3339_v61, %v10267_v4  ;;  %v12040_v37 = vld [vmem:[#allocation161_spill] sm:$0xff] }
 0x248   :  { %v7147_v26 = vpop.f32.mrf.mxu0  ;;  %v7049_v45 = vpop.f32.mrf.mxu1 }
 0x249   :  { %v10719_v30 = vadd.f32 %v3805_v51, %v3538_v19  ;;  %v3541_v3 = vadd.f32 %v7049_v45, %v10272_v23 }
 0x24a   :  { %v3815_v33 = vpop.f32.mrf.mxu0  ;;  %v3349_v22 = vpop.f32.mrf.mxu1 }
 0x24b   :  { %v10722_v14 = vadd.f32 %v7147_v26, %v3541_v3  ;;  %v3540_v41 = vadd.f32 %v3349_v22, %v10281_v39  ;;  %v12041_v26 = vld [vmem:[#allocation6_spill] sm:$0xff] }
 0x24c   :  { %v7150_v40 = vpop.f32.mrf.mxu0  ;;  %v7052_v9 = vpop.f32.mrf.mxu1 }
 0x24d   :  { %v10725_v10 = vadd.f32 %v3815_v33, %v3540_v41  ;;  %v3543_v42 = vadd.f32 %v7052_v9, %v12038_v44  ;;  %v12043_v41 = vld [vmem:[#allocation13_spill] sm:$0xff] }
 0x24e   :  { %v3825_v50 = vpop.f32.mrf.mxu0  ;;  %v3359_v4 = vpop.f32.mrf.mxu1 }
 0x24f   :  { %v10728_v46 = vadd.f32 %v7150_v40, %v3543_v42  ;;  %v3542_v58 = vadd.f32 %v3359_v4, %v12039_v0 }
 0x250   :  { %v7153_v60 = vpop.f32.mrf.mxu0  ;;  %v7055_v23 = vpop.f32.mrf.mxu1 }
 0x251   :  { %v10731_v28 = vadd.f32 %v3825_v50, %v3542_v58  ;;  %v3545_v51 = vadd.f32 %v7055_v23, %v12040_v37  ;;  %v12045_v50 = vld [vmem:[#allocation163_spill] sm:$0xff] }
 0x252   :  { %v3835_v61 = vpop.f32.mrf.mxu0  ;;  %v3369_v39 = vpop.f32.mrf.mxu1 }
 0x253   :  { %v10734_v19 = vadd.f32 %v7153_v60, %v3545_v51  ;;  %v3544_v45 = vadd.f32 %v3369_v39, %v12041_v26  ;;  %v12047_v60 = vld [vmem:[#allocation7_spill] sm:$0xff] }
 0x254   :  { %v7156_v3 = vpop.f32.mrf.mxu0  ;;  %v7058_v33 = vpop.f32.mrf.mxu1 }
 0x255   :  { %v10737_v22 = vadd.f32 %v3835_v61, %v3544_v45  ;;  %v3547_v40 = vadd.f32 %v7058_v33, %v12043_v41  ;;  %v12049_v61 = vld [vmem:[#allocation162_spill] sm:$0xff] }
 0x256   :  { %v3845_v9 = vpop.f32.mrf.mxu0  ;;  %v3379_v44 = vpop.f32.mrf.mxu1 }
 0x257   :  { %12042 = vst [vmem:[#allocation26_spill] sm:$0xff] %v10737_v22  ;;  %v10740_v42 = vadd.f32 %v7156_v3, %v3547_v40  ;;  %v3546_v4 = vadd.f32 %v3379_v44, %v12045_v50  ;;  %v12051_v3 = vld [vmem:[#allocation8_spill] sm:$0xff] }
 0x258   :  { %v7159_v0 = vpop.f32.mrf.mxu0  ;;  %v7061_v58 = vpop.f32.mrf.mxu1 }
 0x259   :  { %12044 = vst [vmem:[#allocation175_spill] sm:$0xff] %v10740_v42  ;;  %v10743_v23 = vadd.f32 %v3845_v9, %v3546_v4  ;;  %v3549_v37 = vadd.f32 %v7061_v58, %v12047_v60  ;;  %v12053_v9 = vld [vmem:[#allocation165_spill] sm:$0xff] }
 0x25a   :  { %v3855_v51 = vpop.f32.mrf.mxu0  ;;  %v3389_v39 = vpop.f32.mrf.mxu1 }
 0x25b   :  { %12046 = vst [vmem:[#allocation174_spill] sm:$0xff] %v10743_v23  ;;  %v10746_v26 = vadd.f32 %v7159_v0, %v3549_v37  ;;  %v3548_v45 = vadd.f32 %v3389_v39, %v12049_v61  ;;  %v12055_v0 = vld [vmem:[#allocation164_spill] sm:$0xff] }
 0x25c   :  { %v7162_v22 = vpop.f32.mrf.mxu0  ;;  %v7064_v33 = vpop.f32.mrf.mxu1 }
 0x25d   :  { %12048 = vst [vmem:[#allocation30_spill] sm:$0xff] %v10746_v26  ;;  %v10749_v41 = vadd.f32 %v3855_v51, %v3548_v45  ;;  %v3551_v40 = vadd.f32 %v7064_v33, %v12051_v3  ;;  %v12057_v51 = vld [vmem:[#allocation10_spill] sm:$0xff] }
 0x25e   :  { %v3865_v42 = vpop.f32.mrf.mxu0  ;;  %v3399_v44 = vpop.f32.mrf.mxu1 }
 0x25f   :  { %12050 = vst [vmem:[#allocation177_spill] sm:$0xff] %v10749_v41  ;;  %v10752_v50 = vadd.f32 %v7162_v22, %v3551_v40  ;;  %v3550_v4 = vadd.f32 %v3399_v44, %v12053_v9  ;;  %v12059_v22 = vld [vmem:[#allocation167_spill] sm:$0xff] }
 0x260   :  { %v7165_v23 = vpop.f32.mrf.mxu0  ;;  %v7067_v58 = vpop.f32.mrf.mxu1 }
 0x261   :  { %12052 = vst [vmem:[#allocation176_spill] sm:$0xff] %v10752_v50  ;;  %v10755_v60 = vadd.f32 %v3865_v42, %v3550_v4  ;;  %v3553_v37 = vadd.f32 %v7067_v58, %v12055_v0  ;;  %v12061_v42 = vld [vmem:[#allocation166_spill] sm:$0xff] }
 0x262   :  { %v3875_v26 = vpop.f32.mrf.mxu0  ;;  %v3409_v39 = vpop.f32.mrf.mxu1 }
 0x263   :  { %12054 = vst [vmem:[#allocation35_spill] sm:$0xff] %v10755_v60  ;;  %v10758_v61 = vadd.f32 %v7165_v23, %v3553_v37  ;;  %v3552_v45 = vadd.f32 %v3409_v39, %v12057_v51  ;;  %v12063_v23 = vld [vmem:[#allocation14_spill] sm:$0xff] }
 0x264   :  { %v7168_v41 = vpop.f32.mrf.mxu0  ;;  %v7070_v33 = vpop.f32.mrf.mxu1 }
 0x265   :  { %12056 = vst [vmem:[#allocation179_spill] sm:$0xff] %v10758_v61  ;;  %v10761_v3 = vadd.f32 %v3875_v26, %v3552_v45  ;;  %v3555_v40 = vadd.f32 %v7070_v33, %v12059_v22  ;;  %v12065_v26 = vld [vmem:[#allocation169_spill] sm:$0xff] }
 0x266   :  { %v3885_v50 = vpop.f32.mrf.mxu0  ;;  %v3419_v44 = vpop.f32.mrf.mxu1 }
 0x267   :  { %12058 = vst [vmem:[#allocation178_spill] sm:$0xff] %v10761_v3  ;;  %v10764_v9 = vadd.f32 %v7168_v41, %v3555_v40  ;;  %v3554_v4 = vadd.f32 %v3419_v44, %v12061_v42  ;;  %v12067_v41 = vld [vmem:[#allocation168_spill] sm:$0xff] }
 0x268   :  { %v7171_v60 = vpop.f32.mrf.mxu0  ;;  %v7073_v58 = vpop.f32.mrf.mxu1 }
 0x269   :  { %12060 = vst [vmem:[#allocation38_spill] sm:$0xff] %v10764_v9  ;;  %v10767_v0 = vadd.f32 %v3885_v50, %v3554_v4  ;;  %v3557_v37 = vadd.f32 %v7073_v58, %v12063_v23  ;;  %v12069_v50 = vld [vmem:[#allocation19_spill] sm:$0xff] }
 0x26a   :  { %v3895_v61 = vpop.f32.mrf.mxu0  ;;  %v3429_v39 = vpop.f32.mrf.mxu1 }
 0x26b   :  { %12062 = vst [vmem:[#allocation181_spill] sm:$0xff] %v10767_v0  ;;  %v10770_v51 = vadd.f32 %v7171_v60, %v3557_v37  ;;  %v3556_v45 = vadd.f32 %v3429_v39, %v12065_v26  ;;  %v12071_v60 = vld [vmem:[#allocation171_spill] sm:$0xff] }
 0x26c   :  { %v7174_v3 = vpop.f32.mrf.mxu0  ;;  %v7076_v33 = vpop.f32.mrf.mxu1 }
 0x26d   :  { %12064 = vst [vmem:[#allocation43_spill] sm:$0xff] %v10770_v51  ;;  %v10773_v22 = vadd.f32 %v3895_v61, %v3556_v45  ;;  %v3559_v40 = vadd.f32 %v7076_v33, %v12067_v41  ;;  %v12073_v61 = vld [vmem:[#allocation170_spill] sm:$0xff] }
 0x26e   :  { %v3905_v9 = vpop.f32.mrf.mxu0  ;;  %v3439_v44 = vpop.f32.mrf.mxu1 }
 0x26f   :  { %12066 = vst [vmem:[#allocation180_spill] sm:$0xff] %v10773_v22  ;;  %v10776_v42 = vadd.f32 %v7174_v3, %v3559_v40  ;;  %v3558_v4 = vadd.f32 %v3439_v44, %v12069_v50  ;;  %v12074_v3 = vld [vmem:[#allocation22_spill] sm:$0xff] }
 0x270   :  { %v7177_v0 = vpop.f32.mrf.mxu0  ;;  %v7079_v58 = vpop.f32.mrf.mxu1 }
 0x271   :  { %12068 = vst [vmem:[#allocation44_spill] sm:$0xff] %v10776_v42  ;;  %v10779_v23 = vadd.f32 %v3905_v9, %v3558_v4  ;;  %v3561_v37 = vadd.f32 %v7079_v58, %v12071_v60  ;;  %v12075_v9 = vld [vmem:[#allocation173_spill] sm:$0xff] }
 0x272   :  { %v3915_v51 = vpop.f32.mrf.mxu0  ;;  %v3449_v39 = vpop.f32.mrf.mxu1 }
 0x273   :  { %12070 = vst [vmem:[#allocation182_spill] sm:$0xff] %v10779_v23  ;;  %v10782_v26 = vadd.f32 %v7177_v0, %v3561_v37  ;;  %v3560_v45 = vadd.f32 %v3449_v39, %v12073_v61  ;;  %v12076_v0 = vld [vmem:[#allocation172_spill] sm:$0xff] }
 0x274   :  { %v7180_v22 = vpop.f32.mrf.mxu0  ;;  %v7082_v33 = vpop.f32.mrf.mxu1 }
 0x275   :  { %12072 = vst [vmem:[#allocation183_spill] sm:$0xff] %v10782_v26  ;;  %v10785_v41 = vadd.f32 %v3915_v51, %v3560_v45  ;;  %v3563_v40 = vadd.f32 %v7082_v33, %v12074_v3 }
 0x276   :  { %v3925_v42 = vpop.f32.mrf.mxu0  ;;  %v3459_v44 = vpop.f32.mrf.mxu1 }
 0x277   :  { %v10788_v50 = vadd.f32 %v7180_v22, %v3563_v40  ;;  %v3562_v4 = vadd.f32 %v3459_v44, %v12075_v9 }
 0x278   :  { %v7183_v23 = vpop.f32.mrf.mxu0  ;;  %v7085_v58 = vpop.f32.mrf.mxu1 }
 0x279   :  { %v10791_v60 = vadd.f32 %v3925_v42, %v3562_v4  ;;  %v3565_v37 = vadd.f32 %v7085_v58, %v12076_v0 }
 0x27a   :  { %v3935_v26 = vpop.f32.mrf.mxu0  ;;  %v3469_v39 = vpop.f32.mrf.mxu1 }
 0x27b   :  { %v10794_v61 = vadd.f32 %v7183_v23, %v3565_v37  ;;  %v3564_v51 = vadd.f32 %v3469_v39, %v10456_v35 }
 0x27c   :  { %v7186_v45 = vpop.f32.mrf.mxu0  ;;  %v7088_v33 = vpop.f32.mrf.mxu1 }
 0x27d   :  { %v10797_v3 = vadd.f32 %v3935_v26, %v3564_v51  ;;  %v3567_v22 = vadd.f32 %v7088_v33, %v10463_v17 }
 0x27e   :  { %v3945_v40 = vpop.f32.mrf.mxu0  ;;  %v3479_v44 = vpop.f32.mrf.mxu1 }
 0x27f   :  { %v10800_v9 = vadd.f32 %v7186_v45, %v3567_v22  ;;  %v3566_v42 = vadd.f32 %v3479_v44, %v10472_v12 }
 0x280   :  { %v7189_v4 = vpop.f32.mrf.mxu0  ;;  %v7091_v58 = vpop.f32.mrf.mxu1 }
 0x281   :  { %v10803_v0 = vadd.f32 %v3945_v40, %v3566_v42  ;;  %v3569_v23 = vadd.f32 %v7091_v58, %v10477_v32 }
 0x282   :  { %v3955_v37 = vpop.f32.mrf.mxu0  ;;  %v3489_v35 = vpop.f32.mrf.mxu1 }
 0x283   :  { %v10806_v39 = vadd.f32 %v7189_v4, %v3569_v23  ;;  %v3568_v26 = vadd.f32 %v3489_v35, %v10484_v54  ;;  %v10821_v54 = vld [vmem:[%s11015_s2] ss:$0 sm:$0xff] }
 0x284   :  { %v7192_v51 = vpop.f32.mrf.mxu0  ;;  %v7094_v17 = vpop.f32.mrf.mxu1 }
 0x285   :  { %v10809_v33 = vadd.f32 %v3955_v37, %v3568_v26  ;;  %v3571_v45 = vadd.f32 %v7094_v17, %v10489_v20 }
 0x286   :  { %v3965_v22 = vpop.f32.mrf.mxu0  ;;  %v3499_v12 = vpop.f32.mrf.mxu1 }
 0x287   :  { %v10812_v44 = vadd.f32 %v7192_v51, %v3571_v45  ;;  %v3570_v40 = vadd.f32 %v3499_v12, %v10498_v16 }
 0x288   :  { %v7295_v42 = vpop.f32.mrf.mxu0  ;;  %v7197_v32 = vpop.f32.mrf.mxu1 }
 0x289   :  { %12077 = vst [vmem:[#allocation186_spill] sm:$0xff] %v10812_v44  ;;  %v10815_v58 = vadd.f32 %v3965_v22, %v3570_v40  ;;  %v4449_v4 = vadd.f32 %v7197_v32, %v10503_v27 }
 0x28a   :  { %v4601_v23 = vpop.f32.mrf.mxu0  ;;  %v4129_v37 = vpop.f32.mrf.mxu1 }
 0x28b   :  { %12078 = vst [vmem:[#allocation184_spill] sm:$0xff] %v10815_v58  ;;  %v4921_v20 = vadd.f32 %v7295_v42, %v4449_v4  ;;  %v4448_v35 = vadd.f32 %v4129_v37, %v10512_v29 }
 0x28c   :  { %v7298_v26 = vpop.f32.mrf.mxu0  ;;  %v7200_v51 = vpop.f32.mrf.mxu1 }
 0x28d   :  { %v4992_v16 = vadd.f32 %v10821_v54, %v4921_v20  ;;  %v4920_v17 = vadd.f32 %v4601_v23, %v4448_v35  ;;  %v4451_v45 = vadd.f32 %v7200_v51, %v10517_v13 }
 0x28e   :  { %v4611_v22 = vpop.f32.mrf.mxu0  ;;  %v4139_v27 = vpop.f32.mrf.mxu1 }
 0x28f   :  { %vm5056_vm5 = vcmp.ge.f32.partialorder %v4992_v16, 0.0  ;;  %v5120_v12 = vmul.f32 0.2, %v4992_v16  ;;  %v4991_v40 = vadd.f32 %v10821_v54, %v4920_v17  ;;  %v4923_v32 = vadd.f32 %v7298_v26, %v4451_v45 }
 0x290   :  { %v7301_v58 = vpop.f32.mrf.mxu0  ;;  %v4450_v42 = vadd.f32 %v4139_v27, %v10526_v63  ;;  %v7203_v4 = vpop.f32.mrf.mxu1 }
 0x291   :  { %v5184_v29 = vsel %vm5056_vm5, %v4992_v16, %v5120_v12  ;;  %vm5055_vm6 = vcmp.ge.f32.partialorder %v4991_v40, 0.0  ;;  %v5119_v37 = vmul.f32 0.2, %v4991_v40  ;;  %v4994_v20 = vadd.f32 %v10821_v54, %v4923_v32 }
 0x292   :  { %v4621_v23 = vpop.f32.mrf.mxu0  ;;  %5249 = vst.msk [vmem:[#allocation2 + $0x8] sm:$0xff] %vm5247_vm4, %v5184_v29  ;;  %v4922_v13 = vadd.f32 %v4611_v22, %v4450_v42  ;;  %v4453_v35 = vadd.f32 %v7203_v4, %v10531_v1  ;;  %v4149_v51 = vpop.f32.mrf.mxu1 }
 0x293   :  { %v5183_v44 = vsel %vm5055_vm6, %v4991_v40, %v5119_v37  ;;  %vm5058_vm7 = vcmp.ge.f32.partialorder %v4994_v20, 0.0  ;;  %v5122_v17 = vmul.f32 0.2, %v4994_v20  ;;  %v4452_v26 = vadd.f32 %v4149_v51, %v10540_v8 }
 0x294   :  { %v7304_v45 = vpop.f32.mrf.mxu0  ;;  %5248 = vst.msk [vmem:[#allocation2] sm:$0xff] %vm5247_vm4, %v5183_v44  ;;  %v4993_v63 = vadd.f32 %v10821_v54, %v4922_v13  ;;  %v4925_v16 = vadd.f32 %v7301_v58, %v4453_v35  ;;  %v7206_v27 = vpop.f32.mrf.mxu1 }
 0x295   :  { %v5186_v12 = vsel %vm5058_vm7, %v4994_v20, %v5122_v17  ;;  %v4924_v32 = vadd.f32 %v4621_v23, %v4452_v26  ;;  %v4455_v29 = vadd.f32 %v7206_v27, %v10545_v48 }
 0x296   :  { %v4631_v22 = vpop.f32.mrf.mxu0  ;;  %5251 = vst.msk [vmem:[#allocation2 + $0x18] sm:$0xff] %vm5247_vm4, %v5186_v12  ;;  %vm5057_vm8 = vcmp.ge.f32.partialorder %v4993_v63, 0.0  ;;  %v5121_v1 = vmul.f32 0.2, %v4993_v63  ;;  %v4996_v40 = vadd.f32 %v10821_v54, %v4925_v16  ;;  %v4159_v42 = vpop.f32.mrf.mxu1 }
 0x297   :  { %v4995_v8 = vadd.f32 %v10821_v54, %v4924_v32  ;;  %v4927_v4 = vadd.f32 %v7304_v45, %v4455_v29  ;;  %v4454_v44 = vadd.f32 %v4159_v42, %v10554_v25 }
 0x298   :  { %v7307_v37 = vpop.f32.mrf.mxu0  ;;  %v5185_v58 = vsel %vm5057_vm8, %v4993_v63, %v5121_v1  ;;  %vm5060_vm9 = vcmp.ge.f32.partialorder %v4996_v40, 0.0  ;;  %v5124_v20 = vmul.f32 0.2, %v4996_v40  ;;  %v7209_v23 = vpop.f32.mrf.mxu1 }
 0x299   :  { %5250 = vst.msk [vmem:[#allocation2 + $0x10] sm:$0xff] %vm5247_vm4, %v5185_v58  ;;  %vm5059_vm10 = vcmp.ge.f32.partialorder %v4995_v8, 0.0  ;;  %v5123_v48 = vmul.f32 0.2, %v4995_v8  ;;  %v4998_v13 = vadd.f32 %v10821_v54, %v4927_v4  ;;  %v4926_v35 = vadd.f32 %v4631_v22, %v4454_v44 }
 0x29a   :  { %v4641_v51 = vpop.f32.mrf.mxu0  ;;  %v5188_v17 = vsel %vm5060_vm9, %v4996_v40, %v5124_v20  ;;  %v4457_v26 = vadd.f32 %v7209_v23, %v10559_v11  ;;  %v4169_v16 = vpop.f32.mrf.mxu1 }
 0x29b   :  { %5253 = vst.msk [vmem:[#allocation2 + $0x28] sm:$0xff] %vm5247_vm4, %v5188_v17  ;;  %v5187_v25 = vsel %vm5059_vm10, %v4995_v8, %v5123_v48  ;;  %vm5062_vm11 = vcmp.ge.f32.partialorder %v4998_v13, 0.0  ;;  %v5126_v45 = vmul.f32 0.2, %v4998_v13  ;;  %v4997_v63 = vadd.f32 %v10821_v54, %v4926_v35 }
 0x29c   :  { %v7310_v27 = vpop.f32.mrf.mxu0  ;;  %5252 = vst.msk [vmem:[#allocation2 + $0x20] sm:$0xff] %vm5247_vm4, %v5187_v25  ;;  %v4929_v12 = vadd.f32 %v7307_v37, %v4457_v26  ;;  %v4456_v32 = vadd.f32 %v4169_v16, %v10568_v36  ;;  %v7212_v29 = vpop.f32.mrf.mxu1 }
 0x29d   :  { %v5190_v22 = vsel %vm5062_vm11, %v4998_v13, %v5126_v45  ;;  %vm5061_vm12 = vcmp.ge.f32.partialorder %v4997_v63, 0.0  ;;  %v5125_v1 = vmul.f32 0.2, %v4997_v63  ;;  %v4459_v11 = vadd.f32 %v7212_v29, %v10573_v57 }
 0x29e   :  { %v4651_v40 = vpop.f32.mrf.mxu0  ;;  %5255 = vst.msk [vmem:[#allocation2 + $0x38] sm:$0xff] %vm5247_vm4, %v5190_v22  ;;  %v5000_v42 = vadd.f32 %v10821_v54, %v4929_v12  ;;  %v4928_v8 = vadd.f32 %v4641_v51, %v4456_v32  ;;  %v4179_v4 = vpop.f32.mrf.mxu1 }
 0x29f   :  { %v5189_v44 = vsel %vm5061_vm12, %v4997_v63, %v5125_v1  ;;  %v4931_v58 = vadd.f32 %v7310_v27, %v4459_v11  ;;  %v4458_v20 = vadd.f32 %v4179_v4, %v10582_v34 }
 0x2a0   :  { %v7313_v37 = vpop.f32.mrf.mxu0  ;;  %5254 = vst.msk [vmem:[#allocation2 + $0x30] sm:$0xff] %vm5247_vm4, %v5189_v44  ;;  %vm5064_vm13 = vcmp.ge.f32.partialorder %v5000_v42, 0.0  ;;  %v5128_v36 = vmul.f32 0.2, %v5000_v42  ;;  %v4999_v23 = vadd.f32 %v10821_v54, %v4928_v8  ;;  %v7215_v48 = vpop.f32.mrf.mxu1 }
 0x2a1   :  { %v5002_v57 = vadd.f32 %v10821_v54, %v4931_v58  ;;  %v4930_v13 = vadd.f32 %v4651_v40, %v4458_v20  ;;  %v4461_v35 = vadd.f32 %v7215_v48, %v10587_v5 }
 0x2a2   :  { %v4661_v17 = vpop.f32.mrf.mxu0  ;;  %v5192_v51 = vsel %vm5064_vm13, %v5000_v42, %v5128_v36  ;;  %vm5063_vm14 = vcmp.ge.f32.partialorder %v4999_v23, 0.0  ;;  %v5127_v26 = vmul.f32 0.2, %v4999_v23  ;;  %v4189_v16 = vpop.f32.mrf.mxu1 }
 0x2a3   :  { %5257 = vst.msk [vmem:[#allocation2 + $0x48] sm:$0xff] %vm5247_vm4, %v5192_v51  ;;  %vm5066_vm15 = vcmp.ge.f32.partialorder %v5002_v57, 0.0  ;;  %v5130_v34 = vmul.f32 0.2, %v5002_v57  ;;  %v5001_v25 = vadd.f32 %v10821_v54, %v4930_v13  ;;  %v4933_v45 = vadd.f32 %v7313_v37, %v4461_v35 }
 0x2a4   :  { %v7316_v63 = vpop.f32.mrf.mxu0  ;;  %v5191_v27 = vsel %vm5063_vm14, %v4999_v23, %v5127_v26  ;;  %v4460_v12 = vadd.f32 %v4189_v16, %v10596_v21  ;;  %v7218_v32 = vpop.f32.mrf.mxu1 }
 0x2a5   :  { %5256 = vst.msk [vmem:[#allocation2 + $0x40] sm:$0xff] %vm5247_vm4, %v5191_v27  ;;  %v5194_v5 = vsel %vm5066_vm15, %v5002_v57, %v5130_v34  ;;  %vm5065_vm0 = vcmp.ge.f32.partialorder %v5001_v25, 0.0  ;;  %v5129_v29 = vmul.f32 0.2, %v5001_v25  ;;  %v5004_v22 = vadd.f32 %v10821_v54, %v4933_v45 }
 0x2a6   :  { %v4671_v1 = vpop.f32.mrf.mxu0  ;;  %5259 = vst.msk [vmem:[#allocation2 + $0x58] sm:$0xff] %vm5247_vm4, %v5194_v5  ;;  %v4932_v11 = vadd.f32 %v4661_v17, %v4460_v12  ;;  %v4463_v40 = vadd.f32 %v7218_v32, %v10601_v49  ;;  %v4199_v42 = vpop.f32.mrf.mxu1 }
 0x2a7   :  { %v5193_v8 = vsel %vm5065_vm0, %v5001_v25, %v5129_v29  ;;  %vm5068_vm1 = vcmp.ge.f32.partialorder %v5004_v22, 0.0  ;;  %v5132_v4 = vmul.f32 0.2, %v5004_v22  ;;  %v4462_v21 = vadd.f32 %v4199_v42, %v10610_v15 }
 0x2a8   :  { %v7319_v44 = vpop.f32.mrf.mxu0  ;;  %5258 = vst.msk [vmem:[#allocation2 + $0x50] sm:$0xff] %vm5247_vm4, %v5193_v8  ;;  %v5003_v58 = vadd.f32 %v10821_v54, %v4932_v11  ;;  %v4935_v20 = vadd.f32 %v7316_v63, %v4463_v40  ;;  %v7221_v37 = vpop.f32.mrf.mxu1 }
 0x2a9   :  { %v5196_v36 = vsel %vm5068_vm1, %v5004_v22, %v5132_v4  ;;  %v4934_v23 = vadd.f32 %v4671_v1, %v4462_v21  ;;  %v4465_v48 = vadd.f32 %v7221_v37, %v10615_v24 }
 0x2aa   :  { %v4681_v57 = vpop.f32.mrf.mxu0  ;;  %5261 = vst.msk [vmem:[#allocation2 + $0x68] sm:$0xff] %vm5247_vm4, %v5196_v36  ;;  %vm5067_vm2 = vcmp.ge.f32.partialorder %v5003_v58, 0.0  ;;  %v5131_v49 = vmul.f32 0.2, %v5003_v58  ;;  %v5006_v13 = vadd.f32 %v10821_v54, %v4935_v20  ;;  %v4209_v35 = vpop.f32.mrf.mxu1 }
 0x2ab   :  { %v5005_v15 = vadd.f32 %v10821_v54, %v4934_v23  ;;  %v4937_v17 = vadd.f32 %v7319_v44, %v4465_v48  ;;  %v4464_v51 = vadd.f32 %v4209_v35, %v10624_v38 }
 0x2ac   :  { %v7322_v26 = vpop.f32.mrf.mxu0  ;;  %v5195_v16 = vsel %vm5067_vm2, %v5003_v58, %v5131_v49  ;;  %vm5070_vm3 = vcmp.ge.f32.partialorder %v5006_v13, 0.0  ;;  %v5134_v34 = vmul.f32 0.2, %v5006_v13  ;;  %v7224_v25 = vpop.f32.mrf.mxu1 }
 0x2ad   :  { %5260 = vst.msk [vmem:[#allocation2 + $0x60] sm:$0xff] %vm5247_vm4, %v5195_v16  ;;  %vm5069_vm5 = vcmp.ge.f32.partialorder %v5005_v15, 0.0  ;;  %v5133_v24 = vmul.f32 0.2, %v5005_v15  ;;  %v5008_v45 = vadd.f32 %v10821_v54, %v4937_v17  ;;  %v4936_v63 = vadd.f32 %v4681_v57, %v4464_v51 }
 0x2ae   :  { %v4691_v27 = vpop.f32.mrf.mxu0  ;;  %v5198_v12 = vsel %vm5070_vm3, %v5006_v13, %v5134_v34  ;;  %v4467_v32 = vadd.f32 %v7224_v25, %v10629_v53  ;;  %v4219_v5 = vpop.f32.mrf.mxu1 }
 0x2af   :  { %5263 = vst.msk [vmem:[#allocation2 + $0x78] sm:$0xff] %vm5247_vm4, %v5198_v12  ;;  %v5197_v38 = vsel %vm5069_vm5, %v5005_v15, %v5133_v24  ;;  %vm5072_vm6 = vcmp.ge.f32.partialorder %v5008_v45, 0.0  ;;  %v5136_v29 = vmul.f32 0.2, %v5008_v45  ;;  %v5007_v22 = vadd.f32 %v10821_v54, %v4936_v63 }
 0x2b0   :  { %v7325_v1 = vpop.f32.mrf.mxu0  ;;  %5262 = vst.msk [vmem:[#allocation2 + $0x70] sm:$0xff] %vm5247_vm4, %v5197_v38  ;;  %v4939_v11 = vadd.f32 %v7322_v26, %v4467_v32  ;;  %v4466_v40 = vadd.f32 %v4219_v5, %v10638_v59  ;;  %v7227_v42 = vpop.f32.mrf.mxu1 }
 0x2b1   :  { %v5200_v8 = vsel %vm5072_vm6, %v5008_v45, %v5136_v29  ;;  %vm5071_vm7 = vcmp.ge.f32.partialorder %v5007_v22, 0.0  ;;  %v5135_v4 = vmul.f32 0.2, %v5007_v22  ;;  %v4469_v53 = vadd.f32 %v7227_v42, %v10643_v7 }
 0x2b2   :  { %v4701_v21 = vpop.f32.mrf.mxu0  ;;  %5265 = vst.msk [vmem:[#allocation2 + $0x88] sm:$0xff] %vm5247_vm4, %v5200_v8  ;;  %v5010_v44 = vadd.f32 %v10821_v54, %v4939_v11  ;;  %v4938_v58 = vadd.f32 %v4691_v27, %v4466_v40  ;;  %v4229_v20 = vpop.f32.mrf.mxu1 }
 0x2b3   :  { %v5199_v37 = vsel %vm5071_vm7, %v5007_v22, %v5135_v4  ;;  %v4941_v36 = vadd.f32 %v7325_v1, %v4469_v53  ;;  %v4468_v23 = vadd.f32 %v4229_v20, %v10652_v56 }
 0x2b4   :  { %v7328_v48 = vpop.f32.mrf.mxu0  ;;  %5264 = vst.msk [vmem:[#allocation2 + $0x80] sm:$0xff] %vm5247_vm4, %v5199_v37  ;;  %vm5074_vm8 = vcmp.ge.f32.partialorder %v5010_v44, 0.0  ;;  %v5138_v59 = vmul.f32 0.2, %v5010_v44  ;;  %v5009_v57 = vadd.f32 %v10821_v54, %v4938_v58  ;;  %v7230_v49 = vpop.f32.mrf.mxu1 }
 0x2b5   :  { %v5012_v7 = vadd.f32 %v10821_v54, %v4941_v36  ;;  %v4940_v13 = vadd.f32 %v4701_v21, %v4468_v23  ;;  %v4471_v35 = vadd.f32 %v7230_v49, %v10657_v43 }
 0x2b6   :  { %v4711_v15 = vpop.f32.mrf.mxu0  ;;  %v5202_v17 = vsel %vm5074_vm8, %v5010_v44, %v5138_v59  ;;  %vm5073_vm9 = vcmp.ge.f32.partialorder %v5009_v57, 0.0  ;;  %v5137_v51 = vmul.f32 0.2, %v5009_v57  ;;  %v4239_v26 = vpop.f32.mrf.mxu1 }
 0x2b7   :  { %5267 = vst.msk [vmem:[#allocation2 + $0x98] sm:$0xff] %vm5247_vm4, %v5202_v17  ;;  %vm5076_vm10 = vcmp.ge.f32.partialorder %v5012_v7, 0.0  ;;  %v5140_v56 = vmul.f32 0.2, %v5012_v7  ;;  %v5011_v16 = vadd.f32 %v10821_v54, %v4940_v13  ;;  %v4943_v34 = vadd.f32 %v7328_v48, %v4471_v35 }
 0x2b8   :  { %v7331_v25 = vpop.f32.mrf.mxu0  ;;  %v5201_v24 = vsel %vm5073_vm9, %v5009_v57, %v5137_v51  ;;  %v4470_v45 = vadd.f32 %v4239_v26, %v10667_v31  ;;  %v7233_v63 = vpop.f32.mrf.mxu1 }
 0x2b9   :  { %5266 = vst.msk [vmem:[#allocation2 + $0x90] sm:$0xff] %vm5247_vm4, %v5201_v24  ;;  %v5204_v43 = vsel %vm5076_vm10, %v5012_v7, %v5140_v56  ;;  %vm5075_vm11 = vcmp.ge.f32.partialorder %v5011_v16, 0.0  ;;  %v5139_v27 = vmul.f32 0.2, %v5011_v16  ;;  %v5014_v12 = vadd.f32 %v10821_v54, %v4943_v34 }
 0x2ba   :  { %v4721_v32 = vpop.f32.mrf.mxu0  ;;  %5269 = vst.msk [vmem:[#allocation2 + $0xa8] sm:$0xff] %vm5247_vm4, %v5204_v43  ;;  %v4942_v5 = vadd.f32 %v4711_v15, %v4470_v45  ;;  %v4473_v38 = vadd.f32 %v7233_v63, %v10678_v6  ;;  %v4249_v29 = vpop.f32.mrf.mxu1 }
 0x2bb   :  { %v5203_v22 = vsel %vm5075_vm11, %v5011_v16, %v5139_v27  ;;  %vm5078_vm12 = vcmp.ge.f32.partialorder %v5014_v12, 0.0  ;;  %v5142_v1 = vmul.f32 0.2, %v5014_v12  ;;  %v4472_v31 = vadd.f32 %v4249_v29, %v10687_v62 }
 0x2bc   :  { %v7334_v11 = vpop.f32.mrf.mxu0  ;;  %5268 = vst.msk [vmem:[#allocation2 + $0xa0] sm:$0xff] %vm5247_vm4, %v5203_v22  ;;  %v5013_v40 = vadd.f32 %v10821_v54, %v4942_v5  ;;  %v4945_v42 = vadd.f32 %v7331_v25, %v4473_v38  ;;  %v7236_v8 = vpop.f32.mrf.mxu1 }
 0x2bd   :  { %v5206_v4 = vsel %vm5078_vm12, %v5014_v12, %v5142_v1  ;;  %v4944_v53 = vadd.f32 %v4721_v32, %v4472_v31  ;;  %v4475_v21 = vadd.f32 %v7236_v8, %v10694_v55 }
 0x2be   :  { %v4731_v44 = vpop.f32.mrf.mxu0  ;;  %5271 = vst.msk [vmem:[#allocation2 + $0xb8] sm:$0xff] %vm5247_vm4, %v5206_v4  ;;  %vm5077_vm13 = vcmp.ge.f32.partialorder %v5013_v40, 0.0  ;;  %v5141_v6 = vmul.f32 0.2, %v5013_v40  ;;  %v5016_v58 = vadd.f32 %v10821_v54, %v4945_v42  ;;  %v4259_v20 = vpop.f32.mrf.mxu1 }
 0x2bf   :  { %v5015_v62 = vadd.f32 %v10821_v54, %v4944_v53  ;;  %v4947_v37 = vadd.f32 %v7334_v11, %v4475_v21  ;;  %v4474_v36 = vadd.f32 %v4259_v20, %v10703_v2 }
 0x2c0   :  { %v7337_v23 = vpop.f32.mrf.mxu0  ;;  %v5205_v48 = vsel %vm5077_vm13, %v5013_v40, %v5141_v6  ;;  %vm5080_vm14 = vcmp.ge.f32.partialorder %v5016_v58, 0.0  ;;  %v5144_v59 = vmul.f32 0.2, %v5016_v58  ;;  %v7239_v57 = vpop.f32.mrf.mxu1 }
 0x2c1   :  { %5270 = vst.msk [vmem:[#allocation2 + $0xb0] sm:$0xff] %vm5247_vm4, %v5205_v48  ;;  %vm5079_vm15 = vcmp.ge.f32.partialorder %v5015_v62, 0.0  ;;  %v5143_v55 = vmul.f32 0.2, %v5015_v62  ;;  %v5018_v49 = vadd.f32 %v10821_v54, %v4947_v37  ;;  %v4946_v7 = vadd.f32 %v4731_v44, %v4474_v36 }
 0x2c2   :  { %v4741_v13 = vpop.f32.mrf.mxu0  ;;  %v5208_v35 = vsel %vm5080_vm14, %v5016_v58, %v5144_v59  ;;  %v4477_v15 = vadd.f32 %v7239_v57, %v10708_v52  ;;  %v4269_v17 = vpop.f32.mrf.mxu1 }
 0x2c3   :  { %5273 = vst.msk [vmem:[#allocation2 + $0xc8] sm:$0xff] %vm5247_vm4, %v5208_v35  ;;  %v5207_v2 = vsel %vm5079_vm15, %v5015_v62, %v5143_v55  ;;  %vm5082_vm0 = vcmp.ge.f32.partialorder %v5018_v49, 0.0  ;;  %v5146_v51 = vmul.f32 0.2, %v5018_v49  ;;  %v5017_v26 = vadd.f32 %v10821_v54, %v4946_v7 }
 0x2c4   :  { %v7340_v56 = vpop.f32.mrf.mxu0  ;;  %5272 = vst.msk [vmem:[#allocation2 + $0xc0] sm:$0xff] %vm5247_vm4, %v5207_v2  ;;  %v4949_v16 = vadd.f32 %v7337_v23, %v4477_v15  ;;  %v4476_v34 = vadd.f32 %v4269_v17, %v10713_v47  ;;  %v7242_v25 = vpop.f32.mrf.mxu1 }
 0x2c5   :  { %v5210_v24 = vsel %vm5082_vm0, %v5018_v49, %v5146_v51  ;;  %vm5081_vm1 = vcmp.ge.f32.partialorder %v5017_v26, 0.0  ;;  %v5145_v45 = vmul.f32 0.2, %v5017_v26  ;;  %v4479_v52 = vadd.f32 %v7242_v25, %v10716_v18 }
 0x2c6   :  { %v4751_v63 = vpop.f32.mrf.mxu0  ;;  %5275 = vst.msk [vmem:[#allocation2 + $0xd8] sm:$0xff] %vm5247_vm4, %v5210_v24  ;;  %v5020_v43 = vadd.f32 %v10821_v54, %v4949_v16  ;;  %v4948_v27 = vadd.f32 %v4741_v13, %v4476_v34  ;;  %v4279_v12 = vpop.f32.mrf.mxu1  ;;  %v12079_v34 = vld [vmem:[#allocation26_spill] sm:$0xff] }
 0x2c7   :  { %v5209_v32 = vsel %vm5081_vm1, %v5017_v26, %v5145_v45  ;;  %v4951_v5 = vadd.f32 %v7340_v56, %v4479_v52  ;;  %v4478_v38 = vadd.f32 %v4279_v12, %v10719_v30 }
 0x2c8   :  { %v7343_v29 = vpop.f32.mrf.mxu0  ;;  %5274 = vst.msk [vmem:[#allocation2 + $0xd0] sm:$0xff] %vm5247_vm4, %v5209_v32  ;;  %vm5084_vm2 = vcmp.ge.f32.partialorder %v5020_v43, 0.0  ;;  %v5148_v47 = vmul.f32 0.2, %v5020_v43  ;;  %v5019_v22 = vadd.f32 %v10821_v54, %v4948_v27  ;;  %v7245_v1 = vpop.f32.mrf.mxu1 }
 0x2c9   :  { %v5022_v18 = vadd.f32 %v10821_v54, %v4951_v5  ;;  %v4950_v31 = vadd.f32 %v4751_v63, %v4478_v38  ;;  %v4481_v11 = vadd.f32 %v7245_v1, %v10722_v14  ;;  %v12080_v5 = vld [vmem:[#allocation175_spill] sm:$0xff] }
 0x2ca   :  { %v4761_v40 = vpop.f32.mrf.mxu0  ;;  %v5212_v42 = vsel %vm5084_vm2, %v5020_v43, %v5148_v47  ;;  %vm5083_vm3 = vcmp.ge.f32.partialorder %v5019_v22, 0.0  ;;  %v5147_v8 = vmul.f32 0.2, %v5019_v22  ;;  %v4289_v4 = vpop.f32.mrf.mxu1 }
 0x2cb   :  { %5277 = vst.msk [vmem:[#allocation2 + $0xe8] sm:$0xff] %vm5247_vm4, %v5212_v42  ;;  %vm5086_vm5 = vcmp.ge.f32.partialorder %v5022_v18, 0.0  ;;  %v5150_v30 = vmul.f32 0.2, %v5022_v18  ;;  %v5021_v53 = vadd.f32 %v10821_v54, %v4950_v31  ;;  %v4953_v21 = vadd.f32 %v7343_v29, %v4481_v11  ;;  %v12081_v11 = vld [vmem:[#allocation174_spill] sm:$0xff] }
 0x2cc   :  { %v7346_v44 = vpop.f32.mrf.mxu0  ;;  %v5211_v6 = vsel %vm5083_vm3, %v5019_v22, %v5147_v8  ;;  %v4480_v58 = vadd.f32 %v4289_v4, %v10725_v10  ;;  %v7248_v20 = vpop.f32.mrf.mxu1 }
 0x2cd   :  { %5276 = vst.msk [vmem:[#allocation2 + $0xe0] sm:$0xff] %vm5247_vm4, %v5211_v6  ;;  %v5214_v14 = vsel %vm5086_vm5, %v5022_v18, %v5150_v30  ;;  %vm5085_vm6 = vcmp.ge.f32.partialorder %v5021_v53, 0.0  ;;  %v5149_v62 = vmul.f32 0.2, %v5021_v53  ;;  %v5024_v37 = vadd.f32 %v10821_v54, %v4953_v21  ;;  %v12082_v30 = vld [vmem:[#allocation30_spill] sm:$0xff] }
 0x2ce   :  { %v4771_v36 = vpop.f32.mrf.mxu0  ;;  %5279 = vst.msk [vmem:[#allocation2 + $0xf8] sm:$0xff] %vm5247_vm4, %v5214_v14  ;;  %v4952_v23 = vadd.f32 %v4761_v40, %v4480_v58  ;;  %v4483_v48 = vadd.f32 %v7248_v20, %v10728_v46  ;;  %v4299_v59 = vpop.f32.mrf.mxu1 }
 0x2cf   :  { %v5213_v57 = vsel %vm5085_vm6, %v5021_v53, %v5149_v62  ;;  %vm5088_vm7 = vcmp.ge.f32.partialorder %v5024_v37, 0.0  ;;  %v5152_v55 = vmul.f32 0.2, %v5024_v37  ;;  %v4482_v10 = vadd.f32 %v4299_v59, %v10731_v28  ;;  %v12083_v62 = vld [vmem:[#allocation177_spill] sm:$0xff] }
 0x2d0   :  { %v7349_v49 = vpop.f32.mrf.mxu0  ;;  %5278 = vst.msk [vmem:[#allocation2 + $0xf0] sm:$0xff] %vm5247_vm4, %v5213_v57  ;;  %v5023_v7 = vadd.f32 %v10821_v54, %v4952_v23  ;;  %v4955_v13 = vadd.f32 %v7346_v44, %v4483_v48  ;;  %v7251_v35 = vpop.f32.mrf.mxu1 }
 0x2d1   :  { %v5216_v15 = vsel %vm5088_vm7, %v5024_v37, %v5152_v55  ;;  %v4954_v17 = vadd.f32 %v4771_v36, %v4482_v10  ;;  %v4485_v2 = vadd.f32 %v7251_v35, %v10734_v19  ;;  %v12084_v10 = vld [vmem:[#allocation176_spill] sm:$0xff] }
 0x2d2   :  { %v4781_v51 = vpop.f32.mrf.mxu0  ;;  %5281 = vst.msk [vmem:[#allocation2 + $0x108] sm:$0xff] %vm5247_vm4, %v5216_v15  ;;  %vm5087_vm8 = vcmp.ge.f32.partialorder %v5023_v7, 0.0  ;;  %v5151_v46 = vmul.f32 0.2, %v5023_v7  ;;  %v5026_v26 = vadd.f32 %v10821_v54, %v4955_v13  ;;  %v4309_v56 = vpop.f32.mrf.mxu1 }
 0x2d3   :  { %v5025_v28 = vadd.f32 %v10821_v54, %v4954_v17  ;;  %v4957_v16 = vadd.f32 %v7349_v49, %v4485_v2  ;;  %v4484_v25 = vadd.f32 %v4309_v56, %v12079_v34  ;;  %v12085_v56 = vld [vmem:[#allocation35_spill] sm:$0xff] }
 0x2d4   :  { %v7352_v24 = vpop.f32.mrf.mxu0  ;;  %v5215_v45 = vsel %vm5087_vm8, %v5023_v7, %v5151_v46  ;;  %vm5090_vm9 = vcmp.ge.f32.partialorder %v5026_v26, 0.0  ;;  %v5154_v52 = vmul.f32 0.2, %v5026_v26  ;;  %v7254_v63 = vpop.f32.mrf.mxu1 }
 0x2d5   :  { %5280 = vst.msk [vmem:[#allocation2 + $0x100] sm:$0xff] %vm5247_vm4, %v5215_v45  ;;  %vm5089_vm10 = vcmp.ge.f32.partialorder %v5025_v28, 0.0  ;;  %v5153_v19 = vmul.f32 0.2, %v5025_v28  ;;  %v5028_v43 = vadd.f32 %v10821_v54, %v4957_v16  ;;  %v4956_v27 = vadd.f32 %v4781_v51, %v4484_v25 }
 0x2d6   :  { %v4791_v12 = vpop.f32.mrf.mxu0  ;;  %v5218_v32 = vsel %vm5090_vm9, %v5026_v26, %v5154_v52  ;;  %v4487_v38 = vadd.f32 %v7254_v63, %v12080_v5  ;;  %v4319_v29 = vpop.f32.mrf.mxu1  ;;  %v12086_v63 = vld [vmem:[#allocation179_spill] sm:$0xff] }
 0x2d7   :  { %5283 = vst.msk [vmem:[#allocation2 + $0x118] sm:$0xff] %vm5247_vm4, %v5218_v32  ;;  %v5217_v47 = vsel %vm5089_vm10, %v5025_v28, %v5153_v19  ;;  %vm5092_vm11 = vcmp.ge.f32.partialorder %v5028_v43, 0.0  ;;  %v5156_v22 = vmul.f32 0.2, %v5028_v43  ;;  %v5027_v1 = vadd.f32 %v10821_v54, %v4956_v27  ;;  %v12087_v32 = vld [vmem:[#allocation178_spill] sm:$0xff] }
 0x2d8   :  { %v7355_v18 = vpop.f32.mrf.mxu0  ;;  %5282 = vst.msk [vmem:[#allocation2 + $0x110] sm:$0xff] %vm5247_vm4, %v5217_v47  ;;  %v4959_v31 = vadd.f32 %v7352_v24, %v4487_v38  ;;  %v4486_v40 = vadd.f32 %v4319_v29, %v12081_v11  ;;  %v7257_v42 = vpop.f32.mrf.mxu1 }
 0x2d9   :  { %v5220_v8 = vsel %vm5092_vm11, %v5028_v43, %v5156_v22  ;;  %vm5091_vm12 = vcmp.ge.f32.partialorder %v5027_v1, 0.0  ;;  %v5155_v4 = vmul.f32 0.2, %v5027_v1  ;;  %v4489_v53 = vadd.f32 %v7257_v42, %v12082_v30 }
 0x2da   :  { %v4801_v21 = vpop.f32.mrf.mxu0  ;;  %5285 = vst.msk [vmem:[#allocation2 + $0x128] sm:$0xff] %vm5247_vm4, %v5220_v8  ;;  %v5030_v44 = vadd.f32 %v10821_v54, %v4959_v31  ;;  %v4958_v6 = vadd.f32 %v4791_v12, %v4486_v40  ;;  %v4329_v58 = vpop.f32.mrf.mxu1  ;;  %v12088_v31 = vld [vmem:[#allocation38_spill] sm:$0xff] }
 0x2db   :  { %v5219_v20 = vsel %vm5091_vm12, %v5027_v1, %v5155_v4  ;;  %v4961_v14 = vadd.f32 %v7355_v18, %v4489_v53  ;;  %v4488_v37 = vadd.f32 %v4329_v58, %v12083_v62 }
 0x2dc   :  { %v7358_v36 = vpop.f32.mrf.mxu0  ;;  %5284 = vst.msk [vmem:[#allocation2 + $0x120] sm:$0xff] %vm5247_vm4, %v5219_v20  ;;  %vm5094_vm13 = vcmp.ge.f32.partialorder %v5030_v44, 0.0  ;;  %v5158_v23 = vmul.f32 0.2, %v5030_v44  ;;  %v5029_v48 = vadd.f32 %v10821_v54, %v4958_v6  ;;  %v7260_v59 = vpop.f32.mrf.mxu1 }
 0x2dd   :  { %v5032_v57 = vadd.f32 %v10821_v54, %v4961_v14  ;;  %v4960_v55 = vadd.f32 %v4801_v21, %v4488_v37  ;;  %v4491_v49 = vadd.f32 %v7260_v59, %v12084_v10  ;;  %v12089_v21 = vld [vmem:[#allocation181_spill] sm:$0xff]  ;;  %v12090_v59 = vld [vmem:[#allocation43_spill] sm:$0xff] }
 0x2de   :  { %v4811_v7 = vpop.f32.mrf.mxu0  ;;  %v5222_v13 = vsel %vm5094_vm13, %v5030_v44, %v5158_v23  ;;  %vm5093_vm14 = vcmp.ge.f32.partialorder %v5029_v48, 0.0  ;;  %v5157_v35 = vmul.f32 0.2, %v5029_v48  ;;  %v4339_v15 = vpop.f32.mrf.mxu1 }
 0x2df   :  { %5287 = vst.msk [vmem:[#allocation2 + $0x138] sm:$0xff] %vm5247_vm4, %v5222_v13  ;;  %vm5096_vm15 = vcmp.ge.f32.partialorder %v5032_v57, 0.0  ;;  %v5160_v17 = vmul.f32 0.2, %v5032_v57  ;;  %v5031_v2 = vadd.f32 %v10821_v54, %v4960_v55  ;;  %v4963_v51 = vadd.f32 %v7358_v36, %v4491_v49 }
 0x2e0   :  { %v7361_v46 = vpop.f32.mrf.mxu0  ;;  %v5221_v26 = vsel %vm5093_vm14, %v5029_v48, %v5157_v35  ;;  %v4490_v28 = vadd.f32 %v4339_v15, %v12085_v56  ;;  %v7263_v16 = vpop.f32.mrf.mxu1  ;;  %v12091_v15 = vld [vmem:[#allocation180_spill] sm:$0xff] }
 0x2e1   :  { %5286 = vst.msk [vmem:[#allocation2 + $0x130] sm:$0xff] %vm5247_vm4, %v5221_v26  ;;  %v5224_v34 = vsel %vm5096_vm15, %v5032_v57, %v5160_v17  ;;  %vm5095_vm0 = vcmp.ge.f32.partialorder %v5031_v2, 0.0  ;;  %v5159_v25 = vmul.f32 0.2, %v5031_v2  ;;  %v5034_v24 = vadd.f32 %v10821_v54, %v4963_v51  ;;  %v12092_v26 = vld [vmem:[#allocation44_spill] sm:$0xff] }
 0x2e2   :  { %v4821_v45 = vpop.f32.mrf.mxu0  ;;  %5289 = vst.msk [vmem:[#allocation2 + $0x148] sm:$0xff] %vm5247_vm4, %v5224_v34  ;;  %v4962_v52 = vadd.f32 %v4811_v7, %v4490_v28  ;;  %v4493_v19 = vadd.f32 %v7263_v16, %v12086_v63  ;;  %v4349_v43 = vpop.f32.mrf.mxu1 }
 0x2e3   :  { %v5223_v27 = vsel %vm5095_vm0, %v5031_v2, %v5159_v25  ;;  %vm5098_vm1 = vcmp.ge.f32.partialorder %v5034_v24, 0.0  ;;  %v5162_v12 = vmul.f32 0.2, %v5034_v24  ;;  %v4492_v5 = vadd.f32 %v4349_v43, %v12087_v32 }
 0x2e4   :  { %v7364_v38 = vpop.f32.mrf.mxu0  ;;  %5288 = vst.msk [vmem:[#allocation2 + $0x140] sm:$0xff] %vm5247_vm4, %v5223_v27  ;;  %v5033_v29 = vadd.f32 %v10821_v54, %v4962_v52  ;;  %v4965_v47 = vadd.f32 %v7361_v46, %v4493_v19  ;;  %v7266_v22 = vpop.f32.mrf.mxu1  ;;  %v12093_v52 = vld [vmem:[#allocation182_spill] sm:$0xff] }
 0x2e5   :  { %v5226_v1 = vsel %vm5098_vm1, %v5034_v24, %v5162_v12  ;;  %v4964_v18 = vadd.f32 %v4821_v45, %v4492_v5  ;;  %v4495_v11 = vadd.f32 %v7266_v22, %v12088_v31 }
 0x2e6   :  { %v4831_v40 = vpop.f32.mrf.mxu0  ;;  %5291 = vst.msk [vmem:[#allocation2 + $0x158] sm:$0xff] %vm5247_vm4, %v5226_v1  ;;  %vm5097_vm2 = vcmp.ge.f32.partialorder %v5033_v29, 0.0  ;;  %v5161_v42 = vmul.f32 0.2, %v5033_v29  ;;  %v5036_v8 = vadd.f32 %v10821_v54, %v4965_v47  ;;  %v4359_v4 = vpop.f32.mrf.mxu1 }
 0x2e7   :  { %v5035_v30 = vadd.f32 %v10821_v54, %v4964_v18  ;;  %v4967_v53 = vadd.f32 %v7364_v38, %v4495_v11  ;;  %v4494_v44 = vadd.f32 %v4359_v4, %v12089_v21  ;;  %v12094_v38 = vld [vmem:[#allocation183_spill] sm:$0xff] }
 0x2e8   :  { %v7367_v6 = vpop.f32.mrf.mxu0  ;;  %v5225_v58 = vsel %vm5097_vm2, %v5033_v29, %v5161_v42  ;;  %vm5100_vm3 = vcmp.ge.f32.partialorder %v5036_v8, 0.0  ;;  %v5164_v20 = vmul.f32 0.2, %v5036_v8  ;;  %v7269_v14 = vpop.f32.mrf.mxu1 }
 0x2e9   :  { %5290 = vst.msk [vmem:[#allocation2 + $0x150] sm:$0xff] %vm5247_vm4, %v5225_v58  ;;  %vm5099_vm5 = vcmp.ge.f32.partialorder %v5035_v30, 0.0  ;;  %v5163_v62 = vmul.f32 0.2, %v5035_v30  ;;  %v5038_v37 = vadd.f32 %v10821_v54, %v4967_v53  ;;  %v4966_v36 = vadd.f32 %v4831_v40, %v4494_v44 }
 0x2ea   :  { %v4841_v23 = vpop.f32.mrf.mxu0  ;;  %v5228_v48 = vsel %vm5100_vm3, %v5036_v8, %v5164_v20  ;;  %v4497_v57 = vadd.f32 %v7269_v14, %v12090_v59  ;;  %v4369_v55 = vpop.f32.mrf.mxu1 }
 0x2eb   :  { %5293 = vst.msk [vmem:[#allocation2 + $0x168] sm:$0xff] %vm5247_vm4, %v5228_v48  ;;  %v5227_v10 = vsel %vm5099_vm5, %v5035_v30, %v5163_v62  ;;  %vm5102_vm6 = vcmp.ge.f32.partialorder %v5038_v37, 0.0  ;;  %v5166_v49 = vmul.f32 0.2, %v5038_v37  ;;  %v5037_v7 = vadd.f32 %v10821_v54, %v4966_v36 }
 0x2ec   :  { %v7370_v13 = vpop.f32.mrf.mxu0  ;;  %5292 = vst.msk [vmem:[#allocation2 + $0x160] sm:$0xff] %vm5247_vm4, %v5227_v10  ;;  %v4969_v35 = vadd.f32 %v7367_v6, %v4497_v57  ;;  %v4496_v17 = vadd.f32 %v4369_v55, %v12091_v15  ;;  %v7272_v2 = vpop.f32.mrf.mxu1 }
 0x2ed   :  { %v5230_v51 = vsel %vm5102_vm6, %v5038_v37, %v5166_v49  ;;  %vm5101_vm7 = vcmp.ge.f32.partialorder %v5037_v7, 0.0  ;;  %v5165_v46 = vmul.f32 0.2, %v5037_v7  ;;  %v4499_v56 = vadd.f32 %v7272_v2, %v12092_v26 }
 0x2ee   :  { %v4851_v28 = vpop.f32.mrf.mxu0  ;;  %5295 = vst.msk [vmem:[#allocation2 + $0x178] sm:$0xff] %vm5247_vm4, %v5230_v51  ;;  %v5040_v16 = vadd.f32 %v10821_v54, %v4969_v35  ;;  %v4968_v34 = vadd.f32 %v4841_v23, %v4496_v17  ;;  %v4379_v25 = vpop.f32.mrf.mxu1 }
 0x2ef   :  { %v5229_v24 = vsel %vm5101_vm7, %v5037_v7, %v5165_v46  ;;  %v4971_v45 = vadd.f32 %v7370_v13, %v4499_v56  ;;  %v4498_v63 = vadd.f32 %v4379_v25, %v12093_v52 }
 0x2f0   :  { %v7373_v19 = vpop.f32.mrf.mxu0  ;;  %5294 = vst.msk [vmem:[#allocation2 + $0x170] sm:$0xff] %vm5247_vm4, %v5229_v24  ;;  %vm5104_vm8 = vcmp.ge.f32.partialorder %v5040_v16, 0.0  ;;  %v5168_v43 = vmul.f32 0.2, %v5040_v16  ;;  %v5039_v27 = vadd.f32 %v10821_v54, %v4968_v34  ;;  %v7275_v12 = vpop.f32.mrf.mxu1 }
 0x2f1   :  { %v5042_v32 = vadd.f32 %v10821_v54, %v4971_v45  ;;  %v4970_v5 = vadd.f32 %v4851_v28, %v4498_v63  ;;  %v4501_v29 = vadd.f32 %v7275_v12, %v12094_v38  ;;  %v7454_v45 = vld [vmem:[%s11015_s2] ss:$0 sm:$0xff]  ;;  %s7477_s2 = smov [#allocation2]  }
 0x2f2   :  { %v4861_v47 = vpop.f32.mrf.mxu0  ;;  %v5232_v22 = vsel %vm5104_vm8, %v5040_v16, %v5168_v43  ;;  %vm5103_vm9 = vcmp.ge.f32.partialorder %v5039_v27, 0.0  ;;  %v5167_v1 = vmul.f32 0.2, %v5039_v27  ;;  %v4389_v18 = vpop.f32.mrf.mxu1  ;;  %s5317_s13 = sshll.u32 %s7477_s2, 4  ;;  %s5318_s13 = int_to_ptr.vmem [resolvable:$true] %s5317_s13 }
 0x2f3   :  { %5297 = vst.msk [vmem:[#allocation2 + $0x188] sm:$0xff] %vm5247_vm4, %v5232_v22  ;;  %vm5106_vm10 = vcmp.ge.f32.partialorder %v5042_v32, 0.0  ;;  %v5170_v31 = vmul.f32 0.2, %v5042_v32  ;;  %v5041_v11 = vadd.f32 %v10821_v54, %v4970_v5  ;;  %v4973_v40 = vadd.f32 %v7373_v19, %v4501_v29  ;;  %s7455_s14 = scalar_lea.vmem %s5318_s13, 8192  ;;  %p7460_p1 = scmp.lt.s32.totalorder %s5318_s13, %s5318_s13 }
 0x2f4   :  { %v7376_v42 = vpop.f32.mrf.mxu0  ;;  %v5231_v8 = vsel %vm5103_vm9, %v5039_v27, %v5167_v1  ;;  %v4500_v4 = vadd.f32 %v4389_v18, %v10785_v41  ;;  %v7278_v30 = vpop.f32.mrf.mxu1  ;;  %p7456_p0 = scmp.ne.s32.totalorder %s5318_s13, %s7455_s14  ;;  %p7461_p2 = scmp.lt.s32.totalorder %s7455_s14, %s7455_s14 }
 0x2f5   :  { %5296 = vst.msk [vmem:[#allocation2 + $0x180] sm:$0xff] %vm5247_vm4, %v5231_v8  ;;  %v5234_v53 = vsel %vm5106_vm10, %v5042_v32, %v5170_v31  ;;  %vm5105_vm11 = vcmp.ge.f32.partialorder %v5041_v11, 0.0  ;;  %v5169_v21 = vmul.f32 0.2, %v5041_v11  ;;  %v5044_v44 = vadd.f32 %v10821_v54, %v4973_v40 }
 0x2f6   :  { %v4871_v6 = vpop.f32.mrf.mxu0  ;;  %5299 = vst.msk [vmem:[#allocation2 + $0x198] sm:$0xff] %vm5247_vm4, %v5234_v53  ;;  %v4972_v58 = vadd.f32 %v4861_v47, %v4500_v4  ;;  %v4503_v20 = vadd.f32 %v7278_v30, %v10788_v50  ;;  %v4399_v14 = vpop.f32.mrf.mxu1  ;;  %p7462_p3 = por %p7461_p2, %p7460_p1 }
 0x2f7   :  { %v5233_v62 = vsel %vm5105_vm11, %v5041_v11, %v5169_v21  ;;  %vm5108_vm12 = vcmp.ge.f32.partialorder %v5044_v44, 0.0  ;;  %v5172_v37 = vmul.f32 0.2, %v5044_v44  ;;  %v4502_v41 = vadd.f32 %v4399_v14, %v10791_v60 }
 0x2f8   :  { %v7379_v36 = vpop.f32.mrf.mxu0  ;;  %5298 = vst.msk [vmem:[#allocation2 + $0x190] sm:$0xff] %vm5247_vm4, %v5233_v62  ;;  %v5043_v23 = vadd.f32 %v10821_v54, %v4972_v58  ;;  %v4975_v48 = vadd.f32 %v7376_v42, %v4503_v20  ;;  %v7281_v59 = vpop.f32.mrf.mxu1  ;;  %v12095_v42 = vld [vmem:[#allocation186_spill] sm:$0xff]  ;;  %v12096_v58 = vld [vmem:[#allocation184_spill] sm:$0xff]  ;;  %p7463_p4 = pnand %p7462_p3, %p7456_p0 }
 0x2f9   :  { %v5236_v57 = vsel %vm5108_vm12, %v5044_v44, %v5172_v37  ;;  %v4974_v55 = vadd.f32 %v4871_v6, %v4502_v41  ;;  %v4505_v10 = vadd.f32 %v7281_v59, %v10794_v61 }
 0x2fa   :  { %v4881_v49 = vpop.f32.mrf.mxu0  ;;  %5301 = vst.msk [vmem:[#allocation2 + $0x1a8] sm:$0xff] %vm5247_vm4, %v5236_v57  ;;  %vm5107_vm13 = vcmp.ge.f32.partialorder %v5043_v23, 0.0  ;;  %v5171_v50 = vmul.f32 0.2, %v5043_v23  ;;  %v5046_v7 = vadd.f32 %v10821_v54, %v4975_v48  ;;  %v4409_v13 = vpop.f32.mrf.mxu1 }
 0x2fb   :  { %v5045_v60 = vadd.f32 %v10821_v54, %v4974_v55  ;;  %v4977_v35 = vadd.f32 %v7379_v36, %v4505_v10  ;;  %v4504_v15 = vadd.f32 %v4409_v13, %v10797_v3 }
 0x2fc   :  { %v7382_v17 = vpop.f32.mrf.mxu0  ;;  %v5235_v2 = vsel %vm5107_vm13, %v5043_v23, %v5171_v50  ;;  %vm5110_vm14 = vcmp.ge.f32.partialorder %v5046_v7, 0.0  ;;  %v5174_v51 = vmul.f32 0.2, %v5046_v7  ;;  %v7284_v46 = vpop.f32.mrf.mxu1 }
 0x2fd   :  { %5300 = vst.msk [vmem:[#allocation2 + $0x1a0] sm:$0xff] %vm5247_vm4, %v5235_v2  ;;  %vm5109_vm15 = vcmp.ge.f32.partialorder %v5045_v60, 0.0  ;;  %v5173_v61 = vmul.f32 0.2, %v5045_v60  ;;  %v5048_v26 = vadd.f32 %v10821_v54, %v4977_v35  ;;  %v4976_v56 = vadd.f32 %v4881_v49, %v4504_v15 }
 0x2fe   :  { %v4891_v28 = vpop.f32.mrf.mxu0  ;;  %v5238_v16 = vsel %vm5110_vm14, %v5046_v7, %v5174_v51  ;;  %v4507_v34 = vadd.f32 %v7284_v46, %v10800_v9  ;;  %v4419_v25 = vpop.f32.mrf.mxu1 }
 0x2ff   :  { %5303 = vst.msk [vmem:[#allocation2 + $0x1b8] sm:$0xff] %vm5247_vm4, %v5238_v16  ;;  %v5237_v3 = vsel %vm5109_vm15, %v5045_v60, %v5173_v61  ;;  %vm5112_vm0 = vcmp.ge.f32.partialorder %v5048_v26, 0.0  ;;  %v5176_v24 = vmul.f32 0.2, %v5048_v26  ;;  %v5047_v52 = vadd.f32 %v7454_v45, %v4976_v56 }
 0x300   :  { %v7385_v63 = vpop.f32.mrf.mxu0  ;;  %5302 = vst.msk [vmem:[#allocation2 + $0x1b0] sm:$0xff] %vm5247_vm4, %v5237_v3  ;;  %v4979_v54 = vadd.f32 %v7382_v17, %v4507_v34  ;;  %v4506_v19 = vadd.f32 %v4419_v25, %v10803_v0  ;;  %v7287_v43 = vpop.f32.mrf.mxu1 }
 0x301   :  { %v5240_v27 = vsel %vm5112_vm0, %v5048_v26, %v5176_v24  ;;  %vm5111_vm1 = vcmp.ge.f32.partialorder %v5047_v52, 0.0  ;;  %v5175_v9 = vmul.f32 0.2, %v5047_v52  ;;  %v4509_v12 = vadd.f32 %v7287_v43, %v10806_v39 }
 0x302   :  { %v4901_v32 = vpop.f32.mrf.mxu0  ;;  %5305 = vst.msk [vmem:[#allocation2 + $0x1c8] sm:$0xff] %vm5247_vm4, %v5240_v27  ;;  %v5050_v5 = vadd.f32 %v7454_v45, %v4979_v54  ;;  %v4978_v38 = vadd.f32 %v4891_v28, %v4506_v19  ;;  %v4429_v29 = vpop.f32.mrf.mxu1 }
 0x303   :  { %v5239_v47 = vsel %vm5111_vm1, %v5047_v52, %v5175_v9  ;;  %v4981_v22 = vadd.f32 %v7385_v63, %v4509_v12  ;;  %v4508_v1 = vadd.f32 %v4429_v29, %v10809_v33 }
 0x304   :  { %5304 = vst.msk [vmem:[#allocation2 + $0x1c0] sm:$0xff] %vm5247_vm4, %v5239_v47  ;;  %vm5114_vm2 = vcmp.ge.f32.partialorder %v5050_v5, 0.0  ;;  %v5178_v0 = vmul.f32 0.2, %v5050_v5  ;;  %v5049_v18 = vadd.f32 %v7454_v45, %v4978_v38  ;;  %v7290_v31 = vpop.f32.mrf.mxu1  ;;  %v7388_v8 = vpop.f32.mrf.mxu0 }
 0x305   :  { %v5052_v11 = vadd.f32 %v7454_v45, %v4981_v22  ;;  %v4980_v40 = vadd.f32 %v4901_v32, %v4508_v1  ;;  %v4511_v39 = vadd.f32 %v7290_v31, %v12095_v42 }
 0x306   :  { %v5242_v4 = vsel %vm5114_vm2, %v5050_v5, %v5178_v0  ;;  %vm5113_vm3 = vcmp.ge.f32.partialorder %v5049_v18, 0.0  ;;  %v5177_v30 = vmul.f32 0.2, %v5049_v18  ;;  %v4439_v53 = vpop.f32.mrf.mxu1  ;;  %v4911_v41 = vpop.f32.mrf.mxu0 }
 0x307   :  { %5307 = vst.msk [vmem:[#allocation2 + $0x1d8] sm:$0xff] %vm5247_vm4, %v5242_v4  ;;  %vm5116_vm5 = vcmp.ge.f32.partialorder %v5052_v11, 0.0  ;;  %v5180_v21 = vmul.f32 0.2, %v5052_v11  ;;  %v5051_v33 = vadd.f32 %v7454_v45, %v4980_v40  ;;  %v4983_v44 = vadd.f32 %v7388_v8, %v4511_v39 }
 0x308   :  { %v5241_v6 = vsel %vm5113_vm3, %v5049_v18, %v5177_v30  ;;  %v4510_v20 = vadd.f32 %v4439_v53, %v12096_v58 }
 0x309   :  { %5306 = vst.msk [vmem:[#allocation2 + $0x1d0] sm:$0xff] %vm5247_vm4, %v5241_v6  ;;  %v5244_v14 = vsel %vm5116_vm5, %v5052_v11, %v5180_v21  ;;  %vm5115_vm6 = vcmp.ge.f32.partialorder %v5051_v33, 0.0  ;;  %v5179_v62 = vmul.f32 0.2, %v5051_v33  ;;  %v5054_v37 = vadd.f32 %v7454_v45, %v4983_v44 }
 0x30a   :  { %5309 = vst.msk [vmem:[#allocation2 + $0x1e8] sm:$0xff] %vm5247_vm4, %v5244_v14  ;;  %v4982_v36 = vadd.f32 %v4911_v41, %v4510_v20 }
 0x30b   :  { %v5243_v23 = vsel %vm5115_vm6, %v5051_v33, %v5179_v62  ;;  %vm5118_vm7 = vcmp.ge.f32.partialorder %v5054_v37, 0.0  ;;  %v5182_v48 = vmul.f32 0.2, %v5054_v37 }
 0x30c   :  { %5308 = vst.msk [vmem:[#allocation2 + $0x1e0] sm:$0xff] %vm5247_vm4, %v5243_v23  ;;  %v5053_v59 = vadd.f32 %v7454_v45, %v4982_v36 }
 0x30d   :  { %v5246_v57 = vsel %vm5118_vm7, %v5054_v37, %v5182_v48 }
 0x30e   :  { %5311 = vst.msk [vmem:[#allocation2 + $0x1f8] sm:$0xff] %vm5247_vm4, %v5246_v57  ;;  %vm5117_vm8 = vcmp.ge.f32.partialorder %v5053_v59, 0.0  ;;  %v5181_v55 = vmul.f32 0.2, %v5053_v59 }
 0x310   :  { %v5245_v10 = vsel %vm5117_vm8, %v5053_v59, %v5181_v55 }
 0x311   :  { %5310 = vst.msk [vmem:[#allocation2 + $0x1f0] sm:$0xff] %vm5247_vm4, %v5245_v10 }
 0x312   :  { %7466 = shalt.err (!%p7463_p4)
}
 0x313   :  { %s7478_s15 = smov 128   ;;  %s7479_s1 = smov 8  }
 0x314   :  { %5323 = dma.vmem_to_hbm [thread:$0]  %s5318_s13, 8192, %s11016_s3, [#allocation3], %s7478_s15, %s7478_s15, %s7479_s1  }
 0x315   :  { %7475 = dma.done.wait [#allocation3], 8192  }
 0x316   :  { %7476 = vsyncadd [#allocation3], 4294959104 }
 0x317   :  { %5327 = vsyncpa [#allocation3], 1 }

</bundles_post_ra>
